<compile_context>
chip_gen: v7x
topology: tpu7x:2x2x1
jax: 0.10.0
libtpu: 0.0.40
codegen_flags: <defaults>
</compile_context>

<pallas_src>
import math
import functools

import jax
import jax.numpy as jnp
from jax import lax
from jax.experimental import pallas as pl
from jax.experimental.pallas import tpu as pltpu

LN_EPS = 1e-5  # PyTorch TransformerEncoderLayer default layer_norm_eps


# ---------------- shared math helpers -----------------------------------------------------

def _layer_norm(x, w, b):
    mu = jnp.mean(x, axis=-1, keepdims=True)
    xc = x - mu
    var = jnp.mean(xc * xc, axis=-1, keepdims=True)
    return xc * lax.rsqrt(var + LN_EPS) * w + b


def _causal_mask(t):
    r = lax.broadcasted_iota(jnp.int32, (t, t), 0)
    c = lax.broadcasted_iota(jnp.int32, (t, t), 1)
    return c <= r  # position i may attend to j <= i


# ---------------- fused Pallas kernel ------------------------------------------------------

def _attention(q_src, kv_src, wq, bq, wk, bk, wv, bv, wo, bo, neg, nhead):
    """Head-major causal attention, bf16 MXU operands, f32 statistics.

    q_src / kv_src: (T, D) bf16 LayerNorm outputs.
    wq/wk/wv: (H, D, hd) bf16 (1/sqrt(hd) folded into wq/bq); bq/bk/bv: (H, 1, hd) f32.
    wo: (H, hd, D) bf16; bo: (1, D) f32.  neg: (T, T) additive f32 causal mask.
    """
    t, d = q_src.shape
    # Head axis is a leading (major) batch axis: no lane slicing of activations anywhere.
    qb = jnp.broadcast_to(q_src[None], (nhead, t, d))
    kvb = qb if (kv_src is q_src) else jnp.broadcast_to(kv_src[None], (nhead, t, d))

    q = jnp.einsum('htd,hdk->htk', qb, wq, preferred_element_type=jnp.float32) + bq
    k = jnp.einsum('htd,hdk->htk', kvb, wk, preferred_element_type=jnp.float32) + bk
    v = jnp.einsum('htd,hdk->htk', kvb, wv, preferred_element_type=jnp.float32) + bv

    # Scores in f32; mask stays (T, T) and broadcasts over the major head axis in the add.
    s = jnp.einsum('hqd,hkd->hqk', q.astype(jnp.bfloat16), k.astype(jnp.bfloat16),
                   preferred_element_type=jnp.float32)
    s = s + neg[None]
    s = s - jnp.max(s, axis=-1, keepdims=True)
    p = jnp.exp(s)
    # TODO(synk): approx reciprocal (EUP slot) — validate accumulated error at real depth/T.
    p = p * pl.reciprocal(jnp.sum(p, axis=-1, keepdims=True), approx=True)

    o = jnp.einsum('hqk,hkd->hqd', p.astype(jnp.bfloat16), v.astype(jnp.bfloat16),
                   preferred_element_type=jnp.float32)
    # ONE batched output-projection matmul, then a cheap reduction over the major head axis.
    oh = jnp.einsum('hqd,hdo->hqo', o.astype(jnp.bfloat16), wo,
                    preferred_element_type=jnp.float32)
    return jnp.sum(oh, axis=0) + bo


def _fused_kernel(nhead, depth,
                  audio_ref, video_ref,
                  ln1w_ref, ln1b_ref, ln2w_ref, ln2b_ref,
                  wq_ref, bq_ref, wk_ref, bk_ref, wv_ref, bv_ref,
                  wo_ref, bo_ref, w1_ref, b1_ref, w2_ref, b2_ref,
                  o_ref):
    t = audio_ref.shape[1]

    # (T, T) additive causal mask, hoisted once per grid step; never blown up to (H, T, T).
    neg = jnp.where(_causal_mask(t), 0.0, -1e30).astype(jnp.float32)

    a = audio_ref[0]    # (T, D) f32
    vid = video_ref[0]  # (T, D) f32

    x = a
    # TODO(synk): at larger depth switch to lax.fori_loop with dynamic ref[l] indexing
    #             (bounds vreg live ranges); at depth=4 the static unroll is fine.
    for l in range(depth):
        ln1w = ln1w_ref[l]; ln1b = ln1b_ref[l]
        ln2w = ln2w_ref[l]; ln2b = ln2b_ref[l]
        wq = wq_ref[l]; bq = bq_ref[l]
        wk = wk_ref[l]; bk = bk_ref[l]
        wv = wv_ref[l]; bv = bv_ref[l]
        wo = wo_ref[l]; bo = bo_ref[l]
        w1 = w1_ref[l]; b1 = b1_ref[l]
        w2 = w2_ref[l]; b2 = b2_ref[l]

        if l == 0:
            # Cross layer: q = LN1(video), k = v = LN1(audio); residual = audio + video + attn.
            nv = _layer_norm(vid, ln1w, ln1b).astype(jnp.bfloat16)
            na = _layer_norm(a, ln1w, ln1b).astype(jnp.bfloat16)
            x = a + vid + _attention(nv, na, wq, bq, wk, bk, wv, bv, wo, bo, neg, nhead)
        else:
            nx = _layer_norm(x, ln1w, ln1b).astype(jnp.bfloat16)
            x = x + _attention(nx, nx, wq, bq, wk, bk, wv, bv, wo, bo, neg, nhead)

        # FFN (relu), bf16 matmul operands, f32 residual.
        nx2 = _layer_norm(x, ln2w, ln2b).astype(jnp.bfloat16)
        h = jnp.maximum(jnp.dot(nx2, w1, preferred_element_type=jnp.float32) + b1, 0.0)
        x = x + jnp.dot(h.astype(jnp.bfloat16), w2, preferred_element_type=jnp.float32) + b2

    o_ref[0] = x


# ---------------- pallas_call plumbing -----------------------------------------------------

def _full_spec(shape):
    nd = len(shape)
    return pl.BlockSpec(shape, lambda i: (0,) * nd)


def cross_transformer(video, audio, stacked_params, nhead):
    """Pallas implementation of CrossTransformer.forward(video, audio). Single fused call."""
    b, t, d = audio.shape
    depth = stacked_params[0].shape[0]
    act_spec = pl.BlockSpec((1, t, d), lambda i: (i, 0, 0))
    in_specs = [act_spec, act_spec] + [_full_spec(p.shape) for p in stacked_params]
    return pl.pallas_call(
        functools.partial(_fused_kernel, nhead, depth),
        out_shape=jax.ShapeDtypeStruct((b, t, d), jnp.float32),
        grid=(b,),
        in_specs=in_specs,
        out_specs=act_spec,
        compiler_params=pltpu.CompilerParams(dimension_semantics=("parallel",)),
    )(audio, video, *stacked_params)


# ---------------- host-side parameter prep -------------------------------------------------

def init_layer_params(key, d_model, dff):
    """Per-layer parameters in PyTorch nn.TransformerEncoderLayer convention (f32)."""
    ks = jax.random.split(key, 6)
    s = 0.05
    return [
        jnp.ones((1, d_model), jnp.float32),                                 # norm1 weight
        jnp.zeros((1, d_model), jnp.float32),                                # norm1 bias
        jnp.ones((1, d_model), jnp.float32),                                 # norm2 weight
        jnp.zeros((1, d_model), jnp.float32),                                # norm2 bias
        s * jax.random.normal(ks[0], (3 * d_model, d_model), jnp.float32),   # in_proj_weight
        s * jax.random.normal(ks[1], (3, d_model), jnp.float32),             # in_proj_bias (q/k/v)
        s * jax.random.normal(ks[2], (d_model, d_model), jnp.float32),       # out_proj.weight
        s * jax.random.normal(ks[3], (1, d_model), jnp.float32),             # out_proj.bias
        s * jax.random.normal(ks[4], (dff, d_model), jnp.float32),           # linear1.weight
        jnp.zeros((1, dff), jnp.float32),                                    # linear1.bias
        s * jax.random.normal(ks[5], (d_model, dff), jnp.float32),           # linear2.weight
        jnp.zeros((1, d_model), jnp.float32),                                # linear2.bias
    ]


def prepare_params(layer_param_list, nhead):
    """Convert PyTorch-convention per-layer params to the kernel format:
    * stacked along a leading depth axis,
    * q/k/v in-projections split per head on the host -> (H, D, hd) bf16 (no in-kernel slicing),
    * 1/sqrt(hd) folded into the Q projection weight + bias,
    * out_proj split per head -> (H, hd, D) bf16,
    * FFN weights pre-transposed bf16; LN params / biases kept f32."""
    d = layer_param_list[0][0].shape[-1]
    hd = d // nhead
    scale = 1.0 / math.sqrt(hd)
    cols = [[] for _ in range(16)]
    for p in layer_param_list:
        n1w, n1b, n2w, n2b, inw, inb, ow, ob, l1w, l1b, l2w, l2b = p

        def head_w(wt):   # (D_in, D_out) -> (H, D_in, hd)
            return wt.reshape(d, nhead, hd).transpose(1, 0, 2)

        def head_b(bv):   # (D,) -> (H, 1, hd)
            return bv.reshape(nhead, 1, hd)

        wq_h = (head_w(inw[:d].T) * scale).astype(jnp.bfloat16)
        wk_h = head_w(inw[d:2 * d].T).astype(jnp.bfloat16)
        wv_h = head_w(inw[2 * d:].T).astype(jnp.bfloat16)
        bq_h = head_b(inb[0]) * scale
        bk_h = head_b(inb[1])
        bv_h = head_b(inb[2])
        wo_h = ow.T.reshape(nhead, hd, d).astype(jnp.bfloat16)   # (H, hd, D)

        vals = [n1w, n1b, n2w, n2b,
                wq_h, bq_h, wk_h, bk_h, wv_h, bv_h,
                wo_h, ob,
                l1w.T.astype(jnp.bfloat16), l1b,                 # (D, DFF), (1, DFF)
                l2w.T.astype(jnp.bfloat16), l2b]                 # (DFF, D), (1, D)
        for c, v in zip(cols, vals):
            c.append(v)
    return [jnp.stack(c, axis=0) for c in cols]


# ---------------- pure-JAX reference (exact f32 math, no Pallas) ---------------------------

def _mha_ref(q_src, kv_src, in_w, in_b, out_w, out_b, nhead, mask):
    t, d = q_src.shape
    hd = d // nhead
    scale = 1.0 / math.sqrt(hd)
    q = q_src @ in_w[:d, :].T + in_b[0:1, :]
    k = kv_src @ in_w[d:2 * d, :].T + in_b[1:2, :]
    v = kv_src @ in_w[2 * d:, :].T + in_b[2:3, :]
    outs = []
    for h in range(nhead):
        sl = slice(h * hd, (h + 1) * hd)
        s = (q[:, sl] @ k[:, sl].T) * scale
        s = jnp.where(mask, s, -1e30)
        s = s - jnp.max(s, axis=-1, keepdims=True)
        p = jnp.exp(s)
        p = p / jnp.sum(p, axis=-1, keepdims=True)
        outs.append(p @ v[:, sl])
    return jnp.concatenate(outs, axis=-1) @ out_w.T + out_b


def _ffn_ref(x, l1w, l1b, l2w, l2b):
    return jnp.maximum(x @ l1w.T + l1b, 0.0) @ l2w.T + l2b


def _ref_forward(video, audio, cross_params, layer_params, nhead):
    def cross_one(a, v, p):
        ln1w, ln1b, ln2w, ln2b, inw, inb, ow, ob, l1w, l1b, l2w, l2b = p
        mask = _causal_mask(a.shape[0])
        x = a + v + _mha_ref(_layer_norm(v, ln1w, ln1b), _layer_norm(a, ln1w, ln1b),
                             inw, inb, ow, ob, nhead, mask)
        return x + _ffn_ref(_layer_norm(x, ln2w, ln2b), l1w, l1b, l2w, l2b)

    def enc_one(x, p):
        ln1w, ln1b, ln2w, ln2b, inw, inb, ow, ob, l1w, l1b, l2w, l2b = p
        mask = _causal_mask(x.shape[0])
        nx = _layer_norm(x, ln1w, ln1b)
        x = x + _mha_ref(nx, nx, inw, inb, ow, ob, nhead, mask)
        return x + _ffn_ref(_layer_norm(x, ln2w, ln2b), l1w, l1b, l2w, l2b)

    x = jax.vmap(lambda a, v: cross_one(a, v, cross_params))(audio, video)
    for lp in layer_params:
        x = jax.vmap(lambda xx: enc_one(xx, lp))(x)
    return x


# ---------------- main ----------------------------------------------------------------------

if __name__ == "__main__":
    B, T, D, NHEAD, DFF, DEPTH = 2, 8, 32, 4, 64, 4

    key = jax.random.PRNGKey(0)
    k_aud, k_vid, k_p = jax.random.split(key, 3)
    audio = jax.random.normal(k_aud, (B, T, D), jnp.float32)  # (B, T, d_model)
    video = jax.random.normal(k_vid, (B, T, D), jnp.float32)  # (B, T, d_model)

    pkeys = jax.random.split(k_p, DEPTH)
    torch_params = [init_layer_params(pkeys[i], D, DFF) for i in range(DEPTH)]
    stacked_params = prepare_params(torch_params, NHEAD)

    out = cross_transformer(video, audio, stacked_params, NHEAD)
    out = jax.block_until_ready(out)

    ref = _ref_forward(video, audio, torch_params[0], torch_params[1:], NHEAD)
    assert out.shape == (B, T, D), out.shape
    max_err = float(jnp.max(jnp.abs(out - ref)))
    # Tolerance covers bf16 MXU operands (weights/activations) + approx-reciprocal softmax,
    # accumulated over depth=4 pre-norm layers, vs the exact-f32 reference.
    assert max_err < 5e-2, f"mismatch vs reference: {max_err}"

    print("KERNEL_OK")
</pallas_src>

<mosaic_0001>
module attributes {stable_mosaic.version = 11 : i64} {
  func.func @_fused_kernel(%arg0: i32, %arg1: memref<1x8x32xf32, #tpu.memory_space<vmem>>, %arg2: memref<1x8x32xf32, #tpu.memory_space<vmem>>, %arg3: memref<4x1x32xf32, #tpu.memory_space<vmem>>, %arg4: memref<4x1x32xf32, #tpu.memory_space<vmem>>, %arg5: memref<4x1x32xf32, #tpu.memory_space<vmem>>, %arg6: memref<4x1x32xf32, #tpu.memory_space<vmem>>, %arg7: memref<4x4x32x8xbf16, #tpu.memory_space<vmem>>, %arg8: memref<4x4x1x8xf32, #tpu.memory_space<vmem>>, %arg9: memref<4x4x32x8xbf16, #tpu.memory_space<vmem>>, %arg10: memref<4x4x1x8xf32, #tpu.memory_space<vmem>>, %arg11: memref<4x4x32x8xbf16, #tpu.memory_space<vmem>>, %arg12: memref<4x4x1x8xf32, #tpu.memory_space<vmem>>, %arg13: memref<4x4x8x32xbf16, #tpu.memory_space<vmem>>, %arg14: memref<4x1x32xf32, #tpu.memory_space<vmem>>, %arg15: memref<4x32x64xbf16, #tpu.memory_space<vmem>>, %arg16: memref<4x1x64xf32, #tpu.memory_space<vmem>>, %arg17: memref<4x64x32xbf16, #tpu.memory_space<vmem>>, %arg18: memref<4x1x32xf32, #tpu.memory_space<vmem>>, %arg19: memref<1x8x32xf32, #tpu.memory_space<vmem>>) attributes {dimension_semantics = [#tpu.dimension_semantics<parallel>], iteration_bounds = array<i64: 2>, scalar_prefetch = 0 : i64, scratch_operands = 0 : i64, tpu.core_type = #tpu.core_type<tc>, window_params = [{transform_indices = @transform_0, window_bounds = array<i64: 1, 8, 32>}, {transform_indices = @transform_1, window_bounds = array<i64: 1, 8, 32>}, {pipeline_mode = #tpu.pipeline_mode<synchronous>, transform_indices = @transform_2, window_bounds = array<i64: 4, 1, 32>}, {pipeline_mode = #tpu.pipeline_mode<synchronous>, transform_indices = @transform_3, window_bounds = array<i64: 4, 1, 32>}, {pipeline_mode = #tpu.pipeline_mode<synchronous>, transform_indices = @transform_4, window_bounds = array<i64: 4, 1, 32>}, {pipeline_mode = #tpu.pipeline_mode<synchronous>, transform_indices = @transform_5, window_bounds = array<i64: 4, 1, 32>}, {pipeline_mode = #tpu.pipeline_mode<synchronous>, transform_indices = @transform_6, window_bounds = array<i64: 4, 4, 32, 8>}, {pipeline_mode = #tpu.pipeline_mode<synchronous>, transform_indices = @transform_7, window_bounds = array<i64: 4, 4, 1, 8>}, {pipeline_mode = #tpu.pipeline_mode<synchronous>, transform_indices = @transform_8, window_bounds = array<i64: 4, 4, 32, 8>}, {pipeline_mode = #tpu.pipeline_mode<synchronous>, transform_indices = @transform_9, window_bounds = array<i64: 4, 4, 1, 8>}, {pipeline_mode = #tpu.pipeline_mode<synchronous>, transform_indices = @transform_10, window_bounds = array<i64: 4, 4, 32, 8>}, {pipeline_mode = #tpu.pipeline_mode<synchronous>, transform_indices = @transform_11, window_bounds = array<i64: 4, 4, 1, 8>}, {pipeline_mode = #tpu.pipeline_mode<synchronous>, transform_indices = @transform_12, window_bounds = array<i64: 4, 4, 8, 32>}, {pipeline_mode = #tpu.pipeline_mode<synchronous>, transform_indices = @transform_13, window_bounds = array<i64: 4, 1, 32>}, {pipeline_mode = #tpu.pipeline_mode<synchronous>, transform_indices = @transform_14, window_bounds = array<i64: 4, 32, 64>}, {pipeline_mode = #tpu.pipeline_mode<synchronous>, transform_indices = @transform_15, window_bounds = array<i64: 4, 1, 64>}, {pipeline_mode = #tpu.pipeline_mode<synchronous>, transform_indices = @transform_16, window_bounds = array<i64: 4, 64, 32>}, {pipeline_mode = #tpu.pipeline_mode<synchronous>, transform_indices = @transform_17, window_bounds = array<i64: 4, 1, 32>}, {transform_indices = @transform_18, window_bounds = array<i64: 1, 8, 32>}]} {
    %0 = tpu.iota {dimensions = array<i32: 0>} : vector<8x8xi32>
    %1 = tpu.iota {dimensions = array<i32: 1>} : vector<8x8xi32>
    %2 = arith.cmpi sle, %1, %0 : vector<8x8xi32>
    %cst = arith.constant 0.000000e+00 : f32
    %cst_0 = arith.constant -1.000000e+30 : f32
    %3 = vector.broadcast %cst : f32 to vector<8x8xf32>
    %4 = vector.broadcast %cst_0 : f32 to vector<8x8xf32>
    %5 = arith.select %2, %3, %4 : vector<8x8xi1>, vector<8x8xf32>
    %c0 = arith.constant 0 : index
    %c0_1 = arith.constant 0 : index
    %c0_2 = arith.constant 0 : index
    %6 = vector.load %arg1[%c0, %c0_1, %c0_2] : memref<1x8x32xf32, #tpu.memory_space<vmem>>, vector<1x8x32xf32>
    %7 = vector.shape_cast %6 : vector<1x8x32xf32> to vector<8x32xf32>
    %c0_3 = arith.constant 0 : index
    %c0_4 = arith.constant 0 : index
    %c0_5 = arith.constant 0 : index
    %8 = vector.load %arg2[%c0_3, %c0_4, %c0_5] : memref<1x8x32xf32, #tpu.memory_space<vmem>>, vector<1x8x32xf32>
    %9 = vector.shape_cast %8 : vector<1x8x32xf32> to vector<8x32xf32>
    %c0_6 = arith.constant 0 : index
    %c0_7 = arith.constant 0 : index
    %c0_8 = arith.constant 0 : index
    %10 = vector.load %arg3[%c0_6, %c0_7, %c0_8] : memref<4x1x32xf32, #tpu.memory_space<vmem>>, vector<1x1x32xf32>
    %11 = vector.shape_cast %10 : vector<1x1x32xf32> to vector<1x32xf32>
    %c0_9 = arith.constant 0 : index
    %c0_10 = arith.constant 0 : index
    %c0_11 = arith.constant 0 : index
    %12 = vector.load %arg4[%c0_9, %c0_10, %c0_11] : memref<4x1x32xf32, #tpu.memory_space<vmem>>, vector<1x1x32xf32>
    %13 = vector.shape_cast %12 : vector<1x1x32xf32> to vector<1x32xf32>
    %c0_12 = arith.constant 0 : index
    %c0_13 = arith.constant 0 : index
    %c0_14 = arith.constant 0 : index
    %14 = vector.load %arg5[%c0_12, %c0_13, %c0_14] : memref<4x1x32xf32, #tpu.memory_space<vmem>>, vector<1x1x32xf32>
    %15 = vector.shape_cast %14 : vector<1x1x32xf32> to vector<1x32xf32>
    %c0_15 = arith.constant 0 : index
    %c0_16 = arith.constant 0 : index
    %c0_17 = arith.constant 0 : index
    %16 = vector.load %arg6[%c0_15, %c0_16, %c0_17] : memref<4x1x32xf32, #tpu.memory_space<vmem>>, vector<1x1x32xf32>
    %17 = vector.shape_cast %16 : vector<1x1x32xf32> to vector<1x32xf32>
    %c0_18 = arith.constant 0 : index
    %c0_19 = arith.constant 0 : index
    %c0_20 = arith.constant 0 : index
    %c0_21 = arith.constant 0 : index
    %18 = vector.load %arg7[%c0_18, %c0_19, %c0_20, %c0_21] : memref<4x4x32x8xbf16, #tpu.memory_space<vmem>>, vector<1x4x32x8xbf16>
    %19 = vector.shape_cast %18 : vector<1x4x32x8xbf16> to vector<4x32x8xbf16>
    %c0_22 = arith.constant 0 : index
    %c0_23 = arith.constant 0 : index
    %c0_24 = arith.constant 0 : index
    %c0_25 = arith.constant 0 : index
    %20 = vector.load %arg8[%c0_22, %c0_23, %c0_24, %c0_25] : memref<4x4x1x8xf32, #tpu.memory_space<vmem>>, vector<1x4x1x8xf32>
    %21 = vector.shape_cast %20 : vector<1x4x1x8xf32> to vector<4x1x8xf32>
    %c0_26 = arith.constant 0 : index
    %c0_27 = arith.constant 0 : index
    %c0_28 = arith.constant 0 : index
    %c0_29 = arith.constant 0 : index
    %22 = vector.load %arg9[%c0_26, %c0_27, %c0_28, %c0_29] : memref<4x4x32x8xbf16, #tpu.memory_space<vmem>>, vector<1x4x32x8xbf16>
    %23 = vector.shape_cast %22 : vector<1x4x32x8xbf16> to vector<4x32x8xbf16>
    %c0_30 = arith.constant 0 : index
    %c0_31 = arith.constant 0 : index
    %c0_32 = arith.constant 0 : index
    %c0_33 = arith.constant 0 : index
    %24 = vector.load %arg10[%c0_30, %c0_31, %c0_32, %c0_33] : memref<4x4x1x8xf32, #tpu.memory_space<vmem>>, vector<1x4x1x8xf32>
    %25 = vector.shape_cast %24 : vector<1x4x1x8xf32> to vector<4x1x8xf32>
    %c0_34 = arith.constant 0 : index
    %c0_35 = arith.constant 0 : index
    %c0_36 = arith.constant 0 : index
    %c0_37 = arith.constant 0 : index
    %26 = vector.load %arg11[%c0_34, %c0_35, %c0_36, %c0_37] : memref<4x4x32x8xbf16, #tpu.memory_space<vmem>>, vector<1x4x32x8xbf16>
    %27 = vector.shape_cast %26 : vector<1x4x32x8xbf16> to vector<4x32x8xbf16>
    %c0_38 = arith.constant 0 : index
    %c0_39 = arith.constant 0 : index
    %c0_40 = arith.constant 0 : index
    %c0_41 = arith.constant 0 : index
    %28 = vector.load %arg12[%c0_38, %c0_39, %c0_40, %c0_41] : memref<4x4x1x8xf32, #tpu.memory_space<vmem>>, vector<1x4x1x8xf32>
    %29 = vector.shape_cast %28 : vector<1x4x1x8xf32> to vector<4x1x8xf32>
    %c0_42 = arith.constant 0 : index
    %c0_43 = arith.constant 0 : index
    %c0_44 = arith.constant 0 : index
    %c0_45 = arith.constant 0 : index
    %30 = vector.load %arg13[%c0_42, %c0_43, %c0_44, %c0_45] : memref<4x4x8x32xbf16, #tpu.memory_space<vmem>>, vector<1x4x8x32xbf16>
    %31 = vector.shape_cast %30 : vector<1x4x8x32xbf16> to vector<4x8x32xbf16>
    %c0_46 = arith.constant 0 : index
    %c0_47 = arith.constant 0 : index
    %c0_48 = arith.constant 0 : index
    %32 = vector.load %arg14[%c0_46, %c0_47, %c0_48] : memref<4x1x32xf32, #tpu.memory_space<vmem>>, vector<1x1x32xf32>
    %33 = vector.shape_cast %32 : vector<1x1x32xf32> to vector<1x32xf32>
    %c0_49 = arith.constant 0 : index
    %c0_50 = arith.constant 0 : index
    %c0_51 = arith.constant 0 : index
    %34 = vector.load %arg15[%c0_49, %c0_50, %c0_51] : memref<4x32x64xbf16, #tpu.memory_space<vmem>>, vector<1x32x64xbf16>
    %35 = vector.shape_cast %34 : vector<1x32x64xbf16> to vector<32x64xbf16>
    %c0_52 = arith.constant 0 : index
    %c0_53 = arith.constant 0 : index
    %c0_54 = arith.constant 0 : index
    %36 = vector.load %arg16[%c0_52, %c0_53, %c0_54] : memref<4x1x64xf32, #tpu.memory_space<vmem>>, vector<1x1x64xf32>
    %37 = vector.shape_cast %36 : vector<1x1x64xf32> to vector<1x64xf32>
    %c0_55 = arith.constant 0 : index
    %c0_56 = arith.constant 0 : index
    %c0_57 = arith.constant 0 : index
    %38 = vector.load %arg17[%c0_55, %c0_56, %c0_57] : memref<4x64x32xbf16, #tpu.memory_space<vmem>>, vector<1x64x32xbf16>
    %39 = vector.shape_cast %38 : vector<1x64x32xbf16> to vector<64x32xbf16>
    %c0_58 = arith.constant 0 : index
    %c0_59 = arith.constant 0 : index
    %c0_60 = arith.constant 0 : index
    %40 = vector.load %arg18[%c0_58, %c0_59, %c0_60] : memref<4x1x32xf32, #tpu.memory_space<vmem>>, vector<1x1x32xf32>
    %41 = vector.shape_cast %40 : vector<1x1x32xf32> to vector<1x32xf32>
    %cst_61 = arith.constant dense<0.000000e+00> : vector<8xf32>
    %42 = vector.multi_reduction <add>, %9, %cst_61 [1] : vector<8x32xf32> to vector<8xf32>
    %43 = vector.shape_cast %42 : vector<8xf32> to vector<8x1xf32>
    %cst_62 = arith.constant 3.200000e+01 : f32
    %44 = vector.broadcast %cst_62 : f32 to vector<8x1xf32>
    %45 = arith.divf %43, %44 : vector<8x1xf32>
    %46 = vector.broadcast %45 : vector<8x1xf32> to vector<8x32xf32>
    %47 = arith.subf %9, %46 : vector<8x32xf32>
    %48 = arith.mulf %47, %47 : vector<8x32xf32>
    %cst_63 = arith.constant dense<0.000000e+00> : vector<8xf32>
    %49 = vector.multi_reduction <add>, %48, %cst_63 [1] : vector<8x32xf32> to vector<8xf32>
    %50 = vector.shape_cast %49 : vector<8xf32> to vector<8x1xf32>
    %cst_64 = arith.constant 3.200000e+01 : f32
    %51 = vector.broadcast %cst_64 : f32 to vector<8x1xf32>
    %52 = arith.divf %50, %51 : vector<8x1xf32>
    %cst_65 = arith.constant 9.99999974E-6 : f32
    %53 = vector.broadcast %cst_65 : f32 to vector<8x1xf32>
    %54 = arith.addf %52, %53 : vector<8x1xf32>
    %55 = math.rsqrt %54 : vector<8x1xf32>
    %56 = vector.broadcast %55 : vector<8x1xf32> to vector<8x32xf32>
    %57 = arith.mulf %47, %56 : vector<8x32xf32>
    %58 = vector.broadcast %11 : vector<1x32xf32> to vector<8x32xf32>
    %59 = arith.mulf %57, %58 : vector<8x32xf32>
    %60 = vector.broadcast %13 : vector<1x32xf32> to vector<8x32xf32>
    %61 = arith.addf %59, %60 : vector<8x32xf32>
    %62 = arith.truncf %61 : vector<8x32xf32> to vector<8x32xbf16>
    %cst_66 = arith.constant dense<0.000000e+00> : vector<8xf32>
    %63 = vector.multi_reduction <add>, %7, %cst_66 [1] : vector<8x32xf32> to vector<8xf32>
    %64 = vector.shape_cast %63 : vector<8xf32> to vector<8x1xf32>
    %cst_67 = arith.constant 3.200000e+01 : f32
    %65 = vector.broadcast %cst_67 : f32 to vector<8x1xf32>
    %66 = arith.divf %64, %65 : vector<8x1xf32>
    %67 = vector.broadcast %66 : vector<8x1xf32> to vector<8x32xf32>
    %68 = arith.subf %7, %67 : vector<8x32xf32>
    %69 = arith.mulf %68, %68 : vector<8x32xf32>
    %cst_68 = arith.constant dense<0.000000e+00> : vector<8xf32>
    %70 = vector.multi_reduction <add>, %69, %cst_68 [1] : vector<8x32xf32> to vector<8xf32>
    %71 = vector.shape_cast %70 : vector<8xf32> to vector<8x1xf32>
    %cst_69 = arith.constant 3.200000e+01 : f32
    %72 = vector.broadcast %cst_69 : f32 to vector<8x1xf32>
    %73 = arith.divf %71, %72 : vector<8x1xf32>
    %cst_70 = arith.constant 9.99999974E-6 : f32
    %74 = vector.broadcast %cst_70 : f32 to vector<8x1xf32>
    %75 = arith.addf %73, %74 : vector<8x1xf32>
    %76 = math.rsqrt %75 : vector<8x1xf32>
    %77 = vector.broadcast %76 : vector<8x1xf32> to vector<8x32xf32>
    %78 = arith.mulf %68, %77 : vector<8x32xf32>
    %79 = vector.broadcast %11 : vector<1x32xf32> to vector<8x32xf32>
    %80 = arith.mulf %78, %79 : vector<8x32xf32>
    %81 = vector.broadcast %13 : vector<1x32xf32> to vector<8x32xf32>
    %82 = arith.addf %80, %81 : vector<8x32xf32>
    %83 = arith.truncf %82 : vector<8x32xf32> to vector<8x32xbf16>
    %84 = arith.addf %7, %9 : vector<8x32xf32>
    %85 = vector.shape_cast %62 : vector<8x32xbf16> to vector<1x8x32xbf16>
    %86 = vector.shape_cast %85 : vector<1x8x32xbf16> to vector<1x8x32xbf16>
    %87 = vector.broadcast %86 : vector<1x8x32xbf16> to vector<4x8x32xbf16>
    %88 = vector.shape_cast %83 : vector<8x32xbf16> to vector<1x8x32xbf16>
    %89 = vector.shape_cast %88 : vector<1x8x32xbf16> to vector<1x8x32xbf16>
    %90 = vector.broadcast %89 : vector<1x8x32xbf16> to vector<4x8x32xbf16>
    "tpu.trace_start"() <{level = 10 : i32, message = "htd,hdk->htk"}> : () -> ()
    %cst_71 = arith.constant dense<0.000000e+00> : vector<4x8x8xf32>
    %91 = tpu.matmul %87, %19, %cst_71 {dimension_numbers = #tpu.dot_dimension_numbers<[2], [1], [1], [2], [0, 0, 0, 1, 1, 2], [0], [0]>} : vector<4x8x32xbf16>, vector<4x32x8xbf16>, vector<4x8x8xf32> -> vector<4x8x8xf32>
    "tpu.trace_stop"() : () -> ()
    %92 = vector.broadcast %21 : vector<4x1x8xf32> to vector<4x8x8xf32>
    %93 = arith.addf %91, %92 : vector<4x8x8xf32>
    "tpu.trace_start"() <{level = 10 : i32, message = "htd,hdk->htk"}> : () -> ()
    %cst_72 = arith.constant dense<0.000000e+00> : vector<4x8x8xf32>
    %94 = tpu.matmul %90, %23, %cst_72 {dimension_numbers = #tpu.dot_dimension_numbers<[2], [1], [1], [2], [0, 0, 0, 1, 1, 2], [0], [0]>} : vector<4x8x32xbf16>, vector<4x32x8xbf16>, vector<4x8x8xf32> -> vector<4x8x8xf32>
    "tpu.trace_stop"() : () -> ()
    %95 = vector.broadcast %25 : vector<4x1x8xf32> to vector<4x8x8xf32>
    %96 = arith.addf %94, %95 : vector<4x8x8xf32>
    "tpu.trace_start"() <{level = 10 : i32, message = "htd,hdk->htk"}> : () -> ()
    %cst_73 = arith.constant dense<0.000000e+00> : vector<4x8x8xf32>
    %97 = tpu.matmul %90, %27, %cst_73 {dimension_numbers = #tpu.dot_dimension_numbers<[2], [1], [1], [2], [0, 0, 0, 1, 1, 2], [0], [0]>} : vector<4x8x32xbf16>, vector<4x32x8xbf16>, vector<4x8x8xf32> -> vector<4x8x8xf32>
    "tpu.trace_stop"() : () -> ()
    %98 = vector.broadcast %29 : vector<4x1x8xf32> to vector<4x8x8xf32>
    %99 = arith.addf %97, %98 : vector<4x8x8xf32>
    %100 = arith.truncf %93 : vector<4x8x8xf32> to vector<4x8x8xbf16>
    %101 = arith.truncf %96 : vector<4x8x8xf32> to vector<4x8x8xbf16>
    "tpu.trace_start"() <{level = 10 : i32, message = "hqd,hkd->hqk"}> : () -> ()
    %cst_74 = arith.constant dense<0.000000e+00> : vector<4x8x8xf32>
    %102 = tpu.matmul %100, %101, %cst_74 {dimension_numbers = #tpu.dot_dimension_numbers<[2], [2], [1], [1], [0, 0, 0, 1, 1, 1], [0], [0]>} : vector<4x8x8xbf16>, vector<4x8x8xbf16>, vector<4x8x8xf32> -> vector<4x8x8xf32>
    "tpu.trace_stop"() : () -> ()
    %103 = vector.shape_cast %5 : vector<8x8xf32> to vector<1x8x8xf32>
    %104 = vector.broadcast %103 : vector<1x8x8xf32> to vector<4x8x8xf32>
    %105 = arith.addf %102, %104 : vector<4x8x8xf32>
    %cst_75 = arith.constant dense<0xFF800000> : vector<4x8xf32>
    %106 = vector.multi_reduction <maximumf>, %105, %cst_75 [2] : vector<4x8x8xf32> to vector<4x8xf32>
    %107 = vector.shape_cast %106 : vector<4x8xf32> to vector<4x8x1xf32>
    %108 = vector.broadcast %107 : vector<4x8x1xf32> to vector<4x8x8xf32>
    %109 = arith.subf %105, %108 : vector<4x8x8xf32>
    %110 = math.exp %109 : vector<4x8x8xf32>
    %cst_76 = arith.constant dense<0.000000e+00> : vector<4x8xf32>
    %111 = vector.multi_reduction <add>, %110, %cst_76 [2] : vector<4x8x8xf32> to vector<4x8xf32>
    %112 = vector.shape_cast %111 : vector<4x8xf32> to vector<4x8x1xf32>
    %113 = tpu.reciprocal %112 {approx = true} : vector<4x8x1xf32> -> vector<4x8x1xf32>
    %114 = vector.broadcast %113 : vector<4x8x1xf32> to vector<4x8x8xf32>
    %115 = arith.mulf %110, %114 : vector<4x8x8xf32>
    %116 = arith.truncf %115 : vector<4x8x8xf32> to vector<4x8x8xbf16>
    %117 = arith.truncf %99 : vector<4x8x8xf32> to vector<4x8x8xbf16>
    "tpu.trace_start"() <{level = 10 : i32, message = "hqk,hkd->hqd"}> : () -> ()
    %cst_77 = arith.constant dense<0.000000e+00> : vector<4x8x8xf32>
    %118 = tpu.matmul %116, %117, %cst_77 {dimension_numbers = #tpu.dot_dimension_numbers<[2], [1], [1], [2], [0, 0, 0, 1, 1, 2], [0], [0]>} : vector<4x8x8xbf16>, vector<4x8x8xbf16>, vector<4x8x8xf32> -> vector<4x8x8xf32>
    "tpu.trace_stop"() : () -> ()
    %119 = arith.truncf %118 : vector<4x8x8xf32> to vector<4x8x8xbf16>
    "tpu.trace_start"() <{level = 10 : i32, message = "hqd,hdo->hqo"}> : () -> ()
    %cst_78 = arith.constant dense<0.000000e+00> : vector<4x8x32xf32>
    %120 = tpu.matmul %119, %31, %cst_78 {dimension_numbers = #tpu.dot_dimension_numbers<[2], [1], [1], [2], [0, 0, 0, 1, 1, 2], [0], [0]>} : vector<4x8x8xbf16>, vector<4x8x32xbf16>, vector<4x8x32xf32> -> vector<4x8x32xf32>
    "tpu.trace_stop"() : () -> ()
    %cst_79 = arith.constant dense<0.000000e+00> : vector<8x32xf32>
    %121 = vector.multi_reduction <add>, %120, %cst_79 [0] : vector<4x8x32xf32> to vector<8x32xf32>
    %122 = vector.broadcast %33 : vector<1x32xf32> to vector<8x32xf32>
    %123 = arith.addf %121, %122 : vector<8x32xf32>
    %124 = arith.addf %84, %123 : vector<8x32xf32>
    %cst_80 = arith.constant dense<0.000000e+00> : vector<8xf32>
    %125 = vector.multi_reduction <add>, %124, %cst_80 [1] : vector<8x32xf32> to vector<8xf32>
    %126 = vector.shape_cast %125 : vector<8xf32> to vector<8x1xf32>
    %cst_81 = arith.constant 3.200000e+01 : f32
    %127 = vector.broadcast %cst_81 : f32 to vector<8x1xf32>
    %128 = arith.divf %126, %127 : vector<8x1xf32>
    %129 = vector.broadcast %128 : vector<8x1xf32> to vector<8x32xf32>
    %130 = arith.subf %124, %129 : vector<8x32xf32>
    %131 = arith.mulf %130, %130 : vector<8x32xf32>
    %cst_82 = arith.constant dense<0.000000e+00> : vector<8xf32>
    %132 = vector.multi_reduction <add>, %131, %cst_82 [1] : vector<8x32xf32> to vector<8xf32>
    %133 = vector.shape_cast %132 : vector<8xf32> to vector<8x1xf32>
    %cst_83 = arith.constant 3.200000e+01 : f32
    %134 = vector.broadcast %cst_83 : f32 to vector<8x1xf32>
    %135 = arith.divf %133, %134 : vector<8x1xf32>
    %cst_84 = arith.constant 9.99999974E-6 : f32
    %136 = vector.broadcast %cst_84 : f32 to vector<8x1xf32>
    %137 = arith.addf %135, %136 : vector<8x1xf32>
    %138 = math.rsqrt %137 : vector<8x1xf32>
    %139 = vector.broadcast %138 : vector<8x1xf32> to vector<8x32xf32>
    %140 = arith.mulf %130, %139 : vector<8x32xf32>
    %141 = vector.broadcast %15 : vector<1x32xf32> to vector<8x32xf32>
    %142 = arith.mulf %140, %141 : vector<8x32xf32>
    %143 = vector.broadcast %17 : vector<1x32xf32> to vector<8x32xf32>
    %144 = arith.addf %142, %143 : vector<8x32xf32>
    %145 = arith.truncf %144 : vector<8x32xf32> to vector<8x32xbf16>
    %cst_85 = arith.constant dense<0.000000e+00> : vector<8x64xf32>
    %146 = tpu.matmul %145, %35, %cst_85 {dimension_numbers = #tpu.dot_dimension_numbers<[1], [0], [0], [1], [0, 0, 1, 1], [], []>} : vector<8x32xbf16>, vector<32x64xbf16>, vector<8x64xf32> -> vector<8x64xf32>
    %147 = vector.broadcast %37 : vector<1x64xf32> to vector<8x64xf32>
    %148 = arith.addf %146, %147 : vector<8x64xf32>
    %cst_86 = arith.constant 0.000000e+00 : f32
    %149 = vector.broadcast %cst_86 : f32 to vector<8x64xf32>
    %150 = arith.maximumf %148, %149 : vector<8x64xf32>
    %151 = arith.truncf %150 : vector<8x64xf32> to vector<8x64xbf16>
    %cst_87 = arith.constant dense<0.000000e+00> : vector<8x32xf32>
    %152 = tpu.matmul %151, %39, %cst_87 {dimension_numbers = #tpu.dot_dimension_numbers<[1], [0], [0], [1], [0, 0, 1, 1], [], []>} : vector<8x64xbf16>, vector<64x32xbf16>, vector<8x32xf32> -> vector<8x32xf32>
    %153 = arith.addf %124, %152 : vector<8x32xf32>
    %154 = vector.broadcast %41 : vector<1x32xf32> to vector<8x32xf32>
    %155 = arith.addf %153, %154 : vector<8x32xf32>
    %c1 = arith.constant 1 : index
    %c0_88 = arith.constant 0 : index
    %c0_89 = arith.constant 0 : index
    %156 = vector.load %arg3[%c1, %c0_88, %c0_89] : memref<4x1x32xf32, #tpu.memory_space<vmem>>, vector<1x1x32xf32>
    %157 = vector.shape_cast %156 : vector<1x1x32xf32> to vector<1x32xf32>
    %c1_90 = arith.constant 1 : index
    %c0_91 = arith.constant 0 : index
    %c0_92 = arith.constant 0 : index
    %158 = vector.load %arg4[%c1_90, %c0_91, %c0_92] : memref<4x1x32xf32, #tpu.memory_space<vmem>>, vector<1x1x32xf32>
    %159 = vector.shape_cast %158 : vector<1x1x32xf32> to vector<1x32xf32>
    %c1_93 = arith.constant 1 : index
    %c0_94 = arith.constant 0 : index
    %c0_95 = arith.constant 0 : index
    %160 = vector.load %arg5[%c1_93, %c0_94, %c0_95] : memref<4x1x32xf32, #tpu.memory_space<vmem>>, vector<1x1x32xf32>
    %161 = vector.shape_cast %160 : vector<1x1x32xf32> to vector<1x32xf32>
    %c1_96 = arith.constant 1 : index
    %c0_97 = arith.constant 0 : index
    %c0_98 = arith.constant 0 : index
    %162 = vector.load %arg6[%c1_96, %c0_97, %c0_98] : memref<4x1x32xf32, #tpu.memory_space<vmem>>, vector<1x1x32xf32>
    %163 = vector.shape_cast %162 : vector<1x1x32xf32> to vector<1x32xf32>
    %c1_99 = arith.constant 1 : index
    %c0_100 = arith.constant 0 : index
    %c0_101 = arith.constant 0 : index
    %c0_102 = arith.constant 0 : index
    %164 = vector.load %arg7[%c1_99, %c0_100, %c0_101, %c0_102] : memref<4x4x32x8xbf16, #tpu.memory_space<vmem>>, vector<1x4x32x8xbf16>
    %165 = vector.shape_cast %164 : vector<1x4x32x8xbf16> to vector<4x32x8xbf16>
    %c1_103 = arith.constant 1 : index
    %c0_104 = arith.constant 0 : index
    %c0_105 = arith.constant 0 : index
    %c0_106 = arith.constant 0 : index
    %166 = vector.load %arg8[%c1_103, %c0_104, %c0_105, %c0_106] : memref<4x4x1x8xf32, #tpu.memory_space<vmem>>, vector<1x4x1x8xf32>
    %167 = vector.shape_cast %166 : vector<1x4x1x8xf32> to vector<4x1x8xf32>
    %c1_107 = arith.constant 1 : index
    %c0_108 = arith.constant 0 : index
    %c0_109 = arith.constant 0 : index
    %c0_110 = arith.constant 0 : index
    %168 = vector.load %arg9[%c1_107, %c0_108, %c0_109, %c0_110] : memref<4x4x32x8xbf16, #tpu.memory_space<vmem>>, vector<1x4x32x8xbf16>
    %169 = vector.shape_cast %168 : vector<1x4x32x8xbf16> to vector<4x32x8xbf16>
    %c1_111 = arith.constant 1 : index
    %c0_112 = arith.constant 0 : index
    %c0_113 = arith.constant 0 : index
    %c0_114 = arith.constant 0 : index
    %170 = vector.load %arg10[%c1_111, %c0_112, %c0_113, %c0_114] : memref<4x4x1x8xf32, #tpu.memory_space<vmem>>, vector<1x4x1x8xf32>
    %171 = vector.shape_cast %170 : vector<1x4x1x8xf32> to vector<4x1x8xf32>
    %c1_115 = arith.constant 1 : index
    %c0_116 = arith.constant 0 : index
    %c0_117 = arith.constant 0 : index
    %c0_118 = arith.constant 0 : index
    %172 = vector.load %arg11[%c1_115, %c0_116, %c0_117, %c0_118] : memref<4x4x32x8xbf16, #tpu.memory_space<vmem>>, vector<1x4x32x8xbf16>
    %173 = vector.shape_cast %172 : vector<1x4x32x8xbf16> to vector<4x32x8xbf16>
    %c1_119 = arith.constant 1 : index
    %c0_120 = arith.constant 0 : index
    %c0_121 = arith.constant 0 : index
    %c0_122 = arith.constant 0 : index
    %174 = vector.load %arg12[%c1_119, %c0_120, %c0_121, %c0_122] : memref<4x4x1x8xf32, #tpu.memory_space<vmem>>, vector<1x4x1x8xf32>
    %175 = vector.shape_cast %174 : vector<1x4x1x8xf32> to vector<4x1x8xf32>
    %c1_123 = arith.constant 1 : index
    %c0_124 = arith.constant 0 : index
    %c0_125 = arith.constant 0 : index
    %c0_126 = arith.constant 0 : index
    %176 = vector.load %arg13[%c1_123, %c0_124, %c0_125, %c0_126] : memref<4x4x8x32xbf16, #tpu.memory_space<vmem>>, vector<1x4x8x32xbf16>
    %177 = vector.shape_cast %176 : vector<1x4x8x32xbf16> to vector<4x8x32xbf16>
    %c1_127 = arith.constant 1 : index
    %c0_128 = arith.constant 0 : index
    %c0_129 = arith.constant 0 : index
    %178 = vector.load %arg14[%c1_127, %c0_128, %c0_129] : memref<4x1x32xf32, #tpu.memory_space<vmem>>, vector<1x1x32xf32>
    %179 = vector.shape_cast %178 : vector<1x1x32xf32> to vector<1x32xf32>
    %c1_130 = arith.constant 1 : index
    %c0_131 = arith.constant 0 : index
    %c0_132 = arith.constant 0 : index
    %180 = vector.load %arg15[%c1_130, %c0_131, %c0_132] : memref<4x32x64xbf16, #tpu.memory_space<vmem>>, vector<1x32x64xbf16>
    %181 = vector.shape_cast %180 : vector<1x32x64xbf16> to vector<32x64xbf16>
    %c1_133 = arith.constant 1 : index
    %c0_134 = arith.constant 0 : index
    %c0_135 = arith.constant 0 : index
    %182 = vector.load %arg16[%c1_133, %c0_134, %c0_135] : memref<4x1x64xf32, #tpu.memory_space<vmem>>, vector<1x1x64xf32>
    %183 = vector.shape_cast %182 : vector<1x1x64xf32> to vector<1x64xf32>
    %c1_136 = arith.constant 1 : index
    %c0_137 = arith.constant 0 : index
    %c0_138 = arith.constant 0 : index
    %184 = vector.load %arg17[%c1_136, %c0_137, %c0_138] : memref<4x64x32xbf16, #tpu.memory_space<vmem>>, vector<1x64x32xbf16>
    %185 = vector.shape_cast %184 : vector<1x64x32xbf16> to vector<64x32xbf16>
    %c1_139 = arith.constant 1 : index
    %c0_140 = arith.constant 0 : index
    %c0_141 = arith.constant 0 : index
    %186 = vector.load %arg18[%c1_139, %c0_140, %c0_141] : memref<4x1x32xf32, #tpu.memory_space<vmem>>, vector<1x1x32xf32>
    %187 = vector.shape_cast %186 : vector<1x1x32xf32> to vector<1x32xf32>
    %cst_142 = arith.constant dense<0.000000e+00> : vector<8xf32>
    %188 = vector.multi_reduction <add>, %155, %cst_142 [1] : vector<8x32xf32> to vector<8xf32>
    %189 = vector.shape_cast %188 : vector<8xf32> to vector<8x1xf32>
    %cst_143 = arith.constant 3.200000e+01 : f32
    %190 = vector.broadcast %cst_143 : f32 to vector<8x1xf32>
    %191 = arith.divf %189, %190 : vector<8x1xf32>
    %192 = vector.broadcast %191 : vector<8x1xf32> to vector<8x32xf32>
    %193 = arith.subf %155, %192 : vector<8x32xf32>
    %194 = arith.mulf %193, %193 : vector<8x32xf32>
    %cst_144 = arith.constant dense<0.000000e+00> : vector<8xf32>
    %195 = vector.multi_reduction <add>, %194, %cst_144 [1] : vector<8x32xf32> to vector<8xf32>
    %196 = vector.shape_cast %195 : vector<8xf32> to vector<8x1xf32>
    %cst_145 = arith.constant 3.200000e+01 : f32
    %197 = vector.broadcast %cst_145 : f32 to vector<8x1xf32>
    %198 = arith.divf %196, %197 : vector<8x1xf32>
    %cst_146 = arith.constant 9.99999974E-6 : f32
    %199 = vector.broadcast %cst_146 : f32 to vector<8x1xf32>
    %200 = arith.addf %198, %199 : vector<8x1xf32>
    %201 = math.rsqrt %200 : vector<8x1xf32>
    %202 = vector.broadcast %201 : vector<8x1xf32> to vector<8x32xf32>
    %203 = arith.mulf %193, %202 : vector<8x32xf32>
    %204 = vector.broadcast %157 : vector<1x32xf32> to vector<8x32xf32>
    %205 = arith.mulf %203, %204 : vector<8x32xf32>
    %206 = vector.broadcast %159 : vector<1x32xf32> to vector<8x32xf32>
    %207 = arith.addf %205, %206 : vector<8x32xf32>
    %208 = arith.truncf %207 : vector<8x32xf32> to vector<8x32xbf16>
    %209 = vector.shape_cast %208 : vector<8x32xbf16> to vector<1x8x32xbf16>
    %210 = vector.shape_cast %209 : vector<1x8x32xbf16> to vector<1x8x32xbf16>
    %211 = vector.broadcast %210 : vector<1x8x32xbf16> to vector<4x8x32xbf16>
    "tpu.trace_start"() <{level = 10 : i32, message = "htd,hdk->htk"}> : () -> ()
    %cst_147 = arith.constant dense<0.000000e+00> : vector<4x8x8xf32>
    %212 = tpu.matmul %211, %165, %cst_147 {dimension_numbers = #tpu.dot_dimension_numbers<[2], [1], [1], [2], [0, 0, 0, 1, 1, 2], [0], [0]>} : vector<4x8x32xbf16>, vector<4x32x8xbf16>, vector<4x8x8xf32> -> vector<4x8x8xf32>
    "tpu.trace_stop"() : () -> ()
    %213 = vector.broadcast %167 : vector<4x1x8xf32> to vector<4x8x8xf32>
    %214 = arith.addf %212, %213 : vector<4x8x8xf32>
    "tpu.trace_start"() <{level = 10 : i32, message = "htd,hdk->htk"}> : () -> ()
    %cst_148 = arith.constant dense<0.000000e+00> : vector<4x8x8xf32>
    %215 = tpu.matmul %211, %169, %cst_148 {dimension_numbers = #tpu.dot_dimension_numbers<[2], [1], [1], [2], [0, 0, 0, 1, 1, 2], [0], [0]>} : vector<4x8x32xbf16>, vector<4x32x8xbf16>, vector<4x8x8xf32> -> vector<4x8x8xf32>
    "tpu.trace_stop"() : () -> ()
    %216 = vector.broadcast %171 : vector<4x1x8xf32> to vector<4x8x8xf32>
    %217 = arith.addf %215, %216 : vector<4x8x8xf32>
    "tpu.trace_start"() <{level = 10 : i32, message = "htd,hdk->htk"}> : () -> ()
    %cst_149 = arith.constant dense<0.000000e+00> : vector<4x8x8xf32>
    %218 = tpu.matmul %211, %173, %cst_149 {dimension_numbers = #tpu.dot_dimension_numbers<[2], [1], [1], [2], [0, 0, 0, 1, 1, 2], [0], [0]>} : vector<4x8x32xbf16>, vector<4x32x8xbf16>, vector<4x8x8xf32> -> vector<4x8x8xf32>
    "tpu.trace_stop"() : () -> ()
    %219 = vector.broadcast %175 : vector<4x1x8xf32> to vector<4x8x8xf32>
    %220 = arith.addf %218, %219 : vector<4x8x8xf32>
    %221 = arith.truncf %214 : vector<4x8x8xf32> to vector<4x8x8xbf16>
    %222 = arith.truncf %217 : vector<4x8x8xf32> to vector<4x8x8xbf16>
    "tpu.trace_start"() <{level = 10 : i32, message = "hqd,hkd->hqk"}> : () -> ()
    %cst_150 = arith.constant dense<0.000000e+00> : vector<4x8x8xf32>
    %223 = tpu.matmul %221, %222, %cst_150 {dimension_numbers = #tpu.dot_dimension_numbers<[2], [2], [1], [1], [0, 0, 0, 1, 1, 1], [0], [0]>} : vector<4x8x8xbf16>, vector<4x8x8xbf16>, vector<4x8x8xf32> -> vector<4x8x8xf32>
    "tpu.trace_stop"() : () -> ()
    %224 = vector.shape_cast %5 : vector<8x8xf32> to vector<1x8x8xf32>
    %225 = vector.broadcast %224 : vector<1x8x8xf32> to vector<4x8x8xf32>
    %226 = arith.addf %223, %225 : vector<4x8x8xf32>
    %cst_151 = arith.constant dense<0xFF800000> : vector<4x8xf32>
    %227 = vector.multi_reduction <maximumf>, %226, %cst_151 [2] : vector<4x8x8xf32> to vector<4x8xf32>
    %228 = vector.shape_cast %227 : vector<4x8xf32> to vector<4x8x1xf32>
    %229 = vector.broadcast %228 : vector<4x8x1xf32> to vector<4x8x8xf32>
    %230 = arith.subf %226, %229 : vector<4x8x8xf32>
    %231 = math.exp %230 : vector<4x8x8xf32>
    %cst_152 = arith.constant dense<0.000000e+00> : vector<4x8xf32>
    %232 = vector.multi_reduction <add>, %231, %cst_152 [2] : vector<4x8x8xf32> to vector<4x8xf32>
    %233 = vector.shape_cast %232 : vector<4x8xf32> to vector<4x8x1xf32>
    %234 = tpu.reciprocal %233 {approx = true} : vector<4x8x1xf32> -> vector<4x8x1xf32>
    %235 = vector.broadcast %234 : vector<4x8x1xf32> to vector<4x8x8xf32>
    %236 = arith.mulf %231, %235 : vector<4x8x8xf32>
    %237 = arith.truncf %236 : vector<4x8x8xf32> to vector<4x8x8xbf16>
    %238 = arith.truncf %220 : vector<4x8x8xf32> to vector<4x8x8xbf16>
    "tpu.trace_start"() <{level = 10 : i32, message = "hqk,hkd->hqd"}> : () -> ()
    %cst_153 = arith.constant dense<0.000000e+00> : vector<4x8x8xf32>
    %239 = tpu.matmul %237, %238, %cst_153 {dimension_numbers = #tpu.dot_dimension_numbers<[2], [1], [1], [2], [0, 0, 0, 1, 1, 2], [0], [0]>} : vector<4x8x8xbf16>, vector<4x8x8xbf16>, vector<4x8x8xf32> -> vector<4x8x8xf32>
    "tpu.trace_stop"() : () -> ()
    %240 = arith.truncf %239 : vector<4x8x8xf32> to vector<4x8x8xbf16>
    "tpu.trace_start"() <{level = 10 : i32, message = "hqd,hdo->hqo"}> : () -> ()
    %cst_154 = arith.constant dense<0.000000e+00> : vector<4x8x32xf32>
    %241 = tpu.matmul %240, %177, %cst_154 {dimension_numbers = #tpu.dot_dimension_numbers<[2], [1], [1], [2], [0, 0, 0, 1, 1, 2], [0], [0]>} : vector<4x8x8xbf16>, vector<4x8x32xbf16>, vector<4x8x32xf32> -> vector<4x8x32xf32>
    "tpu.trace_stop"() : () -> ()
    %cst_155 = arith.constant dense<0.000000e+00> : vector<8x32xf32>
    %242 = vector.multi_reduction <add>, %241, %cst_155 [0] : vector<4x8x32xf32> to vector<8x32xf32>
    %243 = vector.broadcast %179 : vector<1x32xf32> to vector<8x32xf32>
    %244 = arith.addf %242, %243 : vector<8x32xf32>
    %245 = arith.addf %155, %244 : vector<8x32xf32>
    %cst_156 = arith.constant dense<0.000000e+00> : vector<8xf32>
    %246 = vector.multi_reduction <add>, %245, %cst_156 [1] : vector<8x32xf32> to vector<8xf32>
    %247 = vector.shape_cast %246 : vector<8xf32> to vector<8x1xf32>
    %cst_157 = arith.constant 3.200000e+01 : f32
    %248 = vector.broadcast %cst_157 : f32 to vector<8x1xf32>
    %249 = arith.divf %247, %248 : vector<8x1xf32>
    %250 = vector.broadcast %249 : vector<8x1xf32> to vector<8x32xf32>
    %251 = arith.subf %245, %250 : vector<8x32xf32>
    %252 = arith.mulf %251, %251 : vector<8x32xf32>
    %cst_158 = arith.constant dense<0.000000e+00> : vector<8xf32>
    %253 = vector.multi_reduction <add>, %252, %cst_158 [1] : vector<8x32xf32> to vector<8xf32>
    %254 = vector.shape_cast %253 : vector<8xf32> to vector<8x1xf32>
    %cst_159 = arith.constant 3.200000e+01 : f32
    %255 = vector.broadcast %cst_159 : f32 to vector<8x1xf32>
    %256 = arith.divf %254, %255 : vector<8x1xf32>
    %cst_160 = arith.constant 9.99999974E-6 : f32
    %257 = vector.broadcast %cst_160 : f32 to vector<8x1xf32>
    %258 = arith.addf %256, %257 : vector<8x1xf32>
    %259 = math.rsqrt %258 : vector<8x1xf32>
    %260 = vector.broadcast %259 : vector<8x1xf32> to vector<8x32xf32>
    %261 = arith.mulf %251, %260 : vector<8x32xf32>
    %262 = vector.broadcast %161 : vector<1x32xf32> to vector<8x32xf32>
    %263 = arith.mulf %261, %262 : vector<8x32xf32>
    %264 = vector.broadcast %163 : vector<1x32xf32> to vector<8x32xf32>
    %265 = arith.addf %263, %264 : vector<8x32xf32>
    %266 = arith.truncf %265 : vector<8x32xf32> to vector<8x32xbf16>
    %cst_161 = arith.constant dense<0.000000e+00> : vector<8x64xf32>
    %267 = tpu.matmul %266, %181, %cst_161 {dimension_numbers = #tpu.dot_dimension_numbers<[1], [0], [0], [1], [0, 0, 1, 1], [], []>} : vector<8x32xbf16>, vector<32x64xbf16>, vector<8x64xf32> -> vector<8x64xf32>
    %268 = vector.broadcast %183 : vector<1x64xf32> to vector<8x64xf32>
    %269 = arith.addf %267, %268 : vector<8x64xf32>
    %cst_162 = arith.constant 0.000000e+00 : f32
    %270 = vector.broadcast %cst_162 : f32 to vector<8x64xf32>
    %271 = arith.maximumf %269, %270 : vector<8x64xf32>
    %272 = arith.truncf %271 : vector<8x64xf32> to vector<8x64xbf16>
    %cst_163 = arith.constant dense<0.000000e+00> : vector<8x32xf32>
    %273 = tpu.matmul %272, %185, %cst_163 {dimension_numbers = #tpu.dot_dimension_numbers<[1], [0], [0], [1], [0, 0, 1, 1], [], []>} : vector<8x64xbf16>, vector<64x32xbf16>, vector<8x32xf32> -> vector<8x32xf32>
    %274 = arith.addf %245, %273 : vector<8x32xf32>
    %275 = vector.broadcast %187 : vector<1x32xf32> to vector<8x32xf32>
    %276 = arith.addf %274, %275 : vector<8x32xf32>
    %c2 = arith.constant 2 : index
    %c0_164 = arith.constant 0 : index
    %c0_165 = arith.constant 0 : index
    %277 = vector.load %arg3[%c2, %c0_164, %c0_165] : memref<4x1x32xf32, #tpu.memory_space<vmem>>, vector<1x1x32xf32>
    %278 = vector.shape_cast %277 : vector<1x1x32xf32> to vector<1x32xf32>
    %c2_166 = arith.constant 2 : index
    %c0_167 = arith.constant 0 : index
    %c0_168 = arith.constant 0 : index
    %279 = vector.load %arg4[%c2_166, %c0_167, %c0_168] : memref<4x1x32xf32, #tpu.memory_space<vmem>>, vector<1x1x32xf32>
    %280 = vector.shape_cast %279 : vector<1x1x32xf32> to vector<1x32xf32>
    %c2_169 = arith.constant 2 : index
    %c0_170 = arith.constant 0 : index
    %c0_171 = arith.constant 0 : index
    %281 = vector.load %arg5[%c2_169, %c0_170, %c0_171] : memref<4x1x32xf32, #tpu.memory_space<vmem>>, vector<1x1x32xf32>
    %282 = vector.shape_cast %281 : vector<1x1x32xf32> to vector<1x32xf32>
    %c2_172 = arith.constant 2 : index
    %c0_173 = arith.constant 0 : index
    %c0_174 = arith.constant 0 : index
    %283 = vector.load %arg6[%c2_172, %c0_173, %c0_174] : memref<4x1x32xf32, #tpu.memory_space<vmem>>, vector<1x1x32xf32>
    %284 = vector.shape_cast %283 : vector<1x1x32xf32> to vector<1x32xf32>
    %c2_175 = arith.constant 2 : index
    %c0_176 = arith.constant 0 : index
    %c0_177 = arith.constant 0 : index
    %c0_178 = arith.constant 0 : index
    %285 = vector.load %arg7[%c2_175, %c0_176, %c0_177, %c0_178] : memref<4x4x32x8xbf16, #tpu.memory_space<vmem>>, vector<1x4x32x8xbf16>
    %286 = vector.shape_cast %285 : vector<1x4x32x8xbf16> to vector<4x32x8xbf16>
    %c2_179 = arith.constant 2 : index
    %c0_180 = arith.constant 0 : index
    %c0_181 = arith.constant 0 : index
    %c0_182 = arith.constant 0 : index
    %287 = vector.load %arg8[%c2_179, %c0_180, %c0_181, %c0_182] : memref<4x4x1x8xf32, #tpu.memory_space<vmem>>, vector<1x4x1x8xf32>
    %288 = vector.shape_cast %287 : vector<1x4x1x8xf32> to vector<4x1x8xf32>
    %c2_183 = arith.constant 2 : index
    %c0_184 = arith.constant 0 : index
    %c0_185 = arith.constant 0 : index
    %c0_186 = arith.constant 0 : index
    %289 = vector.load %arg9[%c2_183, %c0_184, %c0_185, %c0_186] : memref<4x4x32x8xbf16, #tpu.memory_space<vmem>>, vector<1x4x32x8xbf16>
    %290 = vector.shape_cast %289 : vector<1x4x32x8xbf16> to vector<4x32x8xbf16>
    %c2_187 = arith.constant 2 : index
    %c0_188 = arith.constant 0 : index
    %c0_189 = arith.constant 0 : index
    %c0_190 = arith.constant 0 : index
    %291 = vector.load %arg10[%c2_187, %c0_188, %c0_189, %c0_190] : memref<4x4x1x8xf32, #tpu.memory_space<vmem>>, vector<1x4x1x8xf32>
    %292 = vector.shape_cast %291 : vector<1x4x1x8xf32> to vector<4x1x8xf32>
    %c2_191 = arith.constant 2 : index
    %c0_192 = arith.constant 0 : index
    %c0_193 = arith.constant 0 : index
    %c0_194 = arith.constant 0 : index
    %293 = vector.load %arg11[%c2_191, %c0_192, %c0_193, %c0_194] : memref<4x4x32x8xbf16, #tpu.memory_space<vmem>>, vector<1x4x32x8xbf16>
    %294 = vector.shape_cast %293 : vector<1x4x32x8xbf16> to vector<4x32x8xbf16>
    %c2_195 = arith.constant 2 : index
    %c0_196 = arith.constant 0 : index
    %c0_197 = arith.constant 0 : index
    %c0_198 = arith.constant 0 : index
    %295 = vector.load %arg12[%c2_195, %c0_196, %c0_197, %c0_198] : memref<4x4x1x8xf32, #tpu.memory_space<vmem>>, vector<1x4x1x8xf32>
    %296 = vector.shape_cast %295 : vector<1x4x1x8xf32> to vector<4x1x8xf32>
    %c2_199 = arith.constant 2 : index
    %c0_200 = arith.constant 0 : index
    %c0_201 = arith.constant 0 : index
    %c0_202 = arith.constant 0 : index
    %297 = vector.load %arg13[%c2_199, %c0_200, %c0_201, %c0_202] : memref<4x4x8x32xbf16, #tpu.memory_space<vmem>>, vector<1x4x8x32xbf16>
    %298 = vector.shape_cast %297 : vector<1x4x8x32xbf16> to vector<4x8x32xbf16>
    %c2_203 = arith.constant 2 : index
    %c0_204 = arith.constant 0 : index
    %c0_205 = arith.constant 0 : index
    %299 = vector.load %arg14[%c2_203, %c0_204, %c0_205] : memref<4x1x32xf32, #tpu.memory_space<vmem>>, vector<1x1x32xf32>
    %300 = vector.shape_cast %299 : vector<1x1x32xf32> to vector<1x32xf32>
    %c2_206 = arith.constant 2 : index
    %c0_207 = arith.constant 0 : index
    %c0_208 = arith.constant 0 : index
    %301 = vector.load %arg15[%c2_206, %c0_207, %c0_208] : memref<4x32x64xbf16, #tpu.memory_space<vmem>>, vector<1x32x64xbf16>
    %302 = vector.shape_cast %301 : vector<1x32x64xbf16> to vector<32x64xbf16>
    %c2_209 = arith.constant 2 : index
    %c0_210 = arith.constant 0 : index
    %c0_211 = arith.constant 0 : index
    %303 = vector.load %arg16[%c2_209, %c0_210, %c0_211] : memref<4x1x64xf32, #tpu.memory_space<vmem>>, vector<1x1x64xf32>
    %304 = vector.shape_cast %303 : vector<1x1x64xf32> to vector<1x64xf32>
    %c2_212 = arith.constant 2 : index
    %c0_213 = arith.constant 0 : index
    %c0_214 = arith.constant 0 : index
    %305 = vector.load %arg17[%c2_212, %c0_213, %c0_214] : memref<4x64x32xbf16, #tpu.memory_space<vmem>>, vector<1x64x32xbf16>
    %306 = vector.shape_cast %305 : vector<1x64x32xbf16> to vector<64x32xbf16>
    %c2_215 = arith.constant 2 : index
    %c0_216 = arith.constant 0 : index
    %c0_217 = arith.constant 0 : index
    %307 = vector.load %arg18[%c2_215, %c0_216, %c0_217] : memref<4x1x32xf32, #tpu.memory_space<vmem>>, vector<1x1x32xf32>
    %308 = vector.shape_cast %307 : vector<1x1x32xf32> to vector<1x32xf32>
    %cst_218 = arith.constant dense<0.000000e+00> : vector<8xf32>
    %309 = vector.multi_reduction <add>, %276, %cst_218 [1] : vector<8x32xf32> to vector<8xf32>
    %310 = vector.shape_cast %309 : vector<8xf32> to vector<8x1xf32>
    %cst_219 = arith.constant 3.200000e+01 : f32
    %311 = vector.broadcast %cst_219 : f32 to vector<8x1xf32>
    %312 = arith.divf %310, %311 : vector<8x1xf32>
    %313 = vector.broadcast %312 : vector<8x1xf32> to vector<8x32xf32>
    %314 = arith.subf %276, %313 : vector<8x32xf32>
    %315 = arith.mulf %314, %314 : vector<8x32xf32>
    %cst_220 = arith.constant dense<0.000000e+00> : vector<8xf32>
    %316 = vector.multi_reduction <add>, %315, %cst_220 [1] : vector<8x32xf32> to vector<8xf32>
    %317 = vector.shape_cast %316 : vector<8xf32> to vector<8x1xf32>
    %cst_221 = arith.constant 3.200000e+01 : f32
    %318 = vector.broadcast %cst_221 : f32 to vector<8x1xf32>
    %319 = arith.divf %317, %318 : vector<8x1xf32>
    %cst_222 = arith.constant 9.99999974E-6 : f32
    %320 = vector.broadcast %cst_222 : f32 to vector<8x1xf32>
    %321 = arith.addf %319, %320 : vector<8x1xf32>
    %322 = math.rsqrt %321 : vector<8x1xf32>
    %323 = vector.broadcast %322 : vector<8x1xf32> to vector<8x32xf32>
    %324 = arith.mulf %314, %323 : vector<8x32xf32>
    %325 = vector.broadcast %278 : vector<1x32xf32> to vector<8x32xf32>
    %326 = arith.mulf %324, %325 : vector<8x32xf32>
    %327 = vector.broadcast %280 : vector<1x32xf32> to vector<8x32xf32>
    %328 = arith.addf %326, %327 : vector<8x32xf32>
    %329 = arith.truncf %328 : vector<8x32xf32> to vector<8x32xbf16>
    %330 = vector.shape_cast %329 : vector<8x32xbf16> to vector<1x8x32xbf16>
    %331 = vector.shape_cast %330 : vector<1x8x32xbf16> to vector<1x8x32xbf16>
    %332 = vector.broadcast %331 : vector<1x8x32xbf16> to vector<4x8x32xbf16>
    "tpu.trace_start"() <{level = 10 : i32, message = "htd,hdk->htk"}> : () -> ()
    %cst_223 = arith.constant dense<0.000000e+00> : vector<4x8x8xf32>
    %333 = tpu.matmul %332, %286, %cst_223 {dimension_numbers = #tpu.dot_dimension_numbers<[2], [1], [1], [2], [0, 0, 0, 1, 1, 2], [0], [0]>} : vector<4x8x32xbf16>, vector<4x32x8xbf16>, vector<4x8x8xf32> -> vector<4x8x8xf32>
    "tpu.trace_stop"() : () -> ()
    %334 = vector.broadcast %288 : vector<4x1x8xf32> to vector<4x8x8xf32>
    %335 = arith.addf %333, %334 : vector<4x8x8xf32>
    "tpu.trace_start"() <{level = 10 : i32, message = "htd,hdk->htk"}> : () -> ()
    %cst_224 = arith.constant dense<0.000000e+00> : vector<4x8x8xf32>
    %336 = tpu.matmul %332, %290, %cst_224 {dimension_numbers = #tpu.dot_dimension_numbers<[2], [1], [1], [2], [0, 0, 0, 1, 1, 2], [0], [0]>} : vector<4x8x32xbf16>, vector<4x32x8xbf16>, vector<4x8x8xf32> -> vector<4x8x8xf32>
    "tpu.trace_stop"() : () -> ()
    %337 = vector.broadcast %292 : vector<4x1x8xf32> to vector<4x8x8xf32>
    %338 = arith.addf %336, %337 : vector<4x8x8xf32>
    "tpu.trace_start"() <{level = 10 : i32, message = "htd,hdk->htk"}> : () -> ()
    %cst_225 = arith.constant dense<0.000000e+00> : vector<4x8x8xf32>
    %339 = tpu.matmul %332, %294, %cst_225 {dimension_numbers = #tpu.dot_dimension_numbers<[2], [1], [1], [2], [0, 0, 0, 1, 1, 2], [0], [0]>} : vector<4x8x32xbf16>, vector<4x32x8xbf16>, vector<4x8x8xf32> -> vector<4x8x8xf32>
    "tpu.trace_stop"() : () -> ()
    %340 = vector.broadcast %296 : vector<4x1x8xf32> to vector<4x8x8xf32>
    %341 = arith.addf %339, %340 : vector<4x8x8xf32>
    %342 = arith.truncf %335 : vector<4x8x8xf32> to vector<4x8x8xbf16>
    %343 = arith.truncf %338 : vector<4x8x8xf32> to vector<4x8x8xbf16>
    "tpu.trace_start"() <{level = 10 : i32, message = "hqd,hkd->hqk"}> : () -> ()
    %cst_226 = arith.constant dense<0.000000e+00> : vector<4x8x8xf32>
    %344 = tpu.matmul %342, %343, %cst_226 {dimension_numbers = #tpu.dot_dimension_numbers<[2], [2], [1], [1], [0, 0, 0, 1, 1, 1], [0], [0]>} : vector<4x8x8xbf16>, vector<4x8x8xbf16>, vector<4x8x8xf32> -> vector<4x8x8xf32>
    "tpu.trace_stop"() : () -> ()
    %345 = vector.shape_cast %5 : vector<8x8xf32> to vector<1x8x8xf32>
    %346 = vector.broadcast %345 : vector<1x8x8xf32> to vector<4x8x8xf32>
    %347 = arith.addf %344, %346 : vector<4x8x8xf32>
    %cst_227 = arith.constant dense<0xFF800000> : vector<4x8xf32>
    %348 = vector.multi_reduction <maximumf>, %347, %cst_227 [2] : vector<4x8x8xf32> to vector<4x8xf32>
    %349 = vector.shape_cast %348 : vector<4x8xf32> to vector<4x8x1xf32>
    %350 = vector.broadcast %349 : vector<4x8x1xf32> to vector<4x8x8xf32>
    %351 = arith.subf %347, %350 : vector<4x8x8xf32>
    %352 = math.exp %351 : vector<4x8x8xf32>
    %cst_228 = arith.constant dense<0.000000e+00> : vector<4x8xf32>
    %353 = vector.multi_reduction <add>, %352, %cst_228 [2] : vector<4x8x8xf32> to vector<4x8xf32>
    %354 = vector.shape_cast %353 : vector<4x8xf32> to vector<4x8x1xf32>
    %355 = tpu.reciprocal %354 {approx = true} : vector<4x8x1xf32> -> vector<4x8x1xf32>
    %356 = vector.broadcast %355 : vector<4x8x1xf32> to vector<4x8x8xf32>
    %357 = arith.mulf %352, %356 : vector<4x8x8xf32>
    %358 = arith.truncf %357 : vector<4x8x8xf32> to vector<4x8x8xbf16>
    %359 = arith.truncf %341 : vector<4x8x8xf32> to vector<4x8x8xbf16>
    "tpu.trace_start"() <{level = 10 : i32, message = "hqk,hkd->hqd"}> : () -> ()
    %cst_229 = arith.constant dense<0.000000e+00> : vector<4x8x8xf32>
    %360 = tpu.matmul %358, %359, %cst_229 {dimension_numbers = #tpu.dot_dimension_numbers<[2], [1], [1], [2], [0, 0, 0, 1, 1, 2], [0], [0]>} : vector<4x8x8xbf16>, vector<4x8x8xbf16>, vector<4x8x8xf32> -> vector<4x8x8xf32>
    "tpu.trace_stop"() : () -> ()
    %361 = arith.truncf %360 : vector<4x8x8xf32> to vector<4x8x8xbf16>
    "tpu.trace_start"() <{level = 10 : i32, message = "hqd,hdo->hqo"}> : () -> ()
    %cst_230 = arith.constant dense<0.000000e+00> : vector<4x8x32xf32>
    %362 = tpu.matmul %361, %298, %cst_230 {dimension_numbers = #tpu.dot_dimension_numbers<[2], [1], [1], [2], [0, 0, 0, 1, 1, 2], [0], [0]>} : vector<4x8x8xbf16>, vector<4x8x32xbf16>, vector<4x8x32xf32> -> vector<4x8x32xf32>
    "tpu.trace_stop"() : () -> ()
    %cst_231 = arith.constant dense<0.000000e+00> : vector<8x32xf32>
    %363 = vector.multi_reduction <add>, %362, %cst_231 [0] : vector<4x8x32xf32> to vector<8x32xf32>
    %364 = vector.broadcast %300 : vector<1x32xf32> to vector<8x32xf32>
    %365 = arith.addf %363, %364 : vector<8x32xf32>
    %366 = arith.addf %276, %365 : vector<8x32xf32>
    %cst_232 = arith.constant dense<0.000000e+00> : vector<8xf32>
    %367 = vector.multi_reduction <add>, %366, %cst_232 [1] : vector<8x32xf32> to vector<8xf32>
    %368 = vector.shape_cast %367 : vector<8xf32> to vector<8x1xf32>
    %cst_233 = arith.constant 3.200000e+01 : f32
    %369 = vector.broadcast %cst_233 : f32 to vector<8x1xf32>
    %370 = arith.divf %368, %369 : vector<8x1xf32>
    %371 = vector.broadcast %370 : vector<8x1xf32> to vector<8x32xf32>
    %372 = arith.subf %366, %371 : vector<8x32xf32>
    %373 = arith.mulf %372, %372 : vector<8x32xf32>
    %cst_234 = arith.constant dense<0.000000e+00> : vector<8xf32>
    %374 = vector.multi_reduction <add>, %373, %cst_234 [1] : vector<8x32xf32> to vector<8xf32>
    %375 = vector.shape_cast %374 : vector<8xf32> to vector<8x1xf32>
    %cst_235 = arith.constant 3.200000e+01 : f32
    %376 = vector.broadcast %cst_235 : f32 to vector<8x1xf32>
    %377 = arith.divf %375, %376 : vector<8x1xf32>
    %cst_236 = arith.constant 9.99999974E-6 : f32
    %378 = vector.broadcast %cst_236 : f32 to vector<8x1xf32>
    %379 = arith.addf %377, %378 : vector<8x1xf32>
    %380 = math.rsqrt %379 : vector<8x1xf32>
    %381 = vector.broadcast %380 : vector<8x1xf32> to vector<8x32xf32>
    %382 = arith.mulf %372, %381 : vector<8x32xf32>
    %383 = vector.broadcast %282 : vector<1x32xf32> to vector<8x32xf32>
    %384 = arith.mulf %382, %383 : vector<8x32xf32>
    %385 = vector.broadcast %284 : vector<1x32xf32> to vector<8x32xf32>
    %386 = arith.addf %384, %385 : vector<8x32xf32>
    %387 = arith.truncf %386 : vector<8x32xf32> to vector<8x32xbf16>
    %cst_237 = arith.constant dense<0.000000e+00> : vector<8x64xf32>
    %388 = tpu.matmul %387, %302, %cst_237 {dimension_numbers = #tpu.dot_dimension_numbers<[1], [0], [0], [1], [0, 0, 1, 1], [], []>} : vector<8x32xbf16>, vector<32x64xbf16>, vector<8x64xf32> -> vector<8x64xf32>
    %389 = vector.broadcast %304 : vector<1x64xf32> to vector<8x64xf32>
    %390 = arith.addf %388, %389 : vector<8x64xf32>
    %cst_238 = arith.constant 0.000000e+00 : f32
    %391 = vector.broadcast %cst_238 : f32 to vector<8x64xf32>
    %392 = arith.maximumf %390, %391 : vector<8x64xf32>
    %393 = arith.truncf %392 : vector<8x64xf32> to vector<8x64xbf16>
    %cst_239 = arith.constant dense<0.000000e+00> : vector<8x32xf32>
    %394 = tpu.matmul %393, %306, %cst_239 {dimension_numbers = #tpu.dot_dimension_numbers<[1], [0], [0], [1], [0, 0, 1, 1], [], []>} : vector<8x64xbf16>, vector<64x32xbf16>, vector<8x32xf32> -> vector<8x32xf32>
    %395 = arith.addf %366, %394 : vector<8x32xf32>
    %396 = vector.broadcast %308 : vector<1x32xf32> to vector<8x32xf32>
    %397 = arith.addf %395, %396 : vector<8x32xf32>
    %c3 = arith.constant 3 : index
    %c0_240 = arith.constant 0 : index
    %c0_241 = arith.constant 0 : index
    %398 = vector.load %arg3[%c3, %c0_240, %c0_241] : memref<4x1x32xf32, #tpu.memory_space<vmem>>, vector<1x1x32xf32>
    %399 = vector.shape_cast %398 : vector<1x1x32xf32> to vector<1x32xf32>
    %c3_242 = arith.constant 3 : index
    %c0_243 = arith.constant 0 : index
    %c0_244 = arith.constant 0 : index
    %400 = vector.load %arg4[%c3_242, %c0_243, %c0_244] : memref<4x1x32xf32, #tpu.memory_space<vmem>>, vector<1x1x32xf32>
    %401 = vector.shape_cast %400 : vector<1x1x32xf32> to vector<1x32xf32>
    %c3_245 = arith.constant 3 : index
    %c0_246 = arith.constant 0 : index
    %c0_247 = arith.constant 0 : index
    %402 = vector.load %arg5[%c3_245, %c0_246, %c0_247] : memref<4x1x32xf32, #tpu.memory_space<vmem>>, vector<1x1x32xf32>
    %403 = vector.shape_cast %402 : vector<1x1x32xf32> to vector<1x32xf32>
    %c3_248 = arith.constant 3 : index
    %c0_249 = arith.constant 0 : index
    %c0_250 = arith.constant 0 : index
    %404 = vector.load %arg6[%c3_248, %c0_249, %c0_250] : memref<4x1x32xf32, #tpu.memory_space<vmem>>, vector<1x1x32xf32>
    %405 = vector.shape_cast %404 : vector<1x1x32xf32> to vector<1x32xf32>
    %c3_251 = arith.constant 3 : index
    %c0_252 = arith.constant 0 : index
    %c0_253 = arith.constant 0 : index
    %c0_254 = arith.constant 0 : index
    %406 = vector.load %arg7[%c3_251, %c0_252, %c0_253, %c0_254] : memref<4x4x32x8xbf16, #tpu.memory_space<vmem>>, vector<1x4x32x8xbf16>
    %407 = vector.shape_cast %406 : vector<1x4x32x8xbf16> to vector<4x32x8xbf16>
    %c3_255 = arith.constant 3 : index
    %c0_256 = arith.constant 0 : index
    %c0_257 = arith.constant 0 : index
    %c0_258 = arith.constant 0 : index
    %408 = vector.load %arg8[%c3_255, %c0_256, %c0_257, %c0_258] : memref<4x4x1x8xf32, #tpu.memory_space<vmem>>, vector<1x4x1x8xf32>
    %409 = vector.shape_cast %408 : vector<1x4x1x8xf32> to vector<4x1x8xf32>
    %c3_259 = arith.constant 3 : index
    %c0_260 = arith.constant 0 : index
    %c0_261 = arith.constant 0 : index
    %c0_262 = arith.constant 0 : index
    %410 = vector.load %arg9[%c3_259, %c0_260, %c0_261, %c0_262] : memref<4x4x32x8xbf16, #tpu.memory_space<vmem>>, vector<1x4x32x8xbf16>
    %411 = vector.shape_cast %410 : vector<1x4x32x8xbf16> to vector<4x32x8xbf16>
    %c3_263 = arith.constant 3 : index
    %c0_264 = arith.constant 0 : index
    %c0_265 = arith.constant 0 : index
    %c0_266 = arith.constant 0 : index
    %412 = vector.load %arg10[%c3_263, %c0_264, %c0_265, %c0_266] : memref<4x4x1x8xf32, #tpu.memory_space<vmem>>, vector<1x4x1x8xf32>
    %413 = vector.shape_cast %412 : vector<1x4x1x8xf32> to vector<4x1x8xf32>
    %c3_267 = arith.constant 3 : index
    %c0_268 = arith.constant 0 : index
    %c0_269 = arith.constant 0 : index
    %c0_270 = arith.constant 0 : index
    %414 = vector.load %arg11[%c3_267, %c0_268, %c0_269, %c0_270] : memref<4x4x32x8xbf16, #tpu.memory_space<vmem>>, vector<1x4x32x8xbf16>
    %415 = vector.shape_cast %414 : vector<1x4x32x8xbf16> to vector<4x32x8xbf16>
    %c3_271 = arith.constant 3 : index
    %c0_272 = arith.constant 0 : index
    %c0_273 = arith.constant 0 : index
    %c0_274 = arith.constant 0 : index
    %416 = vector.load %arg12[%c3_271, %c0_272, %c0_273, %c0_274] : memref<4x4x1x8xf32, #tpu.memory_space<vmem>>, vector<1x4x1x8xf32>
    %417 = vector.shape_cast %416 : vector<1x4x1x8xf32> to vector<4x1x8xf32>
    %c3_275 = arith.constant 3 : index
    %c0_276 = arith.constant 0 : index
    %c0_277 = arith.constant 0 : index
    %c0_278 = arith.constant 0 : index
    %418 = vector.load %arg13[%c3_275, %c0_276, %c0_277, %c0_278] : memref<4x4x8x32xbf16, #tpu.memory_space<vmem>>, vector<1x4x8x32xbf16>
    %419 = vector.shape_cast %418 : vector<1x4x8x32xbf16> to vector<4x8x32xbf16>
    %c3_279 = arith.constant 3 : index
    %c0_280 = arith.constant 0 : index
    %c0_281 = arith.constant 0 : index
    %420 = vector.load %arg14[%c3_279, %c0_280, %c0_281] : memref<4x1x32xf32, #tpu.memory_space<vmem>>, vector<1x1x32xf32>
    %421 = vector.shape_cast %420 : vector<1x1x32xf32> to vector<1x32xf32>
    %c3_282 = arith.constant 3 : index
    %c0_283 = arith.constant 0 : index
    %c0_284 = arith.constant 0 : index
    %422 = vector.load %arg15[%c3_282, %c0_283, %c0_284] : memref<4x32x64xbf16, #tpu.memory_space<vmem>>, vector<1x32x64xbf16>
    %423 = vector.shape_cast %422 : vector<1x32x64xbf16> to vector<32x64xbf16>
    %c3_285 = arith.constant 3 : index
    %c0_286 = arith.constant 0 : index
    %c0_287 = arith.constant 0 : index
    %424 = vector.load %arg16[%c3_285, %c0_286, %c0_287] : memref<4x1x64xf32, #tpu.memory_space<vmem>>, vector<1x1x64xf32>
    %425 = vector.shape_cast %424 : vector<1x1x64xf32> to vector<1x64xf32>
    %c3_288 = arith.constant 3 : index
    %c0_289 = arith.constant 0 : index
    %c0_290 = arith.constant 0 : index
    %426 = vector.load %arg17[%c3_288, %c0_289, %c0_290] : memref<4x64x32xbf16, #tpu.memory_space<vmem>>, vector<1x64x32xbf16>
    %427 = vector.shape_cast %426 : vector<1x64x32xbf16> to vector<64x32xbf16>
    %c3_291 = arith.constant 3 : index
    %c0_292 = arith.constant 0 : index
    %c0_293 = arith.constant 0 : index
    %428 = vector.load %arg18[%c3_291, %c0_292, %c0_293] : memref<4x1x32xf32, #tpu.memory_space<vmem>>, vector<1x1x32xf32>
    %429 = vector.shape_cast %428 : vector<1x1x32xf32> to vector<1x32xf32>
    %cst_294 = arith.constant dense<0.000000e+00> : vector<8xf32>
    %430 = vector.multi_reduction <add>, %397, %cst_294 [1] : vector<8x32xf32> to vector<8xf32>
    %431 = vector.shape_cast %430 : vector<8xf32> to vector<8x1xf32>
    %cst_295 = arith.constant 3.200000e+01 : f32
    %432 = vector.broadcast %cst_295 : f32 to vector<8x1xf32>
    %433 = arith.divf %431, %432 : vector<8x1xf32>
    %434 = vector.broadcast %433 : vector<8x1xf32> to vector<8x32xf32>
    %435 = arith.subf %397, %434 : vector<8x32xf32>
    %436 = arith.mulf %435, %435 : vector<8x32xf32>
    %cst_296 = arith.constant dense<0.000000e+00> : vector<8xf32>
    %437 = vector.multi_reduction <add>, %436, %cst_296 [1] : vector<8x32xf32> to vector<8xf32>
    %438 = vector.shape_cast %437 : vector<8xf32> to vector<8x1xf32>
    %cst_297 = arith.constant 3.200000e+01 : f32
    %439 = vector.broadcast %cst_297 : f32 to vector<8x1xf32>
    %440 = arith.divf %438, %439 : vector<8x1xf32>
    %cst_298 = arith.constant 9.99999974E-6 : f32
    %441 = vector.broadcast %cst_298 : f32 to vector<8x1xf32>
    %442 = arith.addf %440, %441 : vector<8x1xf32>
    %443 = math.rsqrt %442 : vector<8x1xf32>
    %444 = vector.broadcast %443 : vector<8x1xf32> to vector<8x32xf32>
    %445 = arith.mulf %435, %444 : vector<8x32xf32>
    %446 = vector.broadcast %399 : vector<1x32xf32> to vector<8x32xf32>
    %447 = arith.mulf %445, %446 : vector<8x32xf32>
    %448 = vector.broadcast %401 : vector<1x32xf32> to vector<8x32xf32>
    %449 = arith.addf %447, %448 : vector<8x32xf32>
    %450 = arith.truncf %449 : vector<8x32xf32> to vector<8x32xbf16>
    %451 = vector.shape_cast %450 : vector<8x32xbf16> to vector<1x8x32xbf16>
    %452 = vector.shape_cast %451 : vector<1x8x32xbf16> to vector<1x8x32xbf16>
    %453 = vector.broadcast %452 : vector<1x8x32xbf16> to vector<4x8x32xbf16>
    "tpu.trace_start"() <{level = 10 : i32, message = "htd,hdk->htk"}> : () -> ()
    %cst_299 = arith.constant dense<0.000000e+00> : vector<4x8x8xf32>
    %454 = tpu.matmul %453, %407, %cst_299 {dimension_numbers = #tpu.dot_dimension_numbers<[2], [1], [1], [2], [0, 0, 0, 1, 1, 2], [0], [0]>} : vector<4x8x32xbf16>, vector<4x32x8xbf16>, vector<4x8x8xf32> -> vector<4x8x8xf32>
    "tpu.trace_stop"() : () -> ()
    %455 = vector.broadcast %409 : vector<4x1x8xf32> to vector<4x8x8xf32>
    %456 = arith.addf %454, %455 : vector<4x8x8xf32>
    "tpu.trace_start"() <{level = 10 : i32, message = "htd,hdk->htk"}> : () -> ()
    %cst_300 = arith.constant dense<0.000000e+00> : vector<4x8x8xf32>
    %457 = tpu.matmul %453, %411, %cst_300 {dimension_numbers = #tpu.dot_dimension_numbers<[2], [1], [1], [2], [0, 0, 0, 1, 1, 2], [0], [0]>} : vector<4x8x32xbf16>, vector<4x32x8xbf16>, vector<4x8x8xf32> -> vector<4x8x8xf32>
    "tpu.trace_stop"() : () -> ()
    %458 = vector.broadcast %413 : vector<4x1x8xf32> to vector<4x8x8xf32>
    %459 = arith.addf %457, %458 : vector<4x8x8xf32>
    "tpu.trace_start"() <{level = 10 : i32, message = "htd,hdk->htk"}> : () -> ()
    %cst_301 = arith.constant dense<0.000000e+00> : vector<4x8x8xf32>
    %460 = tpu.matmul %453, %415, %cst_301 {dimension_numbers = #tpu.dot_dimension_numbers<[2], [1], [1], [2], [0, 0, 0, 1, 1, 2], [0], [0]>} : vector<4x8x32xbf16>, vector<4x32x8xbf16>, vector<4x8x8xf32> -> vector<4x8x8xf32>
    "tpu.trace_stop"() : () -> ()
    %461 = vector.broadcast %417 : vector<4x1x8xf32> to vector<4x8x8xf32>
    %462 = arith.addf %460, %461 : vector<4x8x8xf32>
    %463 = arith.truncf %456 : vector<4x8x8xf32> to vector<4x8x8xbf16>
    %464 = arith.truncf %459 : vector<4x8x8xf32> to vector<4x8x8xbf16>
    "tpu.trace_start"() <{level = 10 : i32, message = "hqd,hkd->hqk"}> : () -> ()
    %cst_302 = arith.constant dense<0.000000e+00> : vector<4x8x8xf32>
    %465 = tpu.matmul %463, %464, %cst_302 {dimension_numbers = #tpu.dot_dimension_numbers<[2], [2], [1], [1], [0, 0, 0, 1, 1, 1], [0], [0]>} : vector<4x8x8xbf16>, vector<4x8x8xbf16>, vector<4x8x8xf32> -> vector<4x8x8xf32>
    "tpu.trace_stop"() : () -> ()
    %466 = vector.shape_cast %5 : vector<8x8xf32> to vector<1x8x8xf32>
    %467 = vector.broadcast %466 : vector<1x8x8xf32> to vector<4x8x8xf32>
    %468 = arith.addf %465, %467 : vector<4x8x8xf32>
    %cst_303 = arith.constant dense<0xFF800000> : vector<4x8xf32>
    %469 = vector.multi_reduction <maximumf>, %468, %cst_303 [2] : vector<4x8x8xf32> to vector<4x8xf32>
    %470 = vector.shape_cast %469 : vector<4x8xf32> to vector<4x8x1xf32>
    %471 = vector.broadcast %470 : vector<4x8x1xf32> to vector<4x8x8xf32>
    %472 = arith.subf %468, %471 : vector<4x8x8xf32>
    %473 = math.exp %472 : vector<4x8x8xf32>
    %cst_304 = arith.constant dense<0.000000e+00> : vector<4x8xf32>
    %474 = vector.multi_reduction <add>, %473, %cst_304 [2] : vector<4x8x8xf32> to vector<4x8xf32>
    %475 = vector.shape_cast %474 : vector<4x8xf32> to vector<4x8x1xf32>
    %476 = tpu.reciprocal %475 {approx = true} : vector<4x8x1xf32> -> vector<4x8x1xf32>
    %477 = vector.broadcast %476 : vector<4x8x1xf32> to vector<4x8x8xf32>
    %478 = arith.mulf %473, %477 : vector<4x8x8xf32>
    %479 = arith.truncf %478 : vector<4x8x8xf32> to vector<4x8x8xbf16>
    %480 = arith.truncf %462 : vector<4x8x8xf32> to vector<4x8x8xbf16>
    "tpu.trace_start"() <{level = 10 : i32, message = "hqk,hkd->hqd"}> : () -> ()
    %cst_305 = arith.constant dense<0.000000e+00> : vector<4x8x8xf32>
    %481 = tpu.matmul %479, %480, %cst_305 {dimension_numbers = #tpu.dot_dimension_numbers<[2], [1], [1], [2], [0, 0, 0, 1, 1, 2], [0], [0]>} : vector<4x8x8xbf16>, vector<4x8x8xbf16>, vector<4x8x8xf32> -> vector<4x8x8xf32>
    "tpu.trace_stop"() : () -> ()
    %482 = arith.truncf %481 : vector<4x8x8xf32> to vector<4x8x8xbf16>
    "tpu.trace_start"() <{level = 10 : i32, message = "hqd,hdo->hqo"}> : () -> ()
    %cst_306 = arith.constant dense<0.000000e+00> : vector<4x8x32xf32>
    %483 = tpu.matmul %482, %419, %cst_306 {dimension_numbers = #tpu.dot_dimension_numbers<[2], [1], [1], [2], [0, 0, 0, 1, 1, 2], [0], [0]>} : vector<4x8x8xbf16>, vector<4x8x32xbf16>, vector<4x8x32xf32> -> vector<4x8x32xf32>
    "tpu.trace_stop"() : () -> ()
    %cst_307 = arith.constant dense<0.000000e+00> : vector<8x32xf32>
    %484 = vector.multi_reduction <add>, %483, %cst_307 [0] : vector<4x8x32xf32> to vector<8x32xf32>
    %485 = vector.broadcast %421 : vector<1x32xf32> to vector<8x32xf32>
    %486 = arith.addf %484, %485 : vector<8x32xf32>
    %487 = arith.addf %397, %486 : vector<8x32xf32>
    %cst_308 = arith.constant dense<0.000000e+00> : vector<8xf32>
    %488 = vector.multi_reduction <add>, %487, %cst_308 [1] : vector<8x32xf32> to vector<8xf32>
    %489 = vector.shape_cast %488 : vector<8xf32> to vector<8x1xf32>
    %cst_309 = arith.constant 3.200000e+01 : f32
    %490 = vector.broadcast %cst_309 : f32 to vector<8x1xf32>
    %491 = arith.divf %489, %490 : vector<8x1xf32>
    %492 = vector.broadcast %491 : vector<8x1xf32> to vector<8x32xf32>
    %493 = arith.subf %487, %492 : vector<8x32xf32>
    %494 = arith.mulf %493, %493 : vector<8x32xf32>
    %cst_310 = arith.constant dense<0.000000e+00> : vector<8xf32>
    %495 = vector.multi_reduction <add>, %494, %cst_310 [1] : vector<8x32xf32> to vector<8xf32>
    %496 = vector.shape_cast %495 : vector<8xf32> to vector<8x1xf32>
    %cst_311 = arith.constant 3.200000e+01 : f32
    %497 = vector.broadcast %cst_311 : f32 to vector<8x1xf32>
    %498 = arith.divf %496, %497 : vector<8x1xf32>
    %cst_312 = arith.constant 9.99999974E-6 : f32
    %499 = vector.broadcast %cst_312 : f32 to vector<8x1xf32>
    %500 = arith.addf %498, %499 : vector<8x1xf32>
    %501 = math.rsqrt %500 : vector<8x1xf32>
    %502 = vector.broadcast %501 : vector<8x1xf32> to vector<8x32xf32>
    %503 = arith.mulf %493, %502 : vector<8x32xf32>
    %504 = vector.broadcast %403 : vector<1x32xf32> to vector<8x32xf32>
    %505 = arith.mulf %503, %504 : vector<8x32xf32>
    %506 = vector.broadcast %405 : vector<1x32xf32> to vector<8x32xf32>
    %507 = arith.addf %505, %506 : vector<8x32xf32>
    %508 = arith.truncf %507 : vector<8x32xf32> to vector<8x32xbf16>
    %cst_313 = arith.constant dense<0.000000e+00> : vector<8x64xf32>
    %509 = tpu.matmul %508, %423, %cst_313 {dimension_numbers = #tpu.dot_dimension_numbers<[1], [0], [0], [1], [0, 0, 1, 1], [], []>} : vector<8x32xbf16>, vector<32x64xbf16>, vector<8x64xf32> -> vector<8x64xf32>
    %510 = vector.broadcast %425 : vector<1x64xf32> to vector<8x64xf32>
    %511 = arith.addf %509, %510 : vector<8x64xf32>
    %cst_314 = arith.constant 0.000000e+00 : f32
    %512 = vector.broadcast %cst_314 : f32 to vector<8x64xf32>
    %513 = arith.maximumf %511, %512 : vector<8x64xf32>
    %514 = arith.truncf %513 : vector<8x64xf32> to vector<8x64xbf16>
    %cst_315 = arith.constant dense<0.000000e+00> : vector<8x32xf32>
    %515 = tpu.matmul %514, %427, %cst_315 {dimension_numbers = #tpu.dot_dimension_numbers<[1], [0], [0], [1], [0, 0, 1, 1], [], []>} : vector<8x64xbf16>, vector<64x32xbf16>, vector<8x32xf32> -> vector<8x32xf32>
    %516 = arith.addf %487, %515 : vector<8x32xf32>
    %517 = vector.broadcast %429 : vector<1x32xf32> to vector<8x32xf32>
    %518 = arith.addf %516, %517 : vector<8x32xf32>
    %c0_316 = arith.constant 0 : index
    %c0_317 = arith.constant 0 : index
    %c0_318 = arith.constant 0 : index
    %519 = vector.load %arg19[%c0_316, %c0_317, %c0_318] : memref<1x8x32xf32, #tpu.memory_space<vmem>>, vector<1x8x32xf32>
    %520 = vector.shape_cast %519 : vector<1x8x32xf32> to vector<8x32xf32>
    %521 = vector.shape_cast %518 : vector<8x32xf32> to vector<1x8x32xf32>
    tpu.vector_store %arg19[%c0_316, %c0_317, %c0_318], %521 {strides = array<i32>} : memref<1x8x32xf32, #tpu.memory_space<vmem>>, vector<1x8x32xf32>,
    return
  }
  func.func @transform_0(%arg0: i32) -> (i32, i32, i32) {
    %c0_i32 = arith.constant 0 : i32
    %c0_i32_0 = arith.constant 0 : i32
    %c0_i32_1 = arith.constant 0 : i32
    return %arg0, %c0_i32, %c0_i32_0 : i32, i32, i32
  }
  func.func @transform_1(%arg0: i32) -> (i32, i32, i32) {
    %c0_i32 = arith.constant 0 : i32
    %c0_i32_0 = arith.constant 0 : i32
    %c0_i32_1 = arith.constant 0 : i32
    return %arg0, %c0_i32, %c0_i32_0 : i32, i32, i32
  }
  func.func @transform_2(%arg0: i32) -> (i32, i32, i32) {
    %c0_i32 = arith.constant 0 : i32
    %c0_i32_0 = arith.constant 0 : i32
    %c0_i32_1 = arith.constant 0 : i32
    %c0_i32_2 = arith.constant 0 : i32
    return %c0_i32, %c0_i32_0, %c0_i32_1 : i32, i32, i32
  }
  func.func @transform_3(%arg0: i32) -> (i32, i32, i32) {
    %c0_i32 = arith.constant 0 : i32
    %c0_i32_0 = arith.constant 0 : i32
    %c0_i32_1 = arith.constant 0 : i32
    %c0_i32_2 = arith.constant 0 : i32
    return %c0_i32, %c0_i32_0, %c0_i32_1 : i32, i32, i32
  }
  func.func @transform_4(%arg0: i32) -> (i32, i32, i32) {
    %c0_i32 = arith.constant 0 : i32
    %c0_i32_0 = arith.constant 0 : i32
    %c0_i32_1 = arith.constant 0 : i32
    %c0_i32_2 = arith.constant 0 : i32
    return %c0_i32, %c0_i32_0, %c0_i32_1 : i32, i32, i32
  }
  func.func @transform_5(%arg0: i32) -> (i32, i32, i32) {
    %c0_i32 = arith.constant 0 : i32
    %c0_i32_0 = arith.constant 0 : i32
    %c0_i32_1 = arith.constant 0 : i32
    %c0_i32_2 = arith.constant 0 : i32
    return %c0_i32, %c0_i32_0, %c0_i32_1 : i32, i32, i32
  }
  func.func @transform_6(%arg0: i32) -> (i32, i32, i32, i32) {
    %c0_i32 = arith.constant 0 : i32
    %c0_i32_0 = arith.constant 0 : i32
    %c0_i32_1 = arith.constant 0 : i32
    %c0_i32_2 = arith.constant 0 : i32
    %c0_i32_3 = arith.constant 0 : i32
    return %c0_i32, %c0_i32_0, %c0_i32_1, %c0_i32_2 : i32, i32, i32, i32
  }
  func.func @transform_7(%arg0: i32) -> (i32, i32, i32, i32) {
    %c0_i32 = arith.constant 0 : i32
    %c0_i32_0 = arith.constant 0 : i32
    %c0_i32_1 = arith.constant 0 : i32
    %c0_i32_2 = arith.constant 0 : i32
    %c0_i32_3 = arith.constant 0 : i32
    return %c0_i32, %c0_i32_0, %c0_i32_1, %c0_i32_2 : i32, i32, i32, i32
  }
  func.func @transform_8(%arg0: i32) -> (i32, i32, i32, i32) {
    %c0_i32 = arith.constant 0 : i32
    %c0_i32_0 = arith.constant 0 : i32
    %c0_i32_1 = arith.constant 0 : i32
    %c0_i32_2 = arith.constant 0 : i32
    %c0_i32_3 = arith.constant 0 : i32
    return %c0_i32, %c0_i32_0, %c0_i32_1, %c0_i32_2 : i32, i32, i32, i32
  }
  func.func @transform_9(%arg0: i32) -> (i32, i32, i32, i32) {
    %c0_i32 = arith.constant 0 : i32
    %c0_i32_0 = arith.constant 0 : i32
    %c0_i32_1 = arith.constant 0 : i32
    %c0_i32_2 = arith.constant 0 : i32
    %c0_i32_3 = arith.constant 0 : i32
    return %c0_i32, %c0_i32_0, %c0_i32_1, %c0_i32_2 : i32, i32, i32, i32
  }
  func.func @transform_10(%arg0: i32) -> (i32, i32, i32, i32) {
    %c0_i32 = arith.constant 0 : i32
    %c0_i32_0 = arith.constant 0 : i32
    %c0_i32_1 = arith.constant 0 : i32
    %c0_i32_2 = arith.constant 0 : i32
    %c0_i32_3 = arith.constant 0 : i32
    return %c0_i32, %c0_i32_0, %c0_i32_1, %c0_i32_2 : i32, i32, i32, i32
  }
  func.func @transform_11(%arg0: i32) -> (i32, i32, i32, i32) {
    %c0_i32 = arith.constant 0 : i32
    %c0_i32_0 = arith.constant 0 : i32
    %c0_i32_1 = arith.constant 0 : i32
    %c0_i32_2 = arith.constant 0 : i32
    %c0_i32_3 = arith.constant 0 : i32
    return %c0_i32, %c0_i32_0, %c0_i32_1, %c0_i32_2 : i32, i32, i32, i32
  }
  func.func @transform_12(%arg0: i32) -> (i32, i32, i32, i32) {
    %c0_i32 = arith.constant 0 : i32
    %c0_i32_0 = arith.constant 0 : i32
    %c0_i32_1 = arith.constant 0 : i32
    %c0_i32_2 = arith.constant 0 : i32
    %c0_i32_3 = arith.constant 0 : i32
    return %c0_i32, %c0_i32_0, %c0_i32_1, %c0_i32_2 : i32, i32, i32, i32
  }
  func.func @transform_13(%arg0: i32) -> (i32, i32, i32) {
    %c0_i32 = arith.constant 0 : i32
    %c0_i32_0 = arith.constant 0 : i32
    %c0_i32_1 = arith.constant 0 : i32
    %c0_i32_2 = arith.constant 0 : i32
    return %c0_i32, %c0_i32_0, %c0_i32_1 : i32, i32, i32
  }
  func.func @transform_14(%arg0: i32) -> (i32, i32, i32) {
    %c0_i32 = arith.constant 0 : i32
    %c0_i32_0 = arith.constant 0 : i32
    %c0_i32_1 = arith.constant 0 : i32
    %c0_i32_2 = arith.constant 0 : i32
    return %c0_i32, %c0_i32_0, %c0_i32_1 : i32, i32, i32
  }
  func.func @transform_15(%arg0: i32) -> (i32, i32, i32) {
    %c0_i32 = arith.constant 0 : i32
    %c0_i32_0 = arith.constant 0 : i32
    %c0_i32_1 = arith.constant 0 : i32
    %c0_i32_2 = arith.constant 0 : i32
    return %c0_i32, %c0_i32_0, %c0_i32_1 : i32, i32, i32
  }
  func.func @transform_16(%arg0: i32) -> (i32, i32, i32) {
    %c0_i32 = arith.constant 0 : i32
    %c0_i32_0 = arith.constant 0 : i32
    %c0_i32_1 = arith.constant 0 : i32
    %c0_i32_2 = arith.constant 0 : i32
    return %c0_i32, %c0_i32_0, %c0_i32_1 : i32, i32, i32
  }
  func.func @transform_17(%arg0: i32) -> (i32, i32, i32) {
    %c0_i32 = arith.constant 0 : i32
    %c0_i32_0 = arith.constant 0 : i32
    %c0_i32_1 = arith.constant 0 : i32
    %c0_i32_2 = arith.constant 0 : i32
    return %c0_i32, %c0_i32_0, %c0_i32_1 : i32, i32, i32
  }
  func.func @transform_18(%arg0: i32) -> (i32, i32, i32) {
    %c0_i32 = arith.constant 0 : i32
    %c0_i32_0 = arith.constant 0 : i32
    %c0_i32_1 = arith.constant 0 : i32
    return %arg0, %c0_i32, %c0_i32_0 : i32, i32, i32
  }
}

</mosaic_0001>

<bundles_post_ra>
// kernel: tpu_custom_call.1
= control target key start
LH: loop header
LB: loop body
LE: loop exit
PB: predicated region body
PF: predicated region fallthrough
CT: control target
= control target key end

     0   :  { %s10628_s0 = inlined_call_operand.vmem [shape: f32[2,8,32], index: 0, kind: input, shape index: {}]   ;;  %s10629_s1 = inlined_call_operand.vmem [shape: f32[2,8,32], index: 1, kind: input, shape index: {}]   ;;  %s10630_s2 = inlined_call_operand.vmem [shape: f32[4,1,32], index: 2, kind: input, shape index: {}]   ;;  %s10631_s3 = inlined_call_operand.vmem [shape: f32[4,1,32], index: 3, kind: input, shape index: {}]   ;;  %s10632_s4 = inlined_call_operand.vmem [shape: f32[4,1,32], index: 4, kind: input, shape index: {}]   ;;  %s10633_s5 = inlined_call_operand.vmem [shape: f32[4,1,32], index: 5, kind: input, shape index: {}]   ;;  %s10634_s6 = inlined_call_operand.vmem [shape: bf16[4,4,32,8], index: 6, kind: input, shape index: {}]   ;;  %s10635_s7 = inlined_call_operand.vmem [shape: f32[4,4,1,8], index: 7, kind: input, shape index: {}]   ;;  %s10636_s8 = inlined_call_operand.vmem [shape: bf16[4,4,32,8], index: 8, kind: input, shape index: {}]   ;;  %s10637_s9 = inlined_call_operand.vmem [shape: f32[4,4,1,8], index: 9, kind: input, shape index: {}]   ;;  %s10638_s10 = inlined_call_operand.vmem [shape: bf16[4,4,32,8], index: 10, kind: input, shape index: {}]   ;;  %s10639_s11 = inlined_call_operand.vmem [shape: f32[4,4,1,8], index: 11, kind: input, shape index: {}]   ;;  %s10640_s12 = inlined_call_operand.vmem [shape: bf16[4,4,8,32], index: 12, kind: input, shape index: {}]   ;;  %s10641_s13 = inlined_call_operand.vmem [shape: f32[4,1,32], index: 13, kind: input, shape index: {}]   ;;  %s10642_s14 = inlined_call_operand.vmem [shape: bf16[4,32,64], index: 14, kind: input, shape index: {}]   ;;  %s10643_s15 = inlined_call_operand.vmem [shape: f32[4,1,64], index: 15, kind: input, shape index: {}]   ;;  %s10644_s16 = inlined_call_operand.vmem [shape: bf16[4,64,32], index: 16, kind: input, shape index: {}]   ;;  %s10645_s17 = inlined_call_operand.vmem [shape: f32[4,1,32], index: 17, kind: input, shape index: {}]   ;;  %s10646_s18 = inlined_call_operand.hbm [shape: f32[2,8,32], index: 18, kind: output, shape index: {}]  }
   0x1   :  { %10653 = sst [smem:[#allocation10_spill]] %s10628_s0 }
   0x2   :  { %10654 = sst [smem:[#allocation11_spill]] %s10629_s1 }
   0x3   :  { %10655 = sst [smem:[#allocation12_spill]] %s10630_s2 }
   0x4   :  { %10656 = sst [smem:[#allocation13_spill]] %s10631_s3 }
   0x5   :  { %23 = vsyncpa [#allocation3], 0 }
   0x6   :  { %25 = vsyncpa [#allocation3 + $0x1], 0  ;;  %s9177_s27 = smov 0   ;;  %s9179_s28 = smov 0  }
   0x7   :  { %s9181_s29 = smov 0   ;;  %s9183_s30 = smov 0  }
   0x8 LB: > { %10657 = sst [smem:[#allocation5_spill]] %s9064_s27  ;;  %s9198_s0 = sadd.s32 4294967295, %s9076_s30   ;;  %s9076_s30 = sphi %s9183_s30, %s10670_s30   ;;  %s9072_s29 = sphi %s9181_s29, %s10672_s29   ;;  %s9068_s28 = sphi %s9179_s28, %s10674_s28   ;;  %s9064_s27 = sphi %s9177_s27, %s10673_s27  }
   0x9   : > { %10658 = sst [smem:[#allocation6_spill]] %s9072_s29  ;;  %s7184_s19 = sadd.s32 4294967294, %s9076_s30  }
   0xa   : > { %s9202_s1 = sadd.s32 1, %s9076_s30   ;;  %s426_s20 = sadd.s32 1, %s9072_s29 }
   0xb   : > { %10659 = sst [smem:[#allocation7_spill]] %s9202_s1  ;;  %s423_s21 = ssub.s32 %s9076_s30, %s9202_s1 }
   0xc   : > { %p436_p0 = scmp.ne.s32.totalorder %s9072_s29, %s9068_s28  ;;  %p424_p1 = scmp.eq.s32.totalorder %s423_s21, 0 }
   0xd   : > { %p437_p2 = scmp.eq.s32.totalorder %s9198_s0, 1  ;;  %p442_p3 = scmp.ne.s32.totalorder %s9068_s28, %s9064_s27 }
   0xe   : > { %p443_p4 = scmp.eq.s32.totalorder %s7184_s19, 1  ;;  %p7187_p7 = scmp.ge.s32.totalorder %s9076_s30, 1 }
   0xf   : > { %s9213_s22 = scalar_select %p424_p1, %s9072_s29, %s426_s20  }
  0x10   : > { %p9215_p5 = por %p437_p2, %p436_p0  ;;  %p9219_p6 = por %p443_p4, %p442_p3 }
  0x11   : > { %10660 = sst [smem:[#allocation8_spill]] %s9213_s22  ;;  %p523_p8 = scmp.lt.s32.totalorder %s9076_s30, 3 }
  0x12   : > { %s10662_s23 = scalar_select %p9219_p6, 1, 0 }
  0x13   : > { %p524_p9 = pnand %p7187_p7, %p523_p8 }
  0x14   : > { %10663 = sst [smem:[#allocation9_spill]] %s10662_s23  ;;  %p580_p10 = scmp.lt.s32.totalorder (!%p524_p9), %s9198_s0, 1  ;;  %vm680_vm0 = vcmask (!%p524_p9), 261120   ;;  %v8810_v14 = vld [vmem:[%s10634_s6] sm:$0xff] (!%p524_p9)   ;;  %v9078_v16 = vmov (!%p524_p9), 0.0   ;;  %v8812_v17 = vld [vmem:[%s10634_s6 + $0x8] sm:$0xff] (!%p524_p9)  }
  0x15   : > { %527 = sbr.rel (%p524_p9) target bundleno = 9179 (0x23db), region = 92  ;;  %s10664_s20 = sld [smem:[#allocation11_spill]] (!%p524_p9)  ;;  %v8811_v15 = vld [vmem:[%s10634_s6 + $0x20] sm:$0xff] (!%p524_p9)   ;;  %8016 = vmatprep.subr.bf16.mxu1 (!%p524_p9), %v9078_v16  ;;  %8032 = vmatprep.subr.bf16.mxu0 (!%p524_p9), %v9078_v16  ;;  %v8813_v18 = vld [vmem:[%s10634_s6 + $0x28] sm:$0xff] (!%p524_p9)   ;;  %vm9079_vm1 = vmmov (!%p524_p9), 0   ;;  %v8814_v33 = vld [vmem:[%s10634_s6 + $0x10] sm:$0xff] (!%p524_p9)  }
  0x16   : > { %s10665_s1 = sld [smem:[#allocation10_spill]] (!%p524_p9)  ;;  %8017 = vmatpush3.bf16.msra.mxu1 (!%p524_p9), %v8810_v14  ;;  %8033 = vmatpush3.bf16.msra.mxu0 (!%p524_p9), %v8811_v15  ;;  %s10666_s22 = sld [smem:[#allocation12_spill]] (!%p524_p9)  ;;  %v8815_v34 = vld [vmem:[%s10636_s8] sm:$0xff] (!%p524_p9)   ;;  %v8816_v37 = vld [vmem:[%s10634_s6 + $0x18] sm:$0xff] (!%p524_p9)   ;;  %v8817_v38 = vld [vmem:[%s10636_s8 + $0x8] sm:$0xff] (!%p524_p9)   ;;  %vm1437_vm2 = vcmask (!%p524_p9), 64512  }
  0x17   : > { %8018 = vmatprep.subr.bf16.mxu1 (!%p524_p9), %v9078_v16  ;;  %8034 = vmatprep.subr.bf16.mxu0 (!%p524_p9), %v9078_v16  ;;  %s10667_s3 = sld [smem:[#allocation13_spill]] (!%p524_p9)  ;;  %v8818_v40 = vld [vmem:[%s10634_s6 + $0x30] sm:$0xff] (!%p524_p9)   ;;  %v8819_v41 = vld [vmem:[%s10636_s8 + $0x20] sm:$0xff] (!%p524_p9)   ;;  %v8820_v43 = vld [vmem:[%s10634_s6 + $0x38] sm:$0xff] (!%p524_p9)   ;;  %vm1677_vm3 = vcmask (!%p524_p9), 1043456   ;;  %vm2177_vm5 = vcmask (!%p524_p9), 523264  }
  0x18   : > { %8020 = vmatprep.mubr.msk.bf16.mxu1 (!%p524_p9), %vm9079_vm1, %v9078_v16  ;;  %8036 = vmatprep.mubr.msk.bf16.mxu0 (!%p524_p9), %vm9079_vm1, %v9078_v16  ;;  %v8821_v44 = vld [vmem:[%s10636_s8 + $0x28] sm:$0xff] (!%p524_p9)   ;;  %v8822_v45 = vld [vmem:[%s10636_s8 + $0x10] sm:$0xff] (!%p524_p9)   ;;  %v8823_v46 = vld [vmem:[%s10638_s10] sm:$0xff] (!%p524_p9)   ;;  %s7741_s19 = sshll.u32 (!%p524_p9), %s9198_s0, 7  ;;  %s9081_s27 = smov (!%p524_p9), [#allocation2]  }
  0x19   : > { %v8824_v47 = vld [vmem:[%s10636_s8 + $0x18] sm:$0xff] (!%p524_p9)   ;;  %v8825_v48 = vld [vmem:[%s10638_s10 + $0x8] sm:$0xff] (!%p524_p9)   ;;  %v8826_v49 = vld [vmem:[%s10636_s8 + $0x30] sm:$0xff] (!%p524_p9)   ;;  %s9018_s26 = sshll.u32 (!%p524_p9), %s9081_s27, 4  ;;  %s9019_s26 = int_to_ptr.vmem [resolvable:$false] %s9018_s26 }
  0x1a   : > { %8019 = vmatpush3.bf16.msra.mxu1 (!%p524_p9), %v8812_v17  ;;  %8035 = vmatpush3.bf16.msra.mxu0 (!%p524_p9), %v8813_v18  ;;  %v8827_v50 = vld [vmem:[%s10638_s10 + $0x20] sm:$0xff] (!%p524_p9)   ;;  %v8828_v51 = vld [vmem:[%s10636_s8 + $0x38] sm:$0xff] (!%p524_p9)   ;;  %v8829_v52 = vld [vmem:[%s10638_s10 + $0x28] sm:$0xff] (!%p524_p9)  }
  0x1b   : > { %8024 = vmatprep.subr.bf16.mxu1 (!%p524_p9), %v9078_v16  ;;  %8048 = vmatprep.subr.bf16.mxu0 (!%p524_p9), %v9078_v16  ;;  %v8830_v53 = vld [vmem:[%s10638_s10 + $0x10] sm:$0xff] (!%p524_p9)   ;;  %v8831_v54 = vld [vmem:[%s10638_s10 + $0x18] sm:$0xff] (!%p524_p9)   ;;  %v7211_v14 = vld [vmem:[%s10637_s9 + $0x2] ss:$0 sm:$0xff] (!%p524_p9) }
  0x1c   : > { %s581_s24 = scalar_select %p580_p10, %s9198_s0, 1  ;;  %v7191_v26 = vld [vmem:[%s10666_s22] ss:$0 sm:$0xff]  ;;  %v8832_v55 = vld [vmem:[%s10638_s10 + $0x30] sm:$0xff]   ;;  %v8833_v56 = vld [vmem:[%s10638_s10 + $0x38] sm:$0xff]  }
  0x1d   : > { %v7192_v28 = vld [vmem:[%s10667_s3] ss:$0 sm:$0xff] }
  0x1e   : > { %s7189_s25 = sshll.u32 %s581_s24, 3  ;;  %s577_s24 = sand.u32 1, %s9068_s28  }
  0x1f   : > { %s9230_s21 = scalar_lea.vmem %s10664_s20, %s7189_s25  ;;  %s9235_s23 = scalar_lea.vmem %s10665_s1, %s7189_s25 }
  0x20   : > { %v596_v0 = vld [vmem:[%s9230_s21] sm:$0xff]  ;;  %s7188_s25 = sshll.u32 %s577_s24, 3  ;;  %s10585_s1 = scalar_lea.hbm %s10646_s18, %s7741_s19 }
  0x21   : > { %v595_v1 = vld [vmem:[%s9235_s23] sm:$0xff]  ;;  %v681_v2 = vsel %vm680_vm0, %v596_v0, 0.0  ;;  %s579_s20 = scalar_lea.vmem [#allocation2], %s7188_s25  ;;  %s7100_s0 = scalar_lea.sflag [#allocation3], %s577_s24 }
  0x22   : > { %v710_v3 = vsel %vm680_vm0, %v595_v1, 0.0  ;;  %682 = vadd.xlane.f32.xlu0 %v681_v2 }
  0x26   : > { %711 = vadd.xlane.f32.xlu0 %v710_v3 }
  0xaf   : > { %v683_v4 = vpop.xlane.xlu0 %682 }
  0xb0   : > { %v685_v5 = vmul.f32 0.03125, %v683_v4 }
  0xb2   : > { %v686_v6 = vsub.f32 %v596_v0, %v685_v5 }
  0xb3   : > { %v712_v7 = vpop.xlane.xlu0 %711 }
  0xb4   : > { %v713_v8 = vmul.f32 0.03125, %v712_v7  ;;  %v687_v9 = vmul.f32 %v686_v6, %v686_v6 }
  0xb6   : > { %v714_v10 = vsub.f32 %v595_v1, %v713_v8  ;;  %v688_v11 = vsel %vm680_vm0, %v687_v9, 0.0  ;;  %v7209_v1 = vld [vmem:[%s10637_s9] ss:$0 sm:$0xff] }
  0xb7   : > { %689 = vadd.xlane.f32.xlu1 %v688_v11 }
  0xb8   : > { %v715_v12 = vmul.f32 %v714_v10, %v714_v10 }
  0xba   : > { %v716_v13 = vsel %vm680_vm0, %v715_v12, 0.0  ;;  %v7193_v12 = vld [vmem:[%s10635_s7] ss:$0 sm:$0xff] }
  0xbb   : > { %717 = vadd.xlane.f32.xlu1 %v716_v13 }
 0x144   : > { %v690_v19 = vpop.xlane.xlu1 %689 }
 0x145   : > { %v691_v20 = vmul.f32 0.03125, %v690_v19 }
 0x147   : > { %v692_v21 = vadd.f32 1e-05, %v691_v20 }
 0x148   : > { %v718_v22 = vpop.xlane.xlu1 %717 }
 0x149   : > { %8930 = vrsqrt.f32 %v692_v21  ;;  %v719_v23 = vmul.f32 0.03125, %v718_v22 }
 0x14b   : > { %v720_v24 = vadd.f32 1e-05, %v719_v23 }
 0x14d   : > { %8932 = vrsqrt.f32 %v720_v24 }
 0x153   : > { %v8931_v25 = vpop.eup %8930 }
 0x154   : > { %v694_v27 = vmul.f32 %v8931_v25, %v686_v6 }
 0x156   : > { %v701_v29 = vmul.f32 %v7191_v26, %v694_v27 }
 0x157   : > { %v8933_v30 = vpop.eup %8932 }
 0x158   : > { %v722_v31 = vmul.f32 %v8933_v30, %v714_v10  ;;  %v708_v32 = vadd.f32 %v7192_v28, %v701_v29  ;;  %v7210_v30 = vld [vmem:[%s10637_s9 + $0x1] ss:$0 sm:$0xff] }
 0x15a   : > { %v709_v35 = vpack.c.bf16 %v708_v32, %v708_v32  ;;  %v723_v36 = vmul.f32 %v7191_v26, %v722_v31  ;;  %v7225_v31 = vld [vmem:[%s10639_s11] ss:$0 sm:$0xff] }
 0x15c   : > { %8021 = vmatmul.mubr.msk.bf16.vlgmr.msra.gmra.mrb[0].mxu1 %vm680_vm0, %v709_v35  ;;  %8037 = vmatmul.mubr.msk.bf16.vlgmr.msra.gmra.mrb[0].mxu0 %vm680_vm0, %v709_v35  ;;  %v724_v39 = vadd.f32 %v7192_v28, %v723_v36  ;;  %v7195_v28 = vld [vmem:[%s10635_s7 + $0x2] ss:$0 sm:$0xff] }
 0x15d   : > { %8025 = vmatpush3.bf16.msra.mxu1 %v8814_v33  ;;  %8049 = vmatpush3.bf16.msra.mxu0 %v8815_v34 }
 0x15e   : > { %8026 = vmatprep.subr.bf16.mxu1 %v9078_v16  ;;  %8050 = vmatprep.subr.bf16.mxu0 %v9078_v16  ;;  %v9297_v42 = vpack.c.bf16 %v724_v39, %v724_v39 }
 0x15f   : > { %8028 = vmatprep.mubr.msk.bf16.mxu1 %vm9079_vm1, %v9078_v16  ;;  %8052 = vmatprep.mubr.msk.bf16.mxu0 %vm9079_vm1, %v9078_v16 }
 0x161   : > { %8027 = vmatpush3.bf16.msra.mxu1 %v8816_v37  ;;  %8051 = vmatpush3.bf16.msra.mxu0 %v8817_v38 }
 0x162   : > { %8040 = vmatprep.subr.bf16.mxu1 %v9078_v16  ;;  %8064 = vmatprep.subr.bf16.mxu0 %v9078_v16 }
 0x164   : > { %8029 = vmatmul.mubr.msk.bf16.vlgmr.msra.gmra.mrb[4].mxu1 %vm680_vm0, %v709_v35  ;;  %8053 = vmatmul.mubr.msk.bf16.vlgmr.msra.gmra.mrb[4].mxu0 %vm680_vm0, %v9297_v42 }
 0x165   : > { %8041 = vmatpush3.bf16.msra.mxu1 %v8818_v40  ;;  %8065 = vmatpush3.bf16.msra.mxu0 %v8819_v41 }
 0x166   : > { %8042 = vmatprep.subr.bf16.mxu1 %v9078_v16  ;;  %8066 = vmatprep.subr.bf16.mxu0 %v9078_v16 }
 0x167   : > { %8044 = vmatprep.mubr.msk.bf16.mxu1 %vm9079_vm1, %v9078_v16  ;;  %8068 = vmatprep.mubr.msk.bf16.mxu0 %vm9079_vm1, %v9078_v16 }
 0x169   : > { %8043 = vmatpush3.bf16.msra.mxu1 %v8820_v43  ;;  %8067 = vmatpush3.bf16.msra.mxu0 %v8821_v44 }
 0x16a   : > { %8056 = vmatprep.subr.bf16.mxu1 %v9078_v16  ;;  %8080 = vmatprep.subr.bf16.mxu0 %v9078_v16 }
 0x16c   : > { %8045 = vmatmul.mubr.msk.bf16.vlgmr.msra.gmra.mrb[8].mxu1 %vm680_vm0, %v709_v35  ;;  %8069 = vmatmul.mubr.msk.bf16.vlgmr.msra.gmra.mrb[8].mxu0 %vm680_vm0, %v9297_v42 }
 0x16d   : > { %8057 = vmatpush3.bf16.msra.mxu1 %v8822_v45  ;;  %8081 = vmatpush3.bf16.msra.mxu0 %v8823_v46  ;;  %v7194_v46 = vld [vmem:[%s10635_s7 + $0x1] ss:$0 sm:$0xff] }
 0x16e   : > { %8058 = vmatprep.subr.bf16.mxu1 %v9078_v16  ;;  %8082 = vmatprep.subr.bf16.mxu0 %v9078_v16 }
 0x16f   : > { %8060 = vmatprep.mubr.msk.bf16.mxu1 %vm9079_vm1, %v9078_v16  ;;  %8084 = vmatprep.mubr.msk.bf16.mxu0 %vm9079_vm1, %v9078_v16 }
 0x171   : > { %8059 = vmatpush3.bf16.msra.mxu1 %v8824_v47  ;;  %8083 = vmatpush3.bf16.msra.mxu0 %v8825_v48 }
 0x172   : > { %8072 = vmatprep.subr.bf16.mxu1 %v9078_v16  ;;  %8096 = vmatprep.subr.bf16.mxu0 %v9078_v16 }
 0x174   : > { %8061 = vmatmul.mubr.msk.bf16.vlgmr.msra.gmra.mrb[12].mxu1 %vm680_vm0, %v9297_v42  ;;  %8085 = vmatmul.mubr.msk.bf16.vlgmr.msra.gmra.mrb[12].mxu0 %vm680_vm0, %v9297_v42 }
 0x175   : > { %8073 = vmatpush3.bf16.msra.mxu1 %v8826_v49  ;;  %8097 = vmatpush3.bf16.msra.mxu0 %v8827_v50  ;;  %v7212_v49 = vld [vmem:[%s10637_s9 + $0x3] ss:$0 sm:$0xff] }
 0x176   : > { %8074 = vmatprep.subr.bf16.mxu1 %v9078_v16  ;;  %8098 = vmatprep.subr.bf16.mxu0 %v9078_v16 }
 0x177   : > { %8076 = vmatprep.mubr.msk.bf16.mxu1 %vm9079_vm1, %v9078_v16  ;;  %8100 = vmatprep.mubr.msk.bf16.mxu0 %vm9079_vm1, %v9078_v16 }
 0x179   : > { %8075 = vmatpush3.bf16.msra.mxu1 %v8828_v51  ;;  %8099 = vmatpush3.bf16.msra.mxu0 %v8829_v52 }
 0x17a   : > { %8088 = vmatprep.subr.bf16.mxu1 %v9078_v16  ;;  %8112 = vmatprep.subr.bf16.mxu0 %v9078_v16 }
 0x17c   : > { %8077 = vmatmul.mubr.msk.bf16.vlgmr.msra.gmra.mrb[16].mxu1 %vm680_vm0, %v9297_v42  ;;  %8101 = vmatmul.mubr.msk.bf16.vlgmr.msra.gmra.mrb[16].mxu0 %vm680_vm0, %v9297_v42 }
 0x17d   : > { %8089 = vmatpush3.bf16.msra.mxu1 %v8830_v53  ;;  %8092 = vmatprep.mubr.msk.bf16.mxu1 %vm9079_vm1, %v9078_v16 }
 0x17e   : > { %8090 = vmatprep.subr.bf16.mxu1 %v9078_v16  ;;  %8114 = vmatprep.mubr.msk.bf16.mxu0 %vm9079_vm1, %v9078_v16 }
 0x181   : > { %8091 = vmatpush3.bf16.msra.mxu1 %v8831_v54 }
 0x182   : > { %8104 = vmatprep.subr.bf16.mxu1 %v9078_v16 }
 0x184   : > { %8093 = vmatmul.mubr.msk.bf16.vlgmr.msra.gmra.mrb[20].mxu1 %vm680_vm0, %v9297_v42 }
 0x185   : > { %8105 = vmatpush3.bf16.msra.mxu1 %v8832_v55  ;;  %8108 = vmatprep.mubr.msk.bf16.mxu1 %vm9079_vm1, %v9078_v16 }
 0x186   : > { %8106 = vmatprep.subr.bf16.mxu1 %v9078_v16 }
 0x189   : > { %8107 = vmatpush3.bf16.msra.mxu1 %v8833_v56 }
 0x18a   : > { %8118 = vmatprep.subr.bf16.mxu1 %v9078_v16 }
 0x18c   : > { %8109 = vmatmul.mubr.msk.bf16.vlgmr.msra.gmra.mrb[24].mxu1 %vm680_vm0, %v9297_v42 }
 0x18d   : > { %8120 = vmatprep.mubr.msk.bf16.mxu1 %vm9079_vm1, %v9078_v16 }
 0x22f   : > { %v800_v57 = vpop.f32.mrb[0].mxu1  ;;  %v904_v58 = vpop.f32.mrb[0].mxu0 }
 0x230   : > { %v8022_v59 = vpop.f32.mrb[1].mxu1  ;;  %v8038_v60 = vpop.f32.mrb[1].mxu0  ;;  %v801_v15 = vadd.f32 %v7193_v12, %v800_v57  ;;  %v905_v32 = vadd.f32 %v7195_v28, %v904_v58 }
 0x231   : > { %v803_v61 = vpop.f32.mrb[2].mxu1  ;;  %v907_v62 = vpop.f32.mrb[2].mxu0 }
 0x232   : > { %v8023_v63 = vpop.f32.mrb[3].mxu1  ;;  %v8039_v0 = vpop.f32.mrb[3].mxu0  ;;  %v1429_v24 = vpack.c.bf16 %v801_v15, %v801_v15  ;;  %v1431_v41 = vpack.c.bf16 %v905_v32, %v905_v32  ;;  %v7196_v62 = vld [vmem:[%s10635_s7 + $0x3] ss:$0 sm:$0xff] }
 0x233   : > { %v7226_v0 = vld [vmem:[%s10639_s11 + $0x1] ss:$0 sm:$0xff] }
 0x237   : > { %v852_v2 = vpop.f32.mrb[4].mxu1  ;;  %v1035_v3 = vpop.f32.mrb[4].mxu0 }
 0x238   : > { %v1036_v4 = vadd.f32 %v7209_v1, %v1035_v3  ;;  %v8030_v5 = vpop.f32.mrb[5].mxu1  ;;  %v8054_v6 = vpop.f32.mrb[5].mxu0  ;;  %v853_v50 = vadd.f32 %v7194_v46, %v852_v2 }
 0x239   : > { %v855_v7 = vpop.f32.mrb[6].mxu1  ;;  %v1038_v8 = vpop.f32.mrb[6].mxu0 }
 0x23a   : > { %v1433_v9 = vpack.c.bf16 %v1036_v4, %v1036_v4  ;;  %v8031_v10 = vpop.f32.mrb[7].mxu1  ;;  %v8055_v11 = vpop.f32.mrb[7].mxu0  ;;  %v1430_v58 = vpack.c.bf16 %v853_v50, %v853_v50 }
 0x23c   : > { %v1442_v13 = vsel %vm1437_vm2, %v1433_v9, 0 }
 0x23d   : > { %8113 = vmatpush3.bf16.xpose.msra.mxu0 %v1442_v13 }
 0x23e   : > { %8124 = vmatprep.subr.bf16.mxu0 %v9078_v16 }
 0x23f   : > { %v956_v17 = vpop.f32.mrb[8].mxu1  ;;  %v1139_v18 = vpop.f32.mrb[8].mxu0 }
 0x240   : > { %v1140_v19 = vadd.f32 %v7211_v14, %v1139_v18  ;;  %v8046_v20 = vpop.f32.mrb[9].mxu1  ;;  %v8070_v21 = vpop.f32.mrb[9].mxu0  ;;  %v957_v1 = vadd.f32 %v7196_v62, %v956_v17  ;;  %v589_v14 = vlaneseq  ;;  %v9080_v18 = vmov -1e+30  }
 0x241   : > { %v959_v22 = vpop.f32.mrb[10].mxu1  ;;  %v1142_v23 = vpop.f32.mrb[10].mxu0 }
 0x242   : > { %v1435_v25 = vpack.c.bf16 %v1140_v19, %v1140_v19  ;;  %v8047_v26 = vpop.f32.mrb[11].mxu1  ;;  %v8071_v27 = vpop.f32.mrb[11].mxu0  ;;  %v1432_v6 = vpack.c.bf16 %v957_v1, %v957_v1  ;;  %v590_v15 = vshrl.u32 %v589_v14, 7  ;;  %v592_v17 = vand.u32 127, %v589_v14 }
 0x244   : > { %v1534_v29 = vsel %vm1437_vm2, %v1435_v25, 0  ;;  %8115 = vmatmul.mubr.msk.bf16.vlgmr.msra.gmra.mrb[20].mxu0 %vm1437_vm2, %v1429_v24  ;;  %vm593_vm4 = vcmp.le.s32.totalorder %v592_v17, %v590_v15 }
 0x245   : > { %8125 = vmatpush3.bf16.xpose.msra.mxu0 %v1534_v29  ;;  %8126 = vmatprep.mubr.msk.bf16.mxu0 %vm9079_vm1, %v9078_v16  ;;  %v9455_v19 = vsel %vm593_vm4, 0.0, %v9080_v18 }
 0x246   : > { %8136 = vmatprep.subr.bf16.mxu0 %v9078_v16 }
 0x247   : > { %v1087_v33 = vpop.f32.mrb[12].mxu1  ;;  %v1267_v34 = vpop.f32.mrb[12].mxu0 }
 0x248   : > { %v1088_v35 = vadd.f32 %v7210_v30, %v1087_v33  ;;  %v1268_v36 = vadd.f32 %v7225_v31, %v1267_v34  ;;  %v8062_v37 = vpop.f32.mrb[13].mxu1  ;;  %v8086_v38 = vpop.f32.mrb[13].mxu0 }
 0x249   : > { %v1090_v39 = vpop.f32.mrb[14].mxu1  ;;  %v1270_v40 = vpop.f32.mrb[14].mxu0 }
 0x24a   : > { %v1434_v42 = vpack.c.bf16 %v1088_v35, %v1088_v35  ;;  %v1670_v43 = vpack.c.bf16 %v1268_v36, %v1268_v36  ;;  %v8063_v44 = vpop.f32.mrb[15].mxu1  ;;  %v8087_v45 = vpop.f32.mrb[15].mxu0 }
 0x24c   : > { %v1488_v47 = vsel %vm1437_vm2, %v1434_v42, 0  ;;  %v1679_v48 = vsel %vm1677_vm3, %v1670_v43, 0  ;;  %8127 = vmatmul.mubr.msk.bf16.vlgmr.msra.gmra.mrb[24].mxu0 %vm1437_vm2, %v1431_v41 }
 0x24d   : > { %8119 = vmatpush3.bf16.xpose.msra.mxu1 %v1488_v47  ;;  %8137 = vmatpush3.bf16.msra.mxu0 %v1679_v48 }
 0x24e   : > { %8130 = vmatprep.subr.bf16.mxu1 %v9078_v16  ;;  %8138 = vmatprep.mubr.msk.bf16.mxu0 %vm9079_vm1, %v9078_v16 }
 0x24f   : > { %v1191_v51 = vpop.f32.mrb[16].mxu1  ;;  %v9434_v52 = vpop.f32.mrb[16].mxu0  ;;  %8148 = vmatprep.subr.bf16.mxu0 %v9078_v16 }
 0x250   : > { %v1192_v53 = vadd.f32 %v7212_v49, %v1191_v51  ;;  %v8078_v54 = vpop.f32.mrb[17].mxu1  ;;  %v8102_v55 = vpop.f32.mrb[17].mxu0 }
 0x251   : > { %v1194_v56 = vpop.f32.mrb[18].mxu1  ;;  %v1374_v57 = vpop.f32.mrb[18].mxu0 }
 0x252   : > { %v1436_v59 = vpack.c.bf16 %v1192_v53, %v1192_v53  ;;  %v8079_v60 = vpop.f32.mrb[19].mxu1  ;;  %v8103_v61 = vpop.f32.mrb[19].mxu0 }
 0x254   : > { %v1580_v63 = vsel %vm1437_vm2, %v1436_v59, 0  ;;  %8121 = vmatmul.mubr.msk.bf16.vlgmr.msra.gmra.mrb[28].mxu1 %vm1437_vm2, %v1430_v58 }
 0x255   : > { %8131 = vmatpush3.bf16.xpose.msra.mxu1 %v1580_v63  ;;  %8132 = vmatprep.mubr.msk.bf16.mxu1 %vm9079_vm1, %v9078_v16 }
 0x256   : > { %8142 = vmatprep.subr.bf16.mxu1 %v9078_v16 }
 0x257   : > { %v1319_v2 = vpop.f32.mrb[20].mxu1 }
 0x258   : > { %v1320_v3 = vadd.f32 %v7226_v0, %v1319_v2  ;;  %v8094_v4 = vpop.f32.mrb[21].mxu1  ;;  %v7227_v2 = vld [vmem:[%s10639_s11 + $0x2] ss:$0 sm:$0xff] }
 0x259   : > { %v1322_v5 = vpop.f32.mrb[22].mxu1 }
 0x25a   : > { %v1671_v7 = vpack.c.bf16 %v1320_v3, %v1320_v3  ;;  %v8095_v8 = vpop.f32.mrb[23].mxu1  ;;  %v1372_v3 = vadd.f32 %v7227_v2, %v9434_v52 }
 0x25c   : > { %v1725_v9 = vsel %vm1677_vm3, %v1671_v7, 0  ;;  %8133 = vmatmul.mubr.msk.bf16.vlgmr.msra.gmra.mrb[32].mxu1 %vm1437_vm2, %v1432_v6  ;;  %v1672_v6 = vpack.c.bf16 %v1372_v3, %v1372_v3 }
 0x25d   : > { %8143 = vmatpush3.bf16.msra.mxu1 %v1725_v9  ;;  %8144 = vmatprep.mubr.msk.bf16.mxu1 %vm9079_vm1, %v9078_v16 }
 0x25e   : > { %8154 = vmatprep.subr.bf16.mxu1 %v9078_v16  ;;  %v1771_v9 = vsel %vm1677_vm3, %v1672_v6, 0 }
 0x25f   : > { %v9453_v10 = vpop.f32.mrb[24].mxu1 }
 0x260   : > { %v8110_v11 = vpop.f32.mrb[25].mxu1 }
 0x261   : > { %v1426_v12 = vpop.f32.mrb[26].mxu1 }
 0x262   : > { %v8111_v13 = vpop.f32.mrb[27].mxu1 }
 0x263   : > { %v7228_v13 = vld [vmem:[%s10639_s11 + $0x3] ss:$0 sm:$0xff] }
 0x264   : > { %v1424_v15 = vadd.f32 %v7228_v13, %v9453_v10  ;;  %v9013_v13 = vld [vmem:[%s9235_s23] sm:$0xff]  ;;  %s7113_s23 = sshll.u32 %s579_s20, 4  ;;  %s10587_s23 = int_to_ptr.vmem [resolvable:$true] %s7113_s23 }
 0x265   : > { %s9014_s25 = scalar_lea.vmem %s10587_s23, 128  ;;  %p9021_p0 = scmp.lt.s32.totalorder %s10587_s23, %s9019_s26 }
 0x266   : > { %p9015_p11 = scmp.ne.s32.totalorder %s10587_s23, %s9014_s25 }
 0x268   : > { %p9016_p12 = pnand %p9015_p11, %p9215_p5 }
 0x26a   : > { %p9017_p13 = pneg %p9016_p12 }
 0x317   : > { %v1478_v20 = vpop.f32.mrb[20].mxu0 }
 0x318   : > { %v1479_v21 = vadd.f32 %v1478_v20, %v9455_v19  ;;  %v8116_v22 = vpop.f32.mrb[21].mxu0  ;;  %v1673_v20 = vpack.c.bf16 %v1424_v15, %v1424_v15 }
 0x319   : > { %v1481_v23 = vpop.f32.mrb[22].mxu0 }
 0x31a   : > { %v8117_v24 = vpop.f32.mrb[23].mxu0  ;;  %v1622_v25 = vsel %vm1437_vm2, %v1479_v21, -inf  ;;  %v1817_v23 = vsel %vm1677_vm3, %v1673_v20, 0 }
 0x31b   : > { %1623 = vmax.xlane.f32.xlu0 %v1622_v25 }
 0x31f   : > { %v1570_v26 = vpop.f32.mrb[24].mxu0 }
 0x320   : > { %v1571_v27 = vadd.f32 %v1570_v26, %v9455_v19  ;;  %v8128_v28 = vpop.f32.mrb[25].mxu0  ;;  %v661_v26 = vld [vmem:[%s10640_s12] sm:$0xf] }
 0x321   : > { %v1573_v29 = vpop.f32.mrb[26].mxu0  ;;  %v662_v28 = vld [vmem:[%s10640_s12 + $0x4] sm:$0xf] }
 0x322   : > { %v8129_v30 = vpop.f32.mrb[27].mxu0  ;;  %v1628_v31 = vsel %vm1437_vm2, %v1571_v27, -inf  ;;  %v1913_v29 = vsel %vm1677_vm3, %v662_v28, 0  ;;  %v8835_v28 = vld [vmem:[%s10642_s14 + $0x8] sm:$0xff]  }
 0x323   : > { %1629 = vmax.xlane.f32.xlu0 %v1628_v31  ;;  %v663_v30 = vld [vmem:[%s10640_s12 + $0x8] sm:$0xf] }
 0x327   : > { %v1524_v32 = vpop.f32.mrb[28].mxu1 }
 0x328   : > { %v1525_v33 = vadd.f32 %v1524_v32, %v9455_v19  ;;  %v8122_v34 = vpop.f32.mrb[29].mxu1 }
 0x329   : > { %v1527_v35 = vpop.f32.mrb[30].mxu1  ;;  %v1959_v34 = vsel %vm1677_vm3, %v663_v30, 0  ;;  %v8837_v30 = vld [vmem:[%s10644_s16 + $0x8] sm:$0xff]  }
 0x32a   : > { %v8123_v36 = vpop.f32.mrb[31].mxu1  ;;  %v1625_v37 = vsel %vm1437_vm2, %v1525_v33, -inf }
 0x32b   : > { %1626 = vmax.xlane.f32.xlu1 %v1625_v37 }
 0x32f   : > { %v1616_v38 = vpop.f32.mrb[32].mxu1 }
 0x330   : > { %v1617_v39 = vadd.f32 %v1616_v38, %v9455_v19  ;;  %v8134_v40 = vpop.f32.mrb[33].mxu1 }
 0x331   : > { %v1619_v41 = vpop.f32.mrb[34].mxu1 }
 0x332   : > { %v8135_v42 = vpop.f32.mrb[35].mxu1  ;;  %v1631_v43 = vsel %vm1437_vm2, %v1617_v39, -inf }
 0x333   : > { %1632 = vmax.xlane.f32.xlu1 %v1631_v43  ;;  %v664_v42 = vld [vmem:[%s10640_s12 + $0xc] sm:$0xf] }
 0x3a8   : > { %v1624_v44 = vpop.xlane.xlu0 %1623 }
 0x3a9   : > { %v1634_v45 = vsub.f32 %v1479_v21, %v1624_v44 }
 0x3ab   : > { %v1638_v46 = vmul.f32 1.442695, %v1634_v45 }
 0x3ad   : > { %8934 = vpow2.f32 %v1638_v46  ;;  %v2005_v46 = vsel %vm1677_vm3, %v664_v42, 0  ;;  %v8839_v42 = vld [vmem:[%s10644_s16 + $0x18] sm:$0xff]  }
 0x3b0   : > { %v1630_v47 = vpop.xlane.xlu0 %1629 }
 0x3b1   : > { %v1636_v48 = vsub.f32 %v1571_v27, %v1630_v47  ;;  %v1867_v27 = vsel %vm1677_vm3, %v661_v26, 0 }
 0x3b3   : > { %v1642_v49 = vmul.f32 1.442695, %v1636_v48 }
 0x3b5   : > { %8936 = vpow2.f32 %v1642_v49 }
 0x3b7   : > { %v8935_v50 = vpop.eup %8934 }
 0x3b8   : > { %v1627_v51 = vpop.xlane.xlu1 %1626  ;;  %v1646_v53 = vsel %vm1437_vm2, %v8935_v50, 0.0 }
 0x3b9   : > { %v1635_v54 = vsub.f32 %v1525_v33, %v1627_v51  ;;  %1647 = vadd.xlane.f32.xlu0 %v1646_v53 }
 0x3bb   : > { %v1640_v55 = vmul.f32 1.442695, %v1635_v54 }
 0x3bd   : > { %8938 = vpow2.f32 %v1640_v55 }
 0x3bf   : > { %v8937_v56 = vpop.eup %8936 }
 0x3c0   : > { %v1633_v57 = vpop.xlane.xlu1 %1632  ;;  %v1652_v58 = vsel %vm1437_vm2, %v8937_v56, 0.0 }
 0x3c1   : > { %v1637_v59 = vsub.f32 %v1617_v39, %v1633_v57  ;;  %1653 = vadd.xlane.f32.xlu0 %v1652_v58 }
 0x3c3   : > { %v1644_v60 = vmul.f32 1.442695, %v1637_v59 }
 0x3c5   : > { %8940 = vpow2.f32 %v1644_v60 }
 0x3c7   : > { %v8939_v61 = vpop.eup %8938 }
 0x3c8   : > { %v1649_v62 = vsel %vm1437_vm2, %v8939_v61, 0.0 }
 0x3c9   : > { %1650 = vadd.xlane.f32.xlu1 %v1649_v62 }
 0x3cf   : > { %v8941_v63 = vpop.eup %8940 }
 0x3d0   : > { %v1655_v0 = vsel %vm1437_vm2, %v8941_v63, 0.0 }
 0x3d1   : > { %1656 = vadd.xlane.f32.xlu1 %v1655_v0 }
 0x446   : > { %v1648_v1 = vpop.xlane.xlu0 %1647 }
 0x447   : > { %8942 = vrcp.f32 %v1648_v1 }
 0x44e   : > { %v1654_v4 = vpop.xlane.xlu0 %1653 }
 0x44f   : > { %8944 = vrcp.f32 %v1654_v4 }
 0x451   : > { %v8943_v5 = vpop.eup %8942 }
 0x452   : > { %v1662_v7 = vmul.f32 %v8943_v5, %v8935_v50 }
 0x454   : > { %v1666_v8 = vpack.c.bf16 %v1662_v7, %v1662_v7 }
 0x456   : > { %v1651_v11 = vpop.xlane.xlu1 %1650  ;;  %8139 = vmatmul.mubr.msk.bf16.vlgmr.msra.gmra.mrb[28].mxu0 %vm1437_vm2, %v1666_v8 }
 0x457   : > { %8946 = vrcp.f32 %v1651_v11  ;;  %8149 = vmatpush3.bf16.msra.mxu0 %v1771_v9  ;;  %8150 = vmatprep.mubr.msk.bf16.mxu0 %vm9079_vm1, %v9078_v16  ;;  %v7253_v9 = vld [vmem:[%s10641_s13] ss:$0 sm:$0xff] }
 0x458   : > { %8160 = vmatprep.subr.bf16.mxu0 %v9078_v16 }
 0x459   : > { %v8945_v12 = vpop.eup %8944 }
 0x45a   : > { %v1664_v52 = vmul.f32 %v8945_v12, %v8937_v56 }
 0x45c   : > { %v1668_v14 = vpack.c.bf16 %v1664_v52, %v1664_v52  ;;  %v9012_v52 = vld [vmem:[%s9230_s21] sm:$0xff] }
 0x45e   : > { %v1657_v17 = vpop.xlane.xlu1 %1656  ;;  %8151 = vmatmul.mubr.msk.bf16.vlgmr.msra.gmra.mrb[32].mxu0 %vm1437_vm2, %v1668_v14  ;;  %v726_v14 = vadd.f32 %v9013_v13, %v9012_v52 }
 0x45f   : > { %8948 = vrcp.f32 %v1657_v17  ;;  %8162 = vmatprep.mubr.msk.bf16.mxu0 %vm9079_vm1, %v9078_v16  ;;  %8161 = vmatpush3.bf16.msra.mxu0 %v1867_v27  ;;  %v8834_v27 = vld [vmem:[%s10642_s14] sm:$0xff]  }
 0x460   : > { %8172 = vmatprep.subr.bf16.mxu0 %v9078_v16 }
 0x461   : > { %v8947_v18 = vpop.eup %8946 }
 0x462   : > { %v1663_v21 = vmul.f32 %v8947_v18, %v8939_v61 }
 0x464   : > { %v1667_v22 = vpack.c.bf16 %v1663_v21, %v1663_v21 }
 0x466   : > { %8145 = vmatmul.mubr.msk.bf16.vlgmr.msra.gmra.mrb[36].mxu1 %vm1437_vm2, %v1667_v22 }
 0x467   : > { %8155 = vmatpush3.bf16.msra.mxu1 %v1817_v23  ;;  %8156 = vmatprep.mubr.msk.bf16.mxu1 %vm9079_vm1, %v9078_v16 }
 0x468   : > { %8166 = vmatprep.subr.bf16.mxu1 %v9078_v16 }
 0x469   : > { %v8949_v10 = vpop.eup %8948 }
 0x46a   : > { %v1665_v24 = vmul.f32 %v8949_v10, %v8941_v63 }
 0x46c   : > { %v1669_v25 = vpack.c.bf16 %v1665_v24, %v1665_v24 }
 0x46e   : > { %8157 = vmatmul.mubr.msk.bf16.vlgmr.msra.gmra.mrb[40].mxu1 %vm1437_vm2, %v1669_v25 }
 0x46f   : > { %8168 = vmatprep.mubr.msk.bf16.mxu1 %vm9079_vm1, %v9078_v16  ;;  %8167 = vmatpush3.bf16.msra.mxu1 %v1913_v29  ;;  %v8836_v29 = vld [vmem:[%s10644_s16] sm:$0xff]  }
 0x470   : > { %8178 = vmatprep.subr.bf16.mxu1 %v9078_v16 }
 0x529   : > { %v1715_v31 = vpop.f32.mrb[28].mxu0 }
 0x52a   : > { %v1859_v32 = vpack.c.bf16 %v1715_v31, %v1715_v31  ;;  %v8140_v33 = vpop.f32.mrb[29].mxu0 }
 0x52b   : > { %v1718_v35 = vpop.f32.mrb[30].mxu0 }
 0x52c   : > { %v8141_v36 = vpop.f32.mrb[31].mxu0  ;;  %8163 = vmatmul.mubr.msk.bf16.vlgmr.msra.gmra.mrb[36].mxu0 %vm1437_vm2, %v1859_v32  ;;  %v7254_v35 = vld [vmem:[%s10632_s4] ss:$0 sm:$0xff] }
 0x52d   : > { %8173 = vmatpush3.bf16.msra.mxu0 %v1959_v34  ;;  %8174 = vmatprep.mubr.msk.bf16.mxu0 %vm9079_vm1, %v9078_v16 }
 0x52e   : > { %8184 = vmatprep.subr.bf16.mxu0 %v9078_v16 }
 0x531   : > { %v1807_v37 = vpop.f32.mrb[32].mxu0 }
 0x532   : > { %v1861_v38 = vpack.c.bf16 %v1807_v37, %v1807_v37  ;;  %v8152_v39 = vpop.f32.mrb[33].mxu0  ;;  %v7255_v37 = vld [vmem:[%s10633_s5] ss:$0 sm:$0xff] }
 0x533   : > { %v1810_v40 = vpop.f32.mrb[34].mxu0 }
 0x534   : > { %v8153_v41 = vpop.f32.mrb[35].mxu0  ;;  %8175 = vmatmul.mubr.msk.bf16.vlgmr.msra.gmra.mrb[40].mxu0 %vm1437_vm2, %v1861_v38 }
 0x535   : > { %8188 = vmatprep.mubr.msk.bf16.mxu0 %vm9079_vm1, %v9078_v16  ;;  %8185 = vmatpush3.bf16.msra.mxu0 %v8834_v27  ;;  %v8838_v41 = vld [vmem:[%s10644_s16 + $0x10] sm:$0xff]   ;;  %v8855_v27 = vld [vmem:[%s10638_s10 + $0x48] sm:$0xff]  }
 0x536   : > { %8186 = vmatprep.subr.bf16.mxu0 %v9078_v16 }
 0x539   : > { %v1761_v43 = vpop.f32.mrb[36].mxu1  ;;  %8187 = vmatpush3.bf16.msra.mxu0 %v8835_v28  ;;  %v8856_v28 = vld [vmem:[%s10636_s8 + $0x70] sm:$0xff]  }
 0x53a   : > { %v1860_v44 = vpack.c.bf16 %v1761_v43, %v1761_v43  ;;  %v8146_v45 = vpop.f32.mrb[37].mxu1  ;;  %8204 = vmatprep.subr.bf16.mxu0 %v9078_v16  ;;  %v7256_v43 = vld [vmem:[%s10643_s15] ss:$0 sm:$0xff] }
 0x53b   : > { %v1764_v47 = vpop.f32.mrb[38].mxu1 }
 0x53c   : > { %v8147_v48 = vpop.f32.mrb[39].mxu1  ;;  %8169 = vmatmul.mubr.msk.bf16.vlgmr.msra.gmra.mrb[44].mxu1 %vm1437_vm2, %v1860_v44 }
 0x53d   : > { %8179 = vmatpush3.bf16.msra.mxu1 %v2005_v46  ;;  %8180 = vmatprep.mubr.msk.bf16.mxu1 %vm9079_vm1, %v9078_v16 }
 0x53e   : > { %8192 = vmatprep.subr.bf16.mxu1 %v9078_v16 }
 0x541   : > { %v1853_v49 = vpop.f32.mrb[40].mxu1 }
 0x542   : > { %v1862_v50 = vpack.c.bf16 %v1853_v49, %v1853_v49  ;;  %v8158_v51 = vpop.f32.mrb[41].mxu1 }
 0x543   : > { %v1856_v53 = vpop.f32.mrb[42].mxu1  ;;  %v7265_v51 = vld [vmem:[%s10645_s17] ss:$0 sm:$0xff] }
 0x544   : > { %v8159_v54 = vpop.f32.mrb[43].mxu1  ;;  %8181 = vmatmul.mubr.msk.bf16.vlgmr.msra.gmra.mrb[48].mxu1 %vm1437_vm2, %v1862_v50 }
 0x545   : > { %8200 = vmatprep.mubr.msk.bf16.mxu1 %vm9079_vm1, %v9078_v16  ;;  %8193 = vmatpush3.bf16.msra.mxu1 %v8836_v29  ;;  %v8857_v29 = vld [vmem:[%s10638_s10 + $0x60] sm:$0xff]  }
 0x546   : > { %8194 = vmatprep.subr.bf16.mxu1 %v9078_v16 }
 0x549   : > { %8195 = vmatpush3.bf16.msra.mxu1 %v8837_v30  ;;  %v8858_v30 = vld [vmem:[%s10636_s8 + $0x78] sm:$0xff]  }
 0x54a   : > { %8196 = vmatprep.subr.bf16.mxu1 %v9078_v16 }
 0x54d   : > { %8197 = vmatpush3.bf16.msra.mxu1 %v8838_v41 }
 0x54e   : > { %8198 = vmatprep.subr.bf16.mxu1 %v9078_v16 }
 0x551   : > { %8199 = vmatpush3.bf16.msra.mxu1 %v8839_v42 }
 0x552   : > { %8220 = vmatprep.subr.bf16.mxu1 %v9078_v16 }
 0x5ff   : > { %v1903_v55 = vpop.f32.mrb[36].mxu0 }
 0x600   : > { %v8164_v56 = vpop.f32.mrb[37].mxu0  ;;  %v2047_v0 = vsel %vm680_vm0, %v1903_v55, 0.0 }
 0x601   : > { %v1906_v57 = vpop.f32.mrb[38].mxu0 }
 0x602   : > { %v8165_v58 = vpop.f32.mrb[39].mxu0 }
 0x607   : > { %v1995_v59 = vpop.f32.mrb[40].mxu0 }
 0x608   : > { %v8176_v60 = vpop.f32.mrb[41].mxu0  ;;  %v2050_v5 = vsel %vm680_vm0, %v1995_v59, 0.0 }
 0x609   : > { %v1998_v61 = vpop.f32.mrb[42].mxu0 }
 0x60a   : > { %v8177_v62 = vpop.f32.mrb[43].mxu0 }
 0x60f   : > { %v1949_v63 = vpop.f32.mrb[44].mxu1 }
 0x610   : > { %v2048_v1 = vsel %vm680_vm0, %v1949_v63, 0.0  ;;  %v8170_v2 = vpop.f32.mrb[45].mxu1 }
 0x611   : > { %v2049_v3 = vadd.f32 %v2048_v1, %v2047_v0  ;;  %v1952_v4 = vpop.f32.mrb[46].mxu1  ;;  %v8840_v1 = vld [vmem:[%s10634_s6 + $0x40] sm:$0xff]  }
 0x612   : > { %v8171_v6 = vpop.f32.mrb[47].mxu1  ;;  %v8841_v2 = vld [vmem:[%s10634_s6 + $0x60] sm:$0xff]   ;;  %v8843_v4 = vld [vmem:[%s10634_s6 + $0x68] sm:$0xff]  }
 0x613   : > { %v2051_v7 = vadd.f32 %v2050_v5, %v2049_v3  ;;  %v8842_v3 = vld [vmem:[%s10634_s6 + $0x48] sm:$0xff]  }
 0x617   : > { %v2041_v8 = vpop.f32.mrb[48].mxu1 }
 0x618   : > { %v2052_v11 = vsel %vm680_vm0, %v2041_v8, 0.0  ;;  %v8182_v12 = vpop.f32.mrb[49].mxu1 }
 0x619   : > { %v2053_v15 = vadd.f32 %v2052_v11, %v2051_v7  ;;  %v2044_v17 = vpop.f32.mrb[50].mxu1  ;;  %v7350_v12 = vld [vmem:[%s10667_s3 + $0x1] ss:$0 sm:$0xff] }
 0x61a   : > { %v8183_v18 = vpop.f32.mrb[51].mxu1 }
 0x61b   : > { %v2060_v20 = vadd.f32 %v7253_v9, %v2053_v15  ;;  %v7349_v9 = vld [vmem:[%s10666_s22 + $0x1] ss:$0 sm:$0xff]  ;;  %v8846_v18 = vld [vmem:[%s10634_s6 + $0x58] sm:$0xff]  }
 0x61c   : > { %v8845_v15 = vld [vmem:[%s10636_s8 + $0x40] sm:$0xff]  }
 0x61d   : > { %v2061_v21 = vadd.f32 %v2060_v20, %v726_v14  ;;  %v8844_v14 = vld [vmem:[%s10634_s6 + $0x50] sm:$0xff]   ;;  %v8847_v20 = vld [vmem:[%s10636_s8 + $0x48] sm:$0xff]  }
 0x61f   : > { %v2062_v22 = vsel %vm680_vm0, %v2061_v21, 0.0 }
 0x620   : > { %2063 = vadd.xlane.f32.xlu0 %v2062_v22  ;;  %v8849_v22 = vld [vmem:[%s10636_s8 + $0x60] sm:$0xff]  }
 0x6ad   : > { %v2064_v23 = vpop.xlane.xlu0 %2063 }
 0x6ae   : > { %v2065_v10 = vmul.f32 0.03125, %v2064_v23  ;;  %v8850_v23 = vld [vmem:[%s10634_s6 + $0x78] sm:$0xff]  }
 0x6b0   : > { %v2066_v24 = vsub.f32 %v2061_v21, %v2065_v10  ;;  %v8851_v10 = vld [vmem:[%s10636_s8 + $0x68] sm:$0xff]  }
 0x6b2   : > { %v2067_v25 = vmul.f32 %v2066_v24, %v2066_v24 }
 0x6b4   : > { %v2068_v26 = vsel %vm680_vm0, %v2067_v25, 0.0  ;;  %v8853_v25 = vld [vmem:[%s10638_s10 + $0x40] sm:$0xff]  }
 0x6b5   : > { %2069 = vadd.xlane.f32.xlu1 %v2068_v26  ;;  %v8854_v26 = vld [vmem:[%s10636_s8 + $0x58] sm:$0xff]  }
 0x742   : > { %v2070_v31 = vpop.xlane.xlu1 %2069 }
 0x743   : > { %v2071_v32 = vmul.f32 0.03125, %v2070_v31  ;;  %v8859_v31 = vld [vmem:[%s10638_s10 + $0x68] sm:$0xff]  }
 0x745   : > { %v2072_v33 = vadd.f32 1e-05, %v2071_v32  ;;  %v8860_v32 = vld [vmem:[%s10638_s10 + $0x50] sm:$0xff]  }
 0x747   : > { %8950 = vrsqrt.f32 %v2072_v33  ;;  %v8861_v33 = vld [vmem:[%s10638_s10 + $0x58] sm:$0xff]  }
 0x751   : > { %v8951_v34 = vpop.eup %8950 }
 0x752   : > { %v2074_v36 = vmul.f32 %v8951_v34, %v2066_v24  ;;  %v8852_v24 = vld [vmem:[%s10636_s8 + $0x50] sm:$0xff]  }
 0x753   : > { %v8862_v34 = vld [vmem:[%s10638_s10 + $0x70] sm:$0xff]  }
 0x754   : > { %v2081_v38 = vmul.f32 %v7254_v35, %v2074_v36  ;;  %v8863_v35 = vld [vmem:[%s10638_s10 + $0x78] sm:$0xff]  }
 0x756   : > { %v2088_v39 = vadd.f32 %v7255_v37, %v2081_v38 }
 0x758   : > { %v2089_v40 = vpack.c.bf16 %v2088_v39, %v2088_v39 }
 0x75a   : > { %8189 = vmatmul.mubr.msk.bf16.vlgmr.msra.gmra.mrb[44].mxu0 %vm680_vm0, %v2089_v40 }
 0x75b   : > { %8208 = vmatprep.mubr.msk.bf16.mxu0 %vm9079_vm1, %v9078_v16  ;;  %8205 = vmatpush3.bf16.msra.mxu0 %v8840_v1 }
 0x75c   : > { %8206 = vmatprep.subr.bf16.mxu0 %v9078_v16 }
 0x75f   : > { %8207 = vmatpush3.bf16.msra.mxu0 %v8842_v3 }
 0x760   : > { %8212 = vmatprep.subr.bf16.mxu0 %v9078_v16 }
 0x82d   : > { %v2145_v44 = vpop.f32.mrb[44].mxu0 }
 0x82e   : > { %v2146_v45 = vadd.f32 %v7256_v43, %v2145_v44  ;;  %v8190_v46 = vpop.f32.mrb[45].mxu0  ;;  %v7367_v44 = vld [vmem:[%s10637_s9 + $0x4] ss:$0 sm:$0xff] }
 0x82f   : > { %v2148_v47 = vpop.f32.mrb[46].mxu0 }
 0x830   : > { %v2151_v48 = vmax.f32 %v2146_v45, 0.0  ;;  %v8191_v49 = vpop.f32.mrb[47].mxu0 }
 0x832   : > { %v2152_v50 = vpack.c.bf16 %v2151_v48, %v2151_v48 }
 0x834   : > { %8201 = vmatmul.mubr.msk.bf16.vlgmr.msra.gmra.mrb[52].mxu1 %vm2177_vm5, %v2152_v50 }
 0x835   : > { %8224 = vmatprep.mubr.msk.bf16.mxu1 %vm9079_vm1, %v9078_v16  ;;  %8221 = vmatpush3.bf16.msra.mxu1 %v8841_v2 }
 0x836   : > { %8222 = vmatprep.subr.bf16.mxu1 %v9078_v16 }
 0x839   : > { %8223 = vmatpush3.bf16.msra.mxu1 %v8843_v4 }
 0x83a   : > { %8236 = vmatprep.subr.bf16.mxu1 %v9078_v16 }
 0x907   : > { %v2215_v53 = vpop.f32.mrb[52].mxu1 }
 0x908   : > { %v2221_v54 = vadd.f32 %v2215_v53, %v2061_v21  ;;  %v8202_v55 = vpop.f32.mrb[53].mxu1  ;;  %v8848_v21 = vld [vmem:[%s10634_s6 + $0x70] sm:$0xff]  }
 0x909   : > { %v2218_v56 = vpop.f32.mrb[54].mxu1 }
 0x90a   : > { %v9578_v57 = vadd.f32 %v7265_v51, %v2221_v54  ;;  %v8203_v58 = vpop.f32.mrb[55].mxu1  ;;  %v7351_v56 = vld [vmem:[%s10635_s7 + $0x4] ss:$0 sm:$0xff] }
 0x90c   : > { %v2328_v59 = vsel %vm680_vm0, %v9578_v57, 0.0 }
 0x90d   : > { %2329 = vadd.xlane.f32.xlu0 %v2328_v59  ;;  %v7369_v59 = vld [vmem:[%s10637_s9 + $0x6] ss:$0 sm:$0xff] }
 0x99a   : > { %v2330_v60 = vpop.xlane.xlu0 %2329 }
 0x99b   : > { %v2331_v61 = vmul.f32 0.03125, %v2330_v60 }
 0x99d   : > { %v2332_v62 = vsub.f32 %v9578_v57, %v2331_v61 }
 0x99f   : > { %v2333_v63 = vmul.f32 %v2332_v62, %v2332_v62 }
 0x9a1   : > { %v2334_v0 = vsel %vm680_vm0, %v2333_v63, 0.0 }
 0x9a2   : > { %2335 = vadd.xlane.f32.xlu1 %v2334_v0 }
 0xa2f   : > { %v2336_v5 = vpop.xlane.xlu1 %2335 }
 0xa30   : > { %v2337_v6 = vmul.f32 0.03125, %v2336_v5 }
 0xa32   : > { %v2338_v7 = vadd.f32 1e-05, %v2337_v6 }
 0xa34   : > { %8952 = vrsqrt.f32 %v2338_v7 }
 0xa3e   : > { %v8953_v8 = vpop.eup %8952 }
 0xa3f   : > { %v2340_v11 = vmul.f32 %v8953_v8, %v2332_v62  ;;  %v7353_v8 = vld [vmem:[%s10635_s7 + $0x6] ss:$0 sm:$0xff] }
 0xa41   : > { %v2347_v52 = vmul.f32 %v7349_v9, %v2340_v11  ;;  %v7368_v11 = vld [vmem:[%s10637_s9 + $0x5] ss:$0 sm:$0xff] }
 0xa43   : > { %v2354_v13 = vadd.f32 %v7350_v12, %v2347_v52  ;;  %v7383_v12 = vld [vmem:[%s10639_s11 + $0x4] ss:$0 sm:$0xff] }
 0xa45   : > { %v9612_v17 = vpack.c.bf16 %v2354_v13, %v2354_v13 }
 0xa47   : > { %8209 = vmatmul.mubr.msk.bf16.vlgmr.msra.gmra.mrb[48].mxu0 %vm680_vm0, %v9612_v17  ;;  %8225 = vmatmul.mubr.msk.bf16.vlgmr.msra.gmra.mrb[56].mxu1 %vm680_vm0, %v9612_v17 }
 0xa48   : > { %8213 = vmatpush3.bf16.msra.mxu0 %v8844_v14  ;;  %8237 = vmatpush3.bf16.msra.mxu1 %v8845_v15 }
 0xa49   : > { %8214 = vmatprep.subr.bf16.mxu0 %v9078_v16  ;;  %8238 = vmatprep.subr.bf16.mxu1 %v9078_v16 }
 0xa4a   : > { %8216 = vmatprep.mubr.msk.bf16.mxu0 %vm9079_vm1, %v9078_v16  ;;  %8240 = vmatprep.mubr.msk.bf16.mxu1 %vm9079_vm1, %v9078_v16 }
 0xa4c   : > { %8215 = vmatpush3.bf16.msra.mxu0 %v8846_v18  ;;  %8239 = vmatpush3.bf16.msra.mxu1 %v8847_v20 }
 0xa4d   : > { %8228 = vmatprep.subr.bf16.mxu0 %v9078_v16  ;;  %8252 = vmatprep.subr.bf16.mxu1 %v9078_v16 }
 0xa4f   : > { %8217 = vmatmul.mubr.msk.bf16.vlgmr.msra.gmra.mrb[52].mxu0 %vm680_vm0, %v9612_v17  ;;  %8241 = vmatmul.mubr.msk.bf16.vlgmr.msra.gmra.mrb[60].mxu1 %vm680_vm0, %v9612_v17 }
 0xa50   : > { %8229 = vmatpush3.bf16.msra.mxu0 %v8848_v21  ;;  %8253 = vmatpush3.bf16.msra.mxu1 %v8849_v22 }
 0xa51   : > { %8230 = vmatprep.subr.bf16.mxu0 %v9078_v16  ;;  %8254 = vmatprep.subr.bf16.mxu1 %v9078_v16 }
 0xa52   : > { %8232 = vmatprep.mubr.msk.bf16.mxu0 %vm9079_vm1, %v9078_v16  ;;  %8256 = vmatprep.mubr.msk.bf16.mxu1 %vm9079_vm1, %v9078_v16 }
 0xa54   : > { %8231 = vmatpush3.bf16.msra.mxu0 %v8850_v23  ;;  %8255 = vmatpush3.bf16.msra.mxu1 %v8851_v10 }
 0xa55   : > { %8244 = vmatprep.subr.bf16.mxu0 %v9078_v16  ;;  %8268 = vmatprep.subr.bf16.mxu1 %v9078_v16 }
 0xa57   : > { %8233 = vmatmul.mubr.msk.bf16.vlgmr.msra.gmra.mrb[56].mxu0 %vm680_vm0, %v9612_v17  ;;  %8257 = vmatmul.mubr.msk.bf16.vlgmr.msra.gmra.mrb[64].mxu1 %vm680_vm0, %v9612_v17 }
 0xa58   : > { %8245 = vmatpush3.bf16.msra.mxu0 %v8852_v24  ;;  %8269 = vmatpush3.bf16.msra.mxu1 %v8853_v25 }
 0xa59   : > { %8246 = vmatprep.subr.bf16.mxu0 %v9078_v16  ;;  %8270 = vmatprep.subr.bf16.mxu1 %v9078_v16 }
 0xa5a   : > { %8248 = vmatprep.mubr.msk.bf16.mxu0 %vm9079_vm1, %v9078_v16  ;;  %8272 = vmatprep.mubr.msk.bf16.mxu1 %vm9079_vm1, %v9078_v16 }
 0xa5c   : > { %8247 = vmatpush3.bf16.msra.mxu0 %v8854_v26  ;;  %8271 = vmatpush3.bf16.msra.mxu1 %v8855_v27  ;;  %v7352_v27 = vld [vmem:[%s10635_s7 + $0x5] ss:$0 sm:$0xff] }
 0xa5d   : > { %8260 = vmatprep.subr.bf16.mxu0 %v9078_v16  ;;  %8284 = vmatprep.subr.bf16.mxu1 %v9078_v16 }
 0xa5f   : > { %8249 = vmatmul.mubr.msk.bf16.vlgmr.msra.gmra.mrb[60].mxu0 %vm680_vm0, %v9612_v17  ;;  %8273 = vmatmul.mubr.msk.bf16.vlgmr.msra.gmra.mrb[68].mxu1 %vm680_vm0, %v9612_v17 }
 0xa60   : > { %8261 = vmatpush3.bf16.msra.mxu0 %v8856_v28  ;;  %8285 = vmatpush3.bf16.msra.mxu1 %v8857_v29 }
 0xa61   : > { %8262 = vmatprep.subr.bf16.mxu0 %v9078_v16  ;;  %8286 = vmatprep.subr.bf16.mxu1 %v9078_v16 }
 0xa62   : > { %8264 = vmatprep.mubr.msk.bf16.mxu0 %vm9079_vm1, %v9078_v16  ;;  %8288 = vmatprep.mubr.msk.bf16.mxu1 %vm9079_vm1, %v9078_v16 }
 0xa64   : > { %8263 = vmatpush3.bf16.msra.mxu0 %v8858_v30  ;;  %8287 = vmatpush3.bf16.msra.mxu1 %v8859_v31  ;;  %v7370_v30 = vld [vmem:[%s10637_s9 + $0x7] ss:$0 sm:$0xff] }
 0xa65   : > { %8276 = vmatprep.subr.bf16.mxu0 %v9078_v16  ;;  %8300 = vmatprep.subr.bf16.mxu1 %v9078_v16 }
 0xa67   : > { %8265 = vmatmul.mubr.msk.bf16.vlgmr.msra.gmra.mrb[64].mxu0 %vm680_vm0, %v9612_v17  ;;  %8289 = vmatmul.mubr.msk.bf16.vlgmr.msra.gmra.mrb[72].mxu1 %vm680_vm0, %v9612_v17 }
 0xa68   : > { %8277 = vmatpush3.bf16.msra.mxu0 %v8860_v32  ;;  %8280 = vmatprep.mubr.msk.bf16.mxu0 %vm9079_vm1, %v9078_v16 }
 0xa69   : > { %8278 = vmatprep.subr.bf16.mxu0 %v9078_v16  ;;  %8302 = vmatprep.mubr.msk.bf16.mxu1 %vm9079_vm1, %v9078_v16 }
 0xa6c   : > { %8279 = vmatpush3.bf16.msra.mxu0 %v8861_v33 }
 0xa6d   : > { %8292 = vmatprep.subr.bf16.mxu0 %v9078_v16 }
 0xa6f   : > { %8281 = vmatmul.mubr.msk.bf16.vlgmr.msra.gmra.mrb[68].mxu0 %vm680_vm0, %v9612_v17 }
 0xa70   : > { %8293 = vmatpush3.bf16.msra.mxu0 %v8862_v34  ;;  %8296 = vmatprep.mubr.msk.bf16.mxu0 %vm9079_vm1, %v9078_v16 }
 0xa71   : > { %8294 = vmatprep.subr.bf16.mxu0 %v9078_v16 }
 0xa74   : > { %8295 = vmatpush3.bf16.msra.mxu0 %v8863_v35 }
 0xa75   : > { %8306 = vmatprep.subr.bf16.mxu0 %v9078_v16 }
 0xa77   : > { %8297 = vmatmul.mubr.msk.bf16.vlgmr.msra.gmra.mrb[72].mxu0 %vm680_vm0, %v9612_v17 }
 0xa78   : > { %8308 = vmatprep.mubr.msk.bf16.mxu0 %vm9079_vm1, %v9078_v16 }
 0xb1a   : > { %v2429_v36 = vpop.f32.mrb[48].mxu0  ;;  %v2533_v37 = vpop.f32.mrb[56].mxu1 }
 0xb1b   : > { %v8210_v38 = vpop.f32.mrb[49].mxu0  ;;  %v8226_v39 = vpop.f32.mrb[57].mxu1  ;;  %v2430_v60 = vadd.f32 %v7351_v56, %v2429_v36  ;;  %v2534_v52 = vadd.f32 %v7353_v8, %v2533_v37 }
 0xb1c   : > { %v2432_v40 = vpop.f32.mrb[50].mxu0  ;;  %v2536_v41 = vpop.f32.mrb[58].mxu1 }
 0xb1d   : > { %v8211_v42 = vpop.f32.mrb[51].mxu0  ;;  %v8227_v43 = vpop.f32.mrb[59].mxu1  ;;  %v3055_v4 = vpack.c.bf16 %v2430_v60, %v2430_v60  ;;  %v3057_v23 = vpack.c.bf16 %v2534_v52, %v2534_v52 }
 0xb1e   : > { %v7354_v43 = vld [vmem:[%s10635_s7 + $0x7] ss:$0 sm:$0xff] }
 0xb22   : > { %v2481_v45 = vpop.f32.mrb[52].mxu0  ;;  %v2661_v46 = vpop.f32.mrb[60].mxu1 }
 0xb23   : > { %v2662_v47 = vadd.f32 %v7367_v44, %v2661_v46  ;;  %v8218_v48 = vpop.f32.mrb[53].mxu0  ;;  %v8242_v49 = vpop.f32.mrb[61].mxu1  ;;  %v2482_v31 = vadd.f32 %v7352_v27, %v2481_v45  ;;  %v7384_v45 = vld [vmem:[%s10639_s11 + $0x5] ss:$0 sm:$0xff] }
 0xb24   : > { %v2484_v50 = vpop.f32.mrb[54].mxu0  ;;  %v2664_v51 = vpop.f32.mrb[62].mxu1 }
 0xb25   : > { %v3059_v53 = vpack.c.bf16 %v2662_v47, %v2662_v47  ;;  %v8219_v54 = vpop.f32.mrb[55].mxu0  ;;  %v8243_v55 = vpop.f32.mrb[63].mxu1  ;;  %v3056_v39 = vpack.c.bf16 %v2482_v31, %v2482_v31 }
 0xb27   : > { %v3067_v58 = vsel %vm1437_vm2, %v3059_v53, 0 }
 0xb28   : > { %8301 = vmatpush3.bf16.xpose.msra.mxu1 %v3067_v58 }
 0xb29   : > { %8312 = vmatprep.subr.bf16.mxu1 %v9078_v16 }
 0xb2a   : > { %v2585_v61 = vpop.f32.mrb[56].mxu0  ;;  %v2765_v62 = vpop.f32.mrb[64].mxu1 }
 0xb2b   : > { %v2766_v63 = vadd.f32 %v7369_v59, %v2765_v62  ;;  %v8234_v0 = vpop.f32.mrb[57].mxu0  ;;  %v8258_v1 = vpop.f32.mrb[65].mxu1  ;;  %v2586_v46 = vadd.f32 %v7354_v43, %v2585_v61 }
 0xb2c   : > { %v2588_v2 = vpop.f32.mrb[58].mxu0  ;;  %v2768_v3 = vpop.f32.mrb[66].mxu1 }
 0xb2d   : > { %v3061_v5 = vpack.c.bf16 %v2766_v63, %v2766_v63  ;;  %v8235_v6 = vpop.f32.mrb[59].mxu0  ;;  %v8259_v7 = vpop.f32.mrb[67].mxu1  ;;  %v3058_v51 = vpack.c.bf16 %v2586_v46, %v2586_v46 }
 0xb2f   : > { %v3159_v9 = vsel %vm1437_vm2, %v3061_v5, 0  ;;  %8303 = vmatmul.mubr.msk.bf16.vlgmr.msra.gmra.mrb[76].mxu1 %vm1437_vm2, %v3055_v4 }
 0xb30   : > { %8313 = vmatpush3.bf16.xpose.msra.mxu1 %v3159_v9  ;;  %8314 = vmatprep.mubr.msk.bf16.mxu1 %vm9079_vm1, %v9078_v16 }
 0xb31   : > { %8324 = vmatprep.subr.bf16.mxu1 %v9078_v16 }
 0xb32   : > { %v2713_v13 = vpop.f32.mrb[60].mxu0  ;;  %v2893_v14 = vpop.f32.mrb[68].mxu1 }
 0xb33   : > { %v2714_v15 = vadd.f32 %v7368_v11, %v2713_v13  ;;  %v2894_v17 = vadd.f32 %v7383_v12, %v2893_v14  ;;  %v8250_v18 = vpop.f32.mrb[61].mxu0  ;;  %v8274_v20 = vpop.f32.mrb[69].mxu1 }
 0xb34   : > { %v2716_v21 = vpop.f32.mrb[62].mxu0  ;;  %v2896_v22 = vpop.f32.mrb[70].mxu1 }
 0xb35   : > { %v3060_v10 = vpack.c.bf16 %v2714_v15, %v2714_v15  ;;  %v3295_v24 = vpack.c.bf16 %v2894_v17, %v2894_v17  ;;  %v8251_v25 = vpop.f32.mrb[63].mxu0  ;;  %v8275_v26 = vpop.f32.mrb[71].mxu1 }
 0xb37   : > { %v3113_v28 = vsel %vm1437_vm2, %v3060_v10, 0  ;;  %v3303_v29 = vsel %vm1677_vm3, %v3295_v24, 0  ;;  %8315 = vmatmul.mubr.msk.bf16.vlgmr.msra.gmra.mrb[80].mxu1 %vm1437_vm2, %v3057_v23 }
 0xb38   : > { %8307 = vmatpush3.bf16.xpose.msra.mxu0 %v3113_v28  ;;  %8325 = vmatpush3.bf16.msra.mxu1 %v3303_v29 }
 0xb39   : > { %8318 = vmatprep.subr.bf16.mxu0 %v9078_v16  ;;  %8326 = vmatprep.mubr.msk.bf16.mxu1 %vm9079_vm1, %v9078_v16 }
 0xb3a   : > { %v2817_v32 = vpop.f32.mrb[64].mxu0  ;;  %v9773_v33 = vpop.f32.mrb[72].mxu1  ;;  %8336 = vmatprep.subr.bf16.mxu1 %v9078_v16 }
 0xb3b   : > { %v2818_v34 = vadd.f32 %v7370_v30, %v2817_v32  ;;  %v8266_v35 = vpop.f32.mrb[65].mxu0  ;;  %v8290_v36 = vpop.f32.mrb[73].mxu1 }
 0xb3c   : > { %v2820_v37 = vpop.f32.mrb[66].mxu0  ;;  %v3000_v38 = vpop.f32.mrb[74].mxu1 }
 0xb3d   : > { %v3062_v40 = vpack.c.bf16 %v2818_v34, %v2818_v34  ;;  %v8267_v41 = vpop.f32.mrb[67].mxu0  ;;  %v8291_v42 = vpop.f32.mrb[75].mxu1 }
 0xb3f   : > { %v3205_v44 = vsel %vm1437_vm2, %v3062_v40, 0  ;;  %8309 = vmatmul.mubr.msk.bf16.vlgmr.msra.gmra.mrb[76].mxu0 %vm1437_vm2, %v3056_v39 }
 0xb40   : > { %8319 = vmatpush3.bf16.xpose.msra.mxu0 %v3205_v44  ;;  %8320 = vmatprep.mubr.msk.bf16.mxu0 %vm9079_vm1, %v9078_v16  ;;  %v7385_v44 = vld [vmem:[%s10639_s11 + $0x6] ss:$0 sm:$0xff] }
 0xb41   : > { %8330 = vmatprep.subr.bf16.mxu0 %v9078_v16 }
 0xb42   : > { %v2945_v47 = vpop.f32.mrb[68].mxu0 }
 0xb43   : > { %v2946_v48 = vadd.f32 %v7384_v45, %v2945_v47  ;;  %v8282_v49 = vpop.f32.mrb[69].mxu0  ;;  %v2998_v45 = vadd.f32 %v7385_v44, %v9773_v33 }
 0xb44   : > { %v2948_v50 = vpop.f32.mrb[70].mxu0 }
 0xb45   : > { %v3296_v53 = vpack.c.bf16 %v2946_v48, %v2946_v48  ;;  %v8283_v54 = vpop.f32.mrb[71].mxu0  ;;  %v3297_v48 = vpack.c.bf16 %v2998_v45, %v2998_v45 }
 0xb47   : > { %v3349_v55 = vsel %vm1677_vm3, %v3296_v53, 0  ;;  %8321 = vmatmul.mubr.msk.bf16.vlgmr.msra.gmra.mrb[80].mxu0 %vm1437_vm2, %v3058_v51  ;;  %v3395_v51 = vsel %vm1677_vm3, %v3297_v48, 0 }
 0xb48   : > { %8331 = vmatpush3.bf16.msra.mxu0 %v3349_v55  ;;  %8332 = vmatprep.mubr.msk.bf16.mxu0 %vm9079_vm1, %v9078_v16  ;;  %v7386_v55 = vld [vmem:[%s10639_s11 + $0x7] ss:$0 sm:$0xff] }
 0xb49   : > { %8342 = vmatprep.subr.bf16.mxu0 %v9078_v16 }
 0xb4a   : > { %v9792_v56 = vpop.f32.mrb[72].mxu0 }
 0xb4b   : > { %v8298_v58 = vpop.f32.mrb[73].mxu0 }
 0xb4c   : > { %v3052_v59 = vpop.f32.mrb[74].mxu0 }
 0xb4d   : > { %v8299_v60 = vpop.f32.mrb[75].mxu0  ;;  %v3050_v59 = vadd.f32 %v7386_v55, %v9792_v56 }
 0xc02   : > { %v3103_v61 = vpop.f32.mrb[76].mxu1 }
 0xc03   : > { %v3104_v62 = vadd.f32 %v3103_v61, %v9455_v19  ;;  %v8304_v63 = vpop.f32.mrb[77].mxu1 }
 0xc04   : > { %v3106_v0 = vpop.f32.mrb[78].mxu1 }
 0xc05   : > { %v8305_v1 = vpop.f32.mrb[79].mxu1  ;;  %v3247_v2 = vsel %vm1437_vm2, %v3104_v62, -inf }
 0xc06   : > { %3248 = vmax.xlane.f32.xlu0 %v3247_v2 }
 0xc0a   : > { %v3195_v3 = vpop.f32.mrb[80].mxu1 }
 0xc0b   : > { %v3196_v4 = vadd.f32 %v3195_v3, %v9455_v19  ;;  %v8316_v5 = vpop.f32.mrb[81].mxu1 }
 0xc0c   : > { %v3198_v6 = vpop.f32.mrb[82].mxu1 }
 0xc0d   : > { %v8317_v7 = vpop.f32.mrb[83].mxu1  ;;  %v3253_v8 = vsel %vm1437_vm2, %v3196_v4, -inf  ;;  %v7331_v6 = vld [vmem:[%s10640_s12 + $0x14] sm:$0xf] }
 0xc0e   : > { %3254 = vmax.xlane.f32.xlu0 %v3253_v8  ;;  %v3537_v7 = vsel %vm1677_vm3, %v7331_v6, 0  ;;  %v7332_v8 = vld [vmem:[%s10640_s12 + $0x18] sm:$0xf] }
 0xc12   : > { %v3149_v9 = vpop.f32.mrb[76].mxu0 }
 0xc13   : > { %v3150_v11 = vadd.f32 %v3149_v9, %v9455_v19  ;;  %v8310_v12 = vpop.f32.mrb[77].mxu0 }
 0xc14   : > { %v3152_v52 = vpop.f32.mrb[78].mxu0 }
 0xc15   : > { %v8311_v13 = vpop.f32.mrb[79].mxu0  ;;  %v3250_v14 = vsel %vm1437_vm2, %v3150_v11, -inf  ;;  %v3583_v52 = vsel %vm1677_vm3, %v7332_v8, 0 }
 0xc16   : > { %3251 = vmax.xlane.f32.xlu1 %v3250_v14 }
 0xc1a   : > { %v3241_v15 = vpop.f32.mrb[80].mxu0 }
 0xc1b   : > { %v3242_v17 = vadd.f32 %v3241_v15, %v9455_v19  ;;  %v8322_v18 = vpop.f32.mrb[81].mxu0 }
 0xc1c   : > { %v3244_v20 = vpop.f32.mrb[82].mxu0 }
 0xc1d   : > { %v8323_v21 = vpop.f32.mrb[83].mxu0  ;;  %v3256_v22 = vsel %vm1437_vm2, %v3242_v17, -inf }
 0xc1e   : > { %3257 = vmax.xlane.f32.xlu1 %v3256_v22  ;;  %v7333_v22 = vld [vmem:[%s10640_s12 + $0x1c] sm:$0xf] }
 0xc93   : > { %v3249_v23 = vpop.xlane.xlu0 %3248 }
 0xc94   : > { %v3259_v10 = vsub.f32 %v3104_v62, %v3249_v23  ;;  %v3298_v62 = vpack.c.bf16 %v3050_v59, %v3050_v59 }
 0xc96   : > { %v3263_v24 = vmul.f32 1.442695, %v3259_v10  ;;  %v3441_v1 = vsel %vm1677_vm3, %v3298_v62, 0 }
 0xc98   : > { %8954 = vpow2.f32 %v3263_v24 }
 0xc9b   : > { %v3255_v25 = vpop.xlane.xlu0 %3254 }
 0xc9c   : > { %v3261_v26 = vsub.f32 %v3196_v4, %v3255_v25  ;;  %v7330_v4 = vld [vmem:[%s10640_s12 + $0x10] sm:$0xf]  ;;  %v3629_v25 = vsel %vm1677_vm3, %v7333_v22, 0 }
 0xc9d   : > { %v3491_v5 = vsel %vm1677_vm3, %v7330_v4, 0  ;;  %v8865_v4 = vld [vmem:[%s10642_s14 + $0x18] sm:$0xff]  }
 0xc9e   : > { %v3267_v27 = vmul.f32 1.442695, %v3261_v26 }
 0xca0   : > { %8956 = vpow2.f32 %v3267_v27 }
 0xca2   : > { %v8955_v28 = vpop.eup %8954 }
 0xca3   : > { %v3252_v29 = vpop.xlane.xlu1 %3251  ;;  %v3271_v30 = vsel %vm1437_vm2, %v8955_v28, 0.0 }
 0xca4   : > { %v3260_v31 = vsub.f32 %v3150_v11, %v3252_v29  ;;  %3272 = vadd.xlane.f32.xlu0 %v3271_v30 }
 0xca6   : > { %v3265_v32 = vmul.f32 1.442695, %v3260_v31 }
 0xca8   : > { %8958 = vpow2.f32 %v3265_v32 }
 0xcaa   : > { %v8957_v34 = vpop.eup %8956 }
 0xcab   : > { %v3258_v35 = vpop.xlane.xlu1 %3257  ;;  %v3277_v36 = vsel %vm1437_vm2, %v8957_v34, 0.0 }
 0xcac   : > { %v3262_v37 = vsub.f32 %v3242_v17, %v3258_v35  ;;  %3278 = vadd.xlane.f32.xlu0 %v3277_v36 }
 0xcae   : > { %v3269_v38 = vmul.f32 1.442695, %v3262_v37 }
 0xcb0   : > { %8960 = vpow2.f32 %v3269_v38 }
 0xcb2   : > { %v8959_v39 = vpop.eup %8958 }
 0xcb3   : > { %v3274_v40 = vsel %vm1437_vm2, %v8959_v39, 0.0 }
 0xcb4   : > { %3275 = vadd.xlane.f32.xlu1 %v3274_v40 }
 0xcba   : > { %v8961_v41 = vpop.eup %8960 }
 0xcbb   : > { %v3280_v42 = vsel %vm1437_vm2, %v8961_v41, 0.0 }
 0xcbc   : > { %3281 = vadd.xlane.f32.xlu1 %v3280_v42 }
 0xd31   : > { %v3273_v43 = vpop.xlane.xlu0 %3272 }
 0xd32   : > { %8962 = vrcp.f32 %v3273_v43 }
 0xd39   : > { %v3279_v46 = vpop.xlane.xlu0 %3278 }
 0xd3a   : > { %8964 = vrcp.f32 %v3279_v46 }
 0xd3c   : > { %v8963_v47 = vpop.eup %8962 }
 0xd3d   : > { %v3287_v49 = vmul.f32 %v8963_v47, %v8955_v28 }
 0xd3f   : > { %v3291_v50 = vpack.c.bf16 %v3287_v49, %v3287_v49 }
 0xd41   : > { %8327 = vmatmul.mubr.msk.bf16.vlgmr.msra.gmra.mrb[84].mxu1 %vm1437_vm2, %v3291_v50  ;;  %v3276_v53 = vpop.xlane.xlu1 %3275 }
 0xd42   : > { %8337 = vmatpush3.bf16.msra.mxu1 %v3395_v51  ;;  %8966 = vrcp.f32 %v3276_v53  ;;  %8338 = vmatprep.mubr.msk.bf16.mxu1 %vm9079_vm1, %v9078_v16  ;;  %v7411_v53 = vld [vmem:[%s10641_s13 + $0x1] ss:$0 sm:$0xff] }
 0xd43   : > { %8348 = vmatprep.subr.bf16.mxu1 %v9078_v16 }
 0xd44   : > { %v8965_v54 = vpop.eup %8964 }
 0xd45   : > { %v3289_v33 = vmul.f32 %v8965_v54, %v8957_v34 }
 0xd47   : > { %v3293_v58 = vpack.c.bf16 %v3289_v33, %v3289_v33 }
 0xd49   : > { %8339 = vmatmul.mubr.msk.bf16.vlgmr.msra.gmra.mrb[88].mxu1 %vm1437_vm2, %v3293_v58  ;;  %v3282_v60 = vpop.xlane.xlu1 %3281 }
 0xd4a   : > { %8968 = vrcp.f32 %v3282_v60  ;;  %8350 = vmatprep.mubr.msk.bf16.mxu1 %vm9079_vm1, %v9078_v16  ;;  %8349 = vmatpush3.bf16.msra.mxu1 %v3491_v5  ;;  %v8867_v5 = vld [vmem:[%s10644_s16 + $0x28] sm:$0xff]  }
 0xd4b   : > { %8360 = vmatprep.subr.bf16.mxu1 %v9078_v16 }
 0xd4c   : > { %v8967_v61 = vpop.eup %8966 }
 0xd4d   : > { %v3288_v63 = vmul.f32 %v8967_v61, %v8959_v39 }
 0xd4f   : > { %v3292_v0 = vpack.c.bf16 %v3288_v63, %v3288_v63 }
 0xd51   : > { %8333 = vmatmul.mubr.msk.bf16.vlgmr.msra.gmra.mrb[84].mxu0 %vm1437_vm2, %v3292_v0 }
 0xd52   : > { %8343 = vmatpush3.bf16.msra.mxu0 %v3441_v1  ;;  %8344 = vmatprep.mubr.msk.bf16.mxu0 %vm9079_vm1, %v9078_v16 }
 0xd53   : > { %8354 = vmatprep.subr.bf16.mxu0 %v9078_v16 }
 0xd54   : > { %v8969_v56 = vpop.eup %8968 }
 0xd55   : > { %v3290_v2 = vmul.f32 %v8969_v56, %v8961_v41 }
 0xd57   : > { %v3294_v3 = vpack.c.bf16 %v3290_v2, %v3290_v2 }
 0xd59   : > { %8345 = vmatmul.mubr.msk.bf16.vlgmr.msra.gmra.mrb[88].mxu0 %vm1437_vm2, %v3294_v3  ;;  %v8864_v3 = vld [vmem:[%s10642_s14 + $0x10] sm:$0xff]  }
 0xd5a   : > { %8356 = vmatprep.mubr.msk.bf16.mxu0 %vm9079_vm1, %v9078_v16  ;;  %8355 = vmatpush3.bf16.msra.mxu0 %v3537_v7 }
 0xd5b   : > { %8366 = vmatprep.subr.bf16.mxu0 %v9078_v16 }
 0xe14   : > { %v3339_v9 = vpop.f32.mrb[84].mxu1 }
 0xe15   : > { %v3483_v11 = vpack.c.bf16 %v3339_v9, %v3339_v9  ;;  %v8328_v12 = vpop.f32.mrb[85].mxu1 }
 0xe16   : > { %v3342_v13 = vpop.f32.mrb[86].mxu1 }
 0xe17   : > { %v8329_v14 = vpop.f32.mrb[87].mxu1  ;;  %8351 = vmatmul.mubr.msk.bf16.vlgmr.msra.gmra.mrb[92].mxu1 %vm1437_vm2, %v3483_v11  ;;  %v7412_v11 = vld [vmem:[%s10632_s4 + $0x1] ss:$0 sm:$0xff] }
 0xe18   : > { %8361 = vmatpush3.bf16.msra.mxu1 %v3583_v52  ;;  %8362 = vmatprep.mubr.msk.bf16.mxu1 %vm9079_vm1, %v9078_v16  ;;  %v7413_v52 = vld [vmem:[%s10633_s5 + $0x1] ss:$0 sm:$0xff] }
 0xe19   : > { %8372 = vmatprep.subr.bf16.mxu1 %v9078_v16 }
 0xe1c   : > { %v3431_v15 = vpop.f32.mrb[88].mxu1 }
 0xe1d   : > { %v3485_v17 = vpack.c.bf16 %v3431_v15, %v3431_v15  ;;  %v8340_v18 = vpop.f32.mrb[89].mxu1 }
 0xe1e   : > { %v3434_v20 = vpop.f32.mrb[90].mxu1  ;;  %v8869_v18 = vld [vmem:[%s10644_s16 + $0x38] sm:$0xff]  }
 0xe1f   : > { %v8341_v21 = vpop.f32.mrb[91].mxu1  ;;  %8363 = vmatmul.mubr.msk.bf16.vlgmr.msra.gmra.mrb[96].mxu1 %vm1437_vm2, %v3485_v17  ;;  %v8868_v17 = vld [vmem:[%s10644_s16 + $0x30] sm:$0xff]   ;;  %v7414_v20 = vld [vmem:[%s10643_s15 + $0x1] ss:$0 sm:$0xff] }
 0xe20   : > { %8376 = vmatprep.mubr.msk.bf16.mxu1 %vm9079_vm1, %v9078_v16  ;;  %8373 = vmatpush3.bf16.msra.mxu1 %v8864_v3  ;;  %v8885_v3 = vld [vmem:[%s10638_s10 + $0x88] sm:$0xff]  }
 0xe21   : > { %8374 = vmatprep.subr.bf16.mxu1 %v9078_v16 }
 0xe24   : > { %v3385_v23 = vpop.f32.mrb[84].mxu0  ;;  %8375 = vmatpush3.bf16.msra.mxu1 %v8865_v4  ;;  %v8886_v4 = vld [vmem:[%s10636_s8 + $0xb0] sm:$0xff]  }
 0xe25   : > { %v3484_v10 = vpack.c.bf16 %v3385_v23, %v3385_v23  ;;  %v8334_v24 = vpop.f32.mrb[85].mxu0  ;;  %8392 = vmatprep.subr.bf16.mxu1 %v9078_v16 }
 0xe26   : > { %v3388_v26 = vpop.f32.mrb[86].mxu0 }
 0xe27   : > { %v8335_v27 = vpop.f32.mrb[87].mxu0  ;;  %8357 = vmatmul.mubr.msk.bf16.vlgmr.msra.gmra.mrb[92].mxu0 %vm1437_vm2, %v3484_v10 }
 0xe28   : > { %8367 = vmatpush3.bf16.msra.mxu0 %v3629_v25  ;;  %8368 = vmatprep.mubr.msk.bf16.mxu0 %vm9079_vm1, %v9078_v16  ;;  %v7423_v27 = vld [vmem:[%s10645_s17 + $0x1] ss:$0 sm:$0xff] }
 0xe29   : > { %8380 = vmatprep.subr.bf16.mxu0 %v9078_v16 }
 0xe2c   : > { %v3477_v28 = vpop.f32.mrb[88].mxu0 }
 0xe2d   : > { %v3486_v29 = vpack.c.bf16 %v3477_v28, %v3477_v28  ;;  %v8346_v30 = vpop.f32.mrb[89].mxu0 }
 0xe2e   : > { %v3480_v31 = vpop.f32.mrb[90].mxu0 }
 0xe2f   : > { %v8347_v32 = vpop.f32.mrb[91].mxu0  ;;  %8369 = vmatmul.mubr.msk.bf16.vlgmr.msra.gmra.mrb[96].mxu0 %vm1437_vm2, %v3486_v29 }
 0xe30   : > { %8388 = vmatprep.mubr.msk.bf16.mxu0 %vm9079_vm1, %v9078_v16 }
 0xeea   : > { %v3527_v34 = vpop.f32.mrb[92].mxu1 }
 0xeeb   : > { %v8352_v35 = vpop.f32.mrb[93].mxu1  ;;  %v3671_v43 = vsel %vm680_vm0, %v3527_v34, 0.0 }
 0xeec   : > { %v3530_v36 = vpop.f32.mrb[94].mxu1 }
 0xeed   : > { %v8353_v37 = vpop.f32.mrb[95].mxu1 }
 0xef2   : > { %v3619_v38 = vpop.f32.mrb[96].mxu1 }
 0xef3   : > { %v8364_v39 = vpop.f32.mrb[97].mxu1  ;;  %v3674_v48 = vsel %vm680_vm0, %v3619_v38, 0.0 }
 0xef4   : > { %v3622_v40 = vpop.f32.mrb[98].mxu1 }
 0xef5   : > { %v8365_v41 = vpop.f32.mrb[99].mxu1 }
 0xef6   : > { %v8870_v41 = vld [vmem:[%s10634_s6 + $0x80] sm:$0xff]  }
 0xefa   : > { %v3573_v42 = vpop.f32.mrb[92].mxu0 }
 0xefb   : > { %v3672_v44 = vsel %vm680_vm0, %v3573_v42, 0.0  ;;  %v8358_v45 = vpop.f32.mrb[93].mxu0  ;;  %v8871_v42 = vld [vmem:[%s10634_s6 + $0xa0] sm:$0xff]  }
 0xefc   : > { %v3673_v46 = vadd.f32 %v3672_v44, %v3671_v43  ;;  %v3576_v47 = vpop.f32.mrb[94].mxu0  ;;  %v8872_v43 = vld [vmem:[%s10634_s6 + $0x88] sm:$0xff]  }
 0xefd   : > { %v8359_v49 = vpop.f32.mrb[95].mxu0  ;;  %v8873_v44 = vld [vmem:[%s10634_s6 + $0xa8] sm:$0xff]  }
 0xefe   : > { %v3675_v50 = vadd.f32 %v3674_v48, %v3673_v46  ;;  %v7507_v49 = vld [vmem:[%s10666_s22 + $0x2] ss:$0 sm:$0xff] }
 0xf02   : > { %v3665_v51 = vpop.f32.mrb[96].mxu0 }
 0xf03   : > { %v3676_v54 = vsel %vm680_vm0, %v3665_v51, 0.0  ;;  %v8370_v33 = vpop.f32.mrb[97].mxu0  ;;  %v7508_v51 = vld [vmem:[%s10667_s3 + $0x2] ss:$0 sm:$0xff] }
 0xf04   : > { %v3677_v55 = vadd.f32 %v3676_v54, %v3675_v50  ;;  %v3668_v58 = vpop.f32.mrb[98].mxu0  ;;  %v8874_v33 = vld [vmem:[%s10634_s6 + $0x90] sm:$0xff]  }
 0xf05   : > { %v8371_v59 = vpop.f32.mrb[99].mxu0 }
 0xf06   : > { %v3684_v60 = vadd.f32 %v7411_v53, %v3677_v55  ;;  %v8875_v55 = vld [vmem:[%s10636_s8 + $0x80] sm:$0xff]   ;;  %v8876_v59 = vld [vmem:[%s10634_s6 + $0x98] sm:$0xff]  }
 0xf08   : > { %v3685_v61 = vadd.f32 %v3684_v60, %v9578_v57  ;;  %v8866_v57 = vld [vmem:[%s10644_s16 + $0x20] sm:$0xff]   ;;  %v8877_v60 = vld [vmem:[%s10636_s8 + $0x88] sm:$0xff]  }
 0xf09   : > { %8381 = vmatpush3.bf16.msra.mxu0 %v8866_v57  ;;  %v8887_v57 = vld [vmem:[%s10638_s10 + $0xa0] sm:$0xff]  }
 0xf0a   : > { %v3686_v62 = vsel %vm680_vm0, %v3685_v61, 0.0  ;;  %8382 = vmatprep.subr.bf16.mxu0 %v9078_v16 }
 0xf0b   : > { %3687 = vadd.xlane.f32.xlu0 %v3686_v62  ;;  %v8879_v62 = vld [vmem:[%s10636_s8 + $0xa0] sm:$0xff]  }
 0xf0d   : > { %8383 = vmatpush3.bf16.msra.mxu0 %v8867_v5  ;;  %v8888_v5 = vld [vmem:[%s10636_s8 + $0xb8] sm:$0xff]  }
 0xf0e   : > { %8384 = vmatprep.subr.bf16.mxu0 %v9078_v16 }
 0xf11   : > { %8385 = vmatpush3.bf16.msra.mxu0 %v8868_v17 }
 0xf12   : > { %8386 = vmatprep.subr.bf16.mxu0 %v9078_v16 }
 0xf15   : > { %8387 = vmatpush3.bf16.msra.mxu0 %v8869_v18 }
 0xf16   : > { %8408 = vmatprep.subr.bf16.mxu0 %v9078_v16 }
 0xf98   : > { %v3688_v63 = vpop.xlane.xlu0 %3687 }
 0xf99   : > { %v3689_v0 = vmul.f32 0.03125, %v3688_v63  ;;  %v8880_v63 = vld [vmem:[%s10634_s6 + $0xb8] sm:$0xff]  }
 0xf9b   : > { %v3690_v1 = vsub.f32 %v3685_v61, %v3689_v0  ;;  %v8881_v0 = vld [vmem:[%s10636_s8 + $0xa8] sm:$0xff]  }
 0xf9d   : > { %v3691_v56 = vmul.f32 %v3690_v1, %v3690_v1 }
 0xf9f   : > { %v3692_v2 = vsel %vm680_vm0, %v3691_v56, 0.0  ;;  %v8883_v56 = vld [vmem:[%s10638_s10 + $0x80] sm:$0xff]  }
 0xfa0   : > { %3693 = vadd.xlane.f32.xlu1 %v3692_v2  ;;  %v8884_v2 = vld [vmem:[%s10636_s8 + $0x98] sm:$0xff]  }
0x102d   : > { %v3694_v6 = vpop.xlane.xlu1 %3693 }
0x102e   : > { %v3695_v7 = vmul.f32 0.03125, %v3694_v6  ;;  %v8889_v6 = vld [vmem:[%s10638_s10 + $0xa8] sm:$0xff]  }
0x1030   : > { %v3696_v8 = vadd.f32 1e-05, %v3695_v7  ;;  %v8890_v7 = vld [vmem:[%s10638_s10 + $0x90] sm:$0xff]  }
0x1032   : > { %8970 = vrsqrt.f32 %v3696_v8  ;;  %v8891_v8 = vld [vmem:[%s10638_s10 + $0x98] sm:$0xff]  }
0x103c   : > { %v8971_v9 = vpop.eup %8970 }
0x103d   : > { %v3698_v12 = vmul.f32 %v8971_v9, %v3690_v1  ;;  %v8882_v1 = vld [vmem:[%s10636_s8 + $0x90] sm:$0xff]  }
0x103e   : > { %v8892_v9 = vld [vmem:[%s10638_s10 + $0xb0] sm:$0xff]  }
0x103f   : > { %v3705_v13 = vmul.f32 %v7412_v11, %v3698_v12  ;;  %v8893_v11 = vld [vmem:[%s10638_s10 + $0xb8] sm:$0xff]  }
0x1041   : > { %v3712_v14 = vadd.f32 %v7413_v52, %v3705_v13 }
0x1043   : > { %v3713_v15 = vpack.c.bf16 %v3712_v14, %v3712_v14 }
0x1045   : > { %8377 = vmatmul.mubr.msk.bf16.vlgmr.msra.gmra.mrb[100].mxu1 %vm680_vm0, %v3713_v15 }
0x1046   : > { %8396 = vmatprep.mubr.msk.bf16.mxu1 %vm9079_vm1, %v9078_v16  ;;  %8393 = vmatpush3.bf16.msra.mxu1 %v8870_v41 }
0x1047   : > { %8394 = vmatprep.subr.bf16.mxu1 %v9078_v16 }
0x104a   : > { %8395 = vmatpush3.bf16.msra.mxu1 %v8872_v43 }
0x104b   : > { %8400 = vmatprep.subr.bf16.mxu1 %v9078_v16 }
0x1118   : > { %v3769_v21 = vpop.f32.mrb[100].mxu1 }
0x1119   : > { %v3770_v22 = vadd.f32 %v7414_v20, %v3769_v21  ;;  %v8378_v23 = vpop.f32.mrb[101].mxu1  ;;  %v7525_v21 = vld [vmem:[%s10637_s9 + $0x8] ss:$0 sm:$0xff] }
0x111a   : > { %v3772_v10 = vpop.f32.mrb[102].mxu1 }
0x111b   : > { %v3775_v24 = vmax.f32 %v3770_v22, 0.0  ;;  %v8379_v25 = vpop.f32.mrb[103].mxu1 }
0x111d   : > { %v3776_v26 = vpack.c.bf16 %v3775_v24, %v3775_v24 }
0x111f   : > { %8389 = vmatmul.mubr.msk.bf16.vlgmr.msra.gmra.mrb[100].mxu0 %vm2177_vm5, %v3776_v26 }
0x1120   : > { %8412 = vmatprep.mubr.msk.bf16.mxu0 %vm9079_vm1, %v9078_v16  ;;  %8409 = vmatpush3.bf16.msra.mxu0 %v8871_v42 }
0x1121   : > { %8410 = vmatprep.subr.bf16.mxu0 %v9078_v16 }
0x1124   : > { %8411 = vmatpush3.bf16.msra.mxu0 %v8873_v44 }
0x1125   : > { %8424 = vmatprep.subr.bf16.mxu0 %v9078_v16 }
0x11f2   : > { %v3838_v28 = vpop.f32.mrb[100].mxu0 }
0x11f3   : > { %v3844_v29 = vadd.f32 %v3838_v28, %v3685_v61  ;;  %v8390_v30 = vpop.f32.mrb[101].mxu0  ;;  %v8878_v61 = vld [vmem:[%s10634_s6 + $0xb0] sm:$0xff]  }
0x11f4   : > { %v3841_v31 = vpop.f32.mrb[102].mxu0 }
0x11f5   : > { %v9914_v32 = vadd.f32 %v7423_v27, %v3844_v29  ;;  %v8391_v34 = vpop.f32.mrb[103].mxu0  ;;  %v7509_v31 = vld [vmem:[%s10635_s7 + $0x8] ss:$0 sm:$0xff] }
0x11f7   : > { %v3951_v35 = vsel %vm680_vm0, %v9914_v32, 0.0 }
0x11f8   : > { %3952 = vadd.xlane.f32.xlu0 %v3951_v35  ;;  %v7527_v35 = vld [vmem:[%s10637_s9 + $0xa] ss:$0 sm:$0xff] }
0x1285   : > { %v3953_v36 = vpop.xlane.xlu0 %3952 }
0x1286   : > { %v3954_v37 = vmul.f32 0.03125, %v3953_v36 }
0x1288   : > { %v3955_v38 = vsub.f32 %v9914_v32, %v3954_v37 }
0x128a   : > { %v3956_v39 = vmul.f32 %v3955_v38, %v3955_v38 }
0x128c   : > { %v3957_v40 = vsel %vm680_vm0, %v3956_v39, 0.0 }
0x128d   : > { %3958 = vadd.xlane.f32.xlu1 %v3957_v40 }
0x131a   : > { %v3959_v45 = vpop.xlane.xlu1 %3958 }
0x131b   : > { %v3960_v46 = vmul.f32 0.03125, %v3959_v45 }
0x131d   : > { %v3961_v47 = vadd.f32 1e-05, %v3960_v46 }
0x131f   : > { %8972 = vrsqrt.f32 %v3961_v47 }
0x1329   : > { %v8973_v48 = vpop.eup %8972 }
0x132a   : > { %v3963_v50 = vmul.f32 %v8973_v48, %v3955_v38  ;;  %v7511_v48 = vld [vmem:[%s10635_s7 + $0xa] ss:$0 sm:$0xff] }
0x132c   : > { %v3970_v53 = vmul.f32 %v7507_v49, %v3963_v50  ;;  %v7526_v50 = vld [vmem:[%s10637_s9 + $0x9] ss:$0 sm:$0xff] }
0x132e   : > { %v3977_v54 = vadd.f32 %v7508_v51, %v3970_v53  ;;  %v7541_v51 = vld [vmem:[%s10639_s11 + $0x8] ss:$0 sm:$0xff] }
0x1330   : > { %v9948_v58 = vpack.c.bf16 %v3977_v54, %v3977_v54 }
0x1332   : > { %8397 = vmatmul.mubr.msk.bf16.vlgmr.msra.gmra.mrb[104].mxu1 %vm680_vm0, %v9948_v58  ;;  %8413 = vmatmul.mubr.msk.bf16.vlgmr.msra.gmra.mrb[104].mxu0 %vm680_vm0, %v9948_v58 }
0x1333   : > { %8401 = vmatpush3.bf16.msra.mxu1 %v8874_v33  ;;  %8425 = vmatpush3.bf16.msra.mxu0 %v8875_v55 }
0x1334   : > { %8402 = vmatprep.subr.bf16.mxu1 %v9078_v16  ;;  %8426 = vmatprep.subr.bf16.mxu0 %v9078_v16 }
0x1335   : > { %8404 = vmatprep.mubr.msk.bf16.mxu1 %vm9079_vm1, %v9078_v16  ;;  %8428 = vmatprep.mubr.msk.bf16.mxu0 %vm9079_vm1, %v9078_v16 }
0x1337   : > { %8403 = vmatpush3.bf16.msra.mxu1 %v8876_v59  ;;  %8427 = vmatpush3.bf16.msra.mxu0 %v8877_v60 }
0x1338   : > { %8416 = vmatprep.subr.bf16.mxu1 %v9078_v16  ;;  %8440 = vmatprep.subr.bf16.mxu0 %v9078_v16 }
0x133a   : > { %8405 = vmatmul.mubr.msk.bf16.vlgmr.msra.gmra.mrb[108].mxu1 %vm680_vm0, %v9948_v58  ;;  %8429 = vmatmul.mubr.msk.bf16.vlgmr.msra.gmra.mrb[108].mxu0 %vm680_vm0, %v9948_v58 }
0x133b   : > { %8417 = vmatpush3.bf16.msra.mxu1 %v8878_v61  ;;  %8441 = vmatpush3.bf16.msra.mxu0 %v8879_v62 }
0x133c   : > { %8418 = vmatprep.subr.bf16.mxu1 %v9078_v16  ;;  %8442 = vmatprep.subr.bf16.mxu0 %v9078_v16 }
0x133d   : > { %8420 = vmatprep.mubr.msk.bf16.mxu1 %vm9079_vm1, %v9078_v16  ;;  %8444 = vmatprep.mubr.msk.bf16.mxu0 %vm9079_vm1, %v9078_v16 }
0x133f   : > { %8419 = vmatpush3.bf16.msra.mxu1 %v8880_v63  ;;  %8443 = vmatpush3.bf16.msra.mxu0 %v8881_v0 }
0x1340   : > { %8432 = vmatprep.subr.bf16.mxu1 %v9078_v16  ;;  %8456 = vmatprep.subr.bf16.mxu0 %v9078_v16 }
0x1342   : > { %8421 = vmatmul.mubr.msk.bf16.vlgmr.msra.gmra.mrb[112].mxu1 %vm680_vm0, %v9948_v58  ;;  %8445 = vmatmul.mubr.msk.bf16.vlgmr.msra.gmra.mrb[112].mxu0 %vm680_vm0, %v9948_v58 }
0x1343   : > { %8433 = vmatpush3.bf16.msra.mxu1 %v8882_v1  ;;  %8457 = vmatpush3.bf16.msra.mxu0 %v8883_v56 }
0x1344   : > { %8434 = vmatprep.subr.bf16.mxu1 %v9078_v16  ;;  %8458 = vmatprep.subr.bf16.mxu0 %v9078_v16 }
0x1345   : > { %8436 = vmatprep.mubr.msk.bf16.mxu1 %vm9079_vm1, %v9078_v16  ;;  %8460 = vmatprep.mubr.msk.bf16.mxu0 %vm9079_vm1, %v9078_v16 }
0x1347   : > { %8435 = vmatpush3.bf16.msra.mxu1 %v8884_v2  ;;  %8459 = vmatpush3.bf16.msra.mxu0 %v8885_v3  ;;  %v7510_v3 = vld [vmem:[%s10635_s7 + $0x9] ss:$0 sm:$0xff] }
0x1348   : > { %8448 = vmatprep.subr.bf16.mxu1 %v9078_v16  ;;  %8472 = vmatprep.subr.bf16.mxu0 %v9078_v16 }
0x134a   : > { %8437 = vmatmul.mubr.msk.bf16.vlgmr.msra.gmra.mrb[116].mxu1 %vm680_vm0, %v9948_v58  ;;  %8461 = vmatmul.mubr.msk.bf16.vlgmr.msra.gmra.mrb[116].mxu0 %vm680_vm0, %v9948_v58 }
0x134b   : > { %8449 = vmatpush3.bf16.msra.mxu1 %v8886_v4  ;;  %8473 = vmatpush3.bf16.msra.mxu0 %v8887_v57 }
0x134c   : > { %8450 = vmatprep.subr.bf16.mxu1 %v9078_v16  ;;  %8474 = vmatprep.subr.bf16.mxu0 %v9078_v16 }
0x134d   : > { %8452 = vmatprep.mubr.msk.bf16.mxu1 %vm9079_vm1, %v9078_v16  ;;  %8476 = vmatprep.mubr.msk.bf16.mxu0 %vm9079_vm1, %v9078_v16 }
0x134f   : > { %8451 = vmatpush3.bf16.msra.mxu1 %v8888_v5  ;;  %8475 = vmatpush3.bf16.msra.mxu0 %v8889_v6  ;;  %v7528_v5 = vld [vmem:[%s10637_s9 + $0xb] ss:$0 sm:$0xff] }
0x1350   : > { %8464 = vmatprep.subr.bf16.mxu1 %v9078_v16  ;;  %8488 = vmatprep.subr.bf16.mxu0 %v9078_v16 }
0x1352   : > { %8453 = vmatmul.mubr.msk.bf16.vlgmr.msra.gmra.mrb[120].mxu1 %vm680_vm0, %v9948_v58  ;;  %8477 = vmatmul.mubr.msk.bf16.vlgmr.msra.gmra.mrb[120].mxu0 %vm680_vm0, %v9948_v58 }
0x1353   : > { %8465 = vmatpush3.bf16.msra.mxu1 %v8890_v7  ;;  %8468 = vmatprep.mubr.msk.bf16.mxu1 %vm9079_vm1, %v9078_v16 }
0x1354   : > { %8466 = vmatprep.subr.bf16.mxu1 %v9078_v16  ;;  %8490 = vmatprep.mubr.msk.bf16.mxu0 %vm9079_vm1, %v9078_v16 }
0x1357   : > { %8467 = vmatpush3.bf16.msra.mxu1 %v8891_v8 }
0x1358   : > { %8480 = vmatprep.subr.bf16.mxu1 %v9078_v16 }
0x135a   : > { %8469 = vmatmul.mubr.msk.bf16.vlgmr.msra.gmra.mrb[124].mxu1 %vm680_vm0, %v9948_v58 }
0x135b   : > { %8481 = vmatpush3.bf16.msra.mxu1 %v8892_v9  ;;  %8484 = vmatprep.mubr.msk.bf16.mxu1 %vm9079_vm1, %v9078_v16 }
0x135c   : > { %8482 = vmatprep.subr.bf16.mxu1 %v9078_v16 }
0x135f   : > { %8483 = vmatpush3.bf16.msra.mxu1 %v8893_v11 }
0x1360   : > { %8494 = vmatprep.subr.bf16.mxu1 %v9078_v16 }
0x1362   : > { %8485 = vmatmul.mubr.msk.bf16.vlgmr.msra.gmra.mrb[128].mxu1 %vm680_vm0, %v9948_v58 }
0x1363   : > { %8496 = vmatprep.mubr.msk.bf16.mxu1 %vm9079_vm1, %v9078_v16 }
0x1405   : > { %v4052_v12 = vpop.f32.mrb[104].mxu1  ;;  %v4156_v52 = vpop.f32.mrb[104].mxu0 }
0x1406   : > { %v8398_v13 = vpop.f32.mrb[105].mxu1  ;;  %v8414_v14 = vpop.f32.mrb[105].mxu0  ;;  %v4053_v36 = vadd.f32 %v7509_v31, %v4052_v12  ;;  %v4157_v53 = vadd.f32 %v7511_v48, %v4156_v52 }
0x1407   : > { %v4055_v15 = vpop.f32.mrb[106].mxu1  ;;  %v4159_v17 = vpop.f32.mrb[106].mxu0 }
0x1408   : > { %v8399_v18 = vpop.f32.mrb[107].mxu1  ;;  %v8415_v20 = vpop.f32.mrb[107].mxu0  ;;  %v4678_v44 = vpack.c.bf16 %v4053_v36, %v4053_v36  ;;  %v4680_v63 = vpack.c.bf16 %v4157_v53, %v4157_v53 }
0x1409   : > { %v7512_v20 = vld [vmem:[%s10635_s7 + $0xb] ss:$0 sm:$0xff] }
0x140d   : > { %v4104_v22 = vpop.f32.mrb[108].mxu1  ;;  %v4284_v23 = vpop.f32.mrb[108].mxu0 }
0x140e   : > { %v4285_v10 = vadd.f32 %v7525_v21, %v4284_v23  ;;  %v8406_v24 = vpop.f32.mrb[109].mxu1  ;;  %v8430_v25 = vpop.f32.mrb[109].mxu0  ;;  %v4105_v6 = vadd.f32 %v7510_v3, %v4104_v22  ;;  %v7542_v22 = vld [vmem:[%s10639_s11 + $0x9] ss:$0 sm:$0xff] }
0x140f   : > { %v4107_v26 = vpop.f32.mrb[110].mxu1  ;;  %v4287_v27 = vpop.f32.mrb[110].mxu0 }
0x1410   : > { %v4682_v28 = vpack.c.bf16 %v4285_v10, %v4285_v10  ;;  %v8407_v29 = vpop.f32.mrb[111].mxu1  ;;  %v8431_v30 = vpop.f32.mrb[111].mxu0  ;;  %v4679_v14 = vpack.c.bf16 %v4105_v6, %v4105_v6 }
0x1412   : > { %v4690_v34 = vsel %vm1437_vm2, %v4682_v28, 0 }
0x1413   : > { %8489 = vmatpush3.bf16.xpose.msra.mxu0 %v4690_v34 }
0x1414   : > { %8500 = vmatprep.subr.bf16.mxu0 %v9078_v16 }
0x1415   : > { %v4208_v37 = vpop.f32.mrb[112].mxu1  ;;  %v4388_v38 = vpop.f32.mrb[112].mxu0 }
0x1416   : > { %v4389_v39 = vadd.f32 %v7527_v35, %v4388_v38  ;;  %v8422_v40 = vpop.f32.mrb[113].mxu1  ;;  %v8446_v41 = vpop.f32.mrb[113].mxu0  ;;  %v4209_v23 = vadd.f32 %v7512_v20, %v4208_v37 }
0x1417   : > { %v4211_v42 = vpop.f32.mrb[114].mxu1  ;;  %v4391_v43 = vpop.f32.mrb[114].mxu0 }
0x1418   : > { %v4684_v45 = vpack.c.bf16 %v4389_v39, %v4389_v39  ;;  %v8423_v46 = vpop.f32.mrb[115].mxu1  ;;  %v8447_v47 = vpop.f32.mrb[115].mxu0  ;;  %v4681_v27 = vpack.c.bf16 %v4209_v23, %v4209_v23 }
0x141a   : > { %v4782_v49 = vsel %vm1437_vm2, %v4684_v45, 0  ;;  %8491 = vmatmul.mubr.msk.bf16.vlgmr.msra.gmra.mrb[124].mxu0 %vm1437_vm2, %v4678_v44 }
0x141b   : > { %8501 = vmatpush3.bf16.xpose.msra.mxu0 %v4782_v49  ;;  %8502 = vmatprep.mubr.msk.bf16.mxu0 %vm9079_vm1, %v9078_v16 }
0x141c   : > { %8512 = vmatprep.subr.bf16.mxu0 %v9078_v16 }
0x141d   : > { %v4336_v54 = vpop.f32.mrb[116].mxu1  ;;  %v4516_v33 = vpop.f32.mrb[116].mxu0 }
0x141e   : > { %v4337_v55 = vadd.f32 %v7526_v50, %v4336_v54  ;;  %v4517_v58 = vadd.f32 %v7541_v51, %v4516_v33  ;;  %v8438_v59 = vpop.f32.mrb[117].mxu1  ;;  %v8462_v60 = vpop.f32.mrb[117].mxu0 }
0x141f   : > { %v4339_v61 = vpop.f32.mrb[118].mxu1  ;;  %v4519_v62 = vpop.f32.mrb[118].mxu0 }
0x1420   : > { %v4683_v0 = vpack.c.bf16 %v4337_v55, %v4337_v55  ;;  %v4918_v1 = vpack.c.bf16 %v4517_v58, %v4517_v58  ;;  %v8439_v56 = vpop.f32.mrb[119].mxu1  ;;  %v8463_v2 = vpop.f32.mrb[119].mxu0 }
0x1422   : > { %v4736_v4 = vsel %vm1437_vm2, %v4683_v0, 0  ;;  %v4926_v57 = vsel %vm1677_vm3, %v4918_v1, 0  ;;  %8503 = vmatmul.mubr.msk.bf16.vlgmr.msra.gmra.mrb[128].mxu0 %vm1437_vm2, %v4680_v63 }
0x1423   : > { %8495 = vmatpush3.bf16.xpose.msra.mxu1 %v4736_v4  ;;  %8513 = vmatpush3.bf16.msra.mxu0 %v4926_v57 }
0x1424   : > { %8506 = vmatprep.subr.bf16.mxu1 %v9078_v16  ;;  %8514 = vmatprep.mubr.msk.bf16.mxu0 %vm9079_vm1, %v9078_v16 }
0x1425   : > { %v4440_v7 = vpop.f32.mrb[120].mxu1  ;;  %v10109_v8 = vpop.f32.mrb[120].mxu0  ;;  %8524 = vmatprep.subr.bf16.mxu0 %v9078_v16 }
0x1426   : > { %v4441_v9 = vadd.f32 %v7528_v5, %v4440_v7  ;;  %v8454_v11 = vpop.f32.mrb[121].mxu1  ;;  %v8478_v12 = vpop.f32.mrb[121].mxu0 }
0x1427   : > { %v4443_v52 = vpop.f32.mrb[122].mxu1  ;;  %v4623_v13 = vpop.f32.mrb[122].mxu0 }
0x1428   : > { %v4685_v15 = vpack.c.bf16 %v4441_v9, %v4441_v9  ;;  %v8455_v17 = vpop.f32.mrb[123].mxu1  ;;  %v8479_v18 = vpop.f32.mrb[123].mxu0 }
0x142a   : > { %v4828_v21 = vsel %vm1437_vm2, %v4685_v15, 0  ;;  %8497 = vmatmul.mubr.msk.bf16.vlgmr.msra.gmra.mrb[132].mxu1 %vm1437_vm2, %v4679_v14 }
0x142b   : > { %8507 = vmatpush3.bf16.xpose.msra.mxu1 %v4828_v21  ;;  %8508 = vmatprep.mubr.msk.bf16.mxu1 %vm9079_vm1, %v9078_v16  ;;  %v7543_v21 = vld [vmem:[%s10639_s11 + $0xa] ss:$0 sm:$0xff] }
0x142c   : > { %8518 = vmatprep.subr.bf16.mxu1 %v9078_v16 }
0x142d   : > { %v4568_v10 = vpop.f32.mrb[124].mxu1 }
0x142e   : > { %v4569_v24 = vadd.f32 %v7542_v22, %v4568_v10  ;;  %v8470_v25 = vpop.f32.mrb[125].mxu1  ;;  %v4621_v22 = vadd.f32 %v7543_v21, %v10109_v8 }
0x142f   : > { %v4571_v26 = vpop.f32.mrb[126].mxu1 }
0x1430   : > { %v4919_v28 = vpack.c.bf16 %v4569_v24, %v4569_v24  ;;  %v8471_v29 = vpop.f32.mrb[127].mxu1  ;;  %v4920_v24 = vpack.c.bf16 %v4621_v22, %v4621_v22 }
0x1432   : > { %v4972_v30 = vsel %vm1677_vm3, %v4919_v28, 0  ;;  %8509 = vmatmul.mubr.msk.bf16.vlgmr.msra.gmra.mrb[136].mxu1 %vm1437_vm2, %v4681_v27  ;;  %v5018_v27 = vsel %vm1677_vm3, %v4920_v24, 0 }
0x1433   : > { %8519 = vmatpush3.bf16.msra.mxu1 %v4972_v30  ;;  %8520 = vmatprep.mubr.msk.bf16.mxu1 %vm9079_vm1, %v9078_v16  ;;  %v7544_v30 = vld [vmem:[%s10639_s11 + $0xb] ss:$0 sm:$0xff] }
0x1434   : > { %8530 = vmatprep.subr.bf16.mxu1 %v9078_v16 }
0x1435   : > { %v10128_v31 = vpop.f32.mrb[128].mxu1 }
0x1436   : > { %v8486_v34 = vpop.f32.mrb[129].mxu1 }
0x1437   : > { %v4675_v35 = vpop.f32.mrb[130].mxu1 }
0x1438   : > { %v8487_v36 = vpop.f32.mrb[131].mxu1  ;;  %v4673_v35 = vadd.f32 %v7544_v30, %v10128_v31 }
0x14ed   : > { %v4726_v37 = vpop.f32.mrb[124].mxu0 }
0x14ee   : > { %v4727_v38 = vadd.f32 %v4726_v37, %v9455_v19  ;;  %v8492_v39 = vpop.f32.mrb[125].mxu0 }
0x14ef   : > { %v4729_v40 = vpop.f32.mrb[126].mxu0 }
0x14f0   : > { %v8493_v41 = vpop.f32.mrb[127].mxu0  ;;  %v4870_v42 = vsel %vm1437_vm2, %v4727_v38, -inf }
0x14f1   : > { %4871 = vmax.xlane.f32.xlu0 %v4870_v42 }
0x14f5   : > { %v4818_v43 = vpop.f32.mrb[128].mxu0 }
0x14f6   : > { %v4819_v44 = vadd.f32 %v4818_v43, %v9455_v19  ;;  %v8504_v45 = vpop.f32.mrb[129].mxu0 }
0x14f7   : > { %v4821_v46 = vpop.f32.mrb[130].mxu0 }
0x14f8   : > { %v8505_v47 = vpop.f32.mrb[131].mxu0  ;;  %v4876_v48 = vsel %vm1437_vm2, %v4819_v44, -inf  ;;  %v7489_v46 = vld [vmem:[%s10640_s12 + $0x24] sm:$0xf] }
0x14f9   : > { %4877 = vmax.xlane.f32.xlu0 %v4876_v48  ;;  %v5160_v47 = vsel %vm1677_vm3, %v7489_v46, 0  ;;  %v7490_v48 = vld [vmem:[%s10640_s12 + $0x28] sm:$0xf] }
0x14fd   : > { %v4772_v49 = vpop.f32.mrb[132].mxu1 }
0x14fe   : > { %v4773_v50 = vadd.f32 %v4772_v49, %v9455_v19  ;;  %v8498_v51 = vpop.f32.mrb[133].mxu1 }
0x14ff   : > { %v4775_v53 = vpop.f32.mrb[134].mxu1 }
0x1500   : > { %v8499_v54 = vpop.f32.mrb[135].mxu1  ;;  %v4873_v33 = vsel %vm1437_vm2, %v4773_v50, -inf  ;;  %v5206_v53 = vsel %vm1677_vm3, %v7490_v48, 0 }
0x1501   : > { %4874 = vmax.xlane.f32.xlu1 %v4873_v33 }
0x1505   : > { %v4864_v55 = vpop.f32.mrb[136].mxu1 }
0x1506   : > { %v4865_v58 = vadd.f32 %v4864_v55, %v9455_v19  ;;  %v8510_v59 = vpop.f32.mrb[137].mxu1 }
0x1507   : > { %v4867_v60 = vpop.f32.mrb[138].mxu1 }
0x1508   : > { %v8511_v61 = vpop.f32.mrb[139].mxu1  ;;  %v4879_v62 = vsel %vm1437_vm2, %v4865_v58, -inf }
0x1509   : > { %4880 = vmax.xlane.f32.xlu1 %v4879_v62  ;;  %v7491_v62 = vld [vmem:[%s10640_s12 + $0x2c] sm:$0xf] }
0x157e   : > { %v4872_v63 = vpop.xlane.xlu0 %4871 }
0x157f   : > { %v4882_v0 = vsub.f32 %v4727_v38, %v4872_v63  ;;  %v4921_v38 = vpack.c.bf16 %v4673_v35, %v4673_v35 }
0x1581   : > { %v4886_v1 = vmul.f32 1.442695, %v4882_v0  ;;  %v5064_v41 = vsel %vm1677_vm3, %v4921_v38, 0 }
0x1583   : > { %8974 = vpow2.f32 %v4886_v1 }
0x1586   : > { %v4878_v56 = vpop.xlane.xlu0 %4877 }
0x1587   : > { %v4884_v2 = vsub.f32 %v4819_v44, %v4878_v56  ;;  %v7488_v44 = vld [vmem:[%s10640_s12 + $0x20] sm:$0xf]  ;;  %v5252_v56 = vsel %vm1677_vm3, %v7491_v62, 0 }
0x1588   : > { %v5114_v45 = vsel %vm1677_vm3, %v7488_v44, 0  ;;  %v8895_v44 = vld [vmem:[%s10642_s14 + $0x28] sm:$0xff]  }
0x1589   : > { %v4890_v3 = vmul.f32 1.442695, %v4884_v2 }
0x158b   : > { %8976 = vpow2.f32 %v4890_v3 }
0x158d   : > { %v8975_v4 = vpop.eup %8974 }
0x158e   : > { %v4875_v57 = vpop.xlane.xlu1 %4874  ;;  %v4894_v5 = vsel %vm1437_vm2, %v8975_v4, 0.0 }
0x158f   : > { %v4883_v6 = vsub.f32 %v4773_v50, %v4875_v57  ;;  %4895 = vadd.xlane.f32.xlu0 %v4894_v5 }
0x1591   : > { %v4888_v7 = vmul.f32 1.442695, %v4883_v6 }
0x1593   : > { %8978 = vpow2.f32 %v4888_v7 }
0x1595   : > { %v8977_v9 = vpop.eup %8976 }
0x1596   : > { %v4881_v11 = vpop.xlane.xlu1 %4880  ;;  %v4900_v12 = vsel %vm1437_vm2, %v8977_v9, 0.0 }
0x1597   : > { %v4885_v52 = vsub.f32 %v4865_v58, %v4881_v11  ;;  %4901 = vadd.xlane.f32.xlu0 %v4900_v12 }
0x1599   : > { %v4892_v13 = vmul.f32 1.442695, %v4885_v52 }
0x159b   : > { %8980 = vpow2.f32 %v4892_v13 }
0x159d   : > { %v8979_v14 = vpop.eup %8978 }
0x159e   : > { %v4897_v15 = vsel %vm1437_vm2, %v8979_v14, 0.0 }
0x159f   : > { %4898 = vadd.xlane.f32.xlu1 %v4897_v15 }
0x15a5   : > { %v8981_v17 = vpop.eup %8980 }
0x15a6   : > { %v4903_v18 = vsel %vm1437_vm2, %v8981_v17, 0.0 }
0x15a7   : > { %4904 = vadd.xlane.f32.xlu1 %v4903_v18 }
0x161c   : > { %v4896_v20 = vpop.xlane.xlu0 %4895 }
0x161d   : > { %8982 = vrcp.f32 %v4896_v20 }
0x1624   : > { %v4902_v23 = vpop.xlane.xlu0 %4901 }
0x1625   : > { %8984 = vrcp.f32 %v4902_v23 }
0x1627   : > { %v8983_v10 = vpop.eup %8982 }
0x1628   : > { %v4910_v25 = vmul.f32 %v8983_v10, %v8975_v4 }
0x162a   : > { %v4914_v26 = vpack.c.bf16 %v4910_v25, %v4910_v25 }
0x162c   : > { %v4899_v28 = vpop.xlane.xlu1 %4898  ;;  %8515 = vmatmul.mubr.msk.bf16.vlgmr.msra.gmra.mrb[132].mxu0 %vm1437_vm2, %v4914_v26 }
0x162d   : > { %8986 = vrcp.f32 %v4899_v28  ;;  %8525 = vmatpush3.bf16.msra.mxu0 %v5018_v27  ;;  %8526 = vmatprep.mubr.msk.bf16.mxu0 %vm9079_vm1, %v9078_v16  ;;  %v7569_v28 = vld [vmem:[%s10641_s13 + $0x2] ss:$0 sm:$0xff] }
0x162e   : > { %8536 = vmatprep.subr.bf16.mxu0 %v9078_v16 }
0x162f   : > { %v8985_v29 = vpop.eup %8984 }
0x1630   : > { %v4912_v8 = vmul.f32 %v8985_v29, %v8977_v9 }
0x1632   : > { %v4916_v34 = vpack.c.bf16 %v4912_v8, %v4912_v8 }
0x1634   : > { %v4905_v36 = vpop.xlane.xlu1 %4904  ;;  %8527 = vmatmul.mubr.msk.bf16.vlgmr.msra.gmra.mrb[136].mxu0 %vm1437_vm2, %v4916_v34 }
0x1635   : > { %8988 = vrcp.f32 %v4905_v36  ;;  %8538 = vmatprep.mubr.msk.bf16.mxu0 %vm9079_vm1, %v9078_v16  ;;  %8537 = vmatpush3.bf16.msra.mxu0 %v5114_v45  ;;  %v8897_v45 = vld [vmem:[%s10644_s16 + $0x48] sm:$0xff]  }
0x1636   : > { %8548 = vmatprep.subr.bf16.mxu0 %v9078_v16 }
0x1637   : > { %v8987_v37 = vpop.eup %8986 }
0x1638   : > { %v4911_v39 = vmul.f32 %v8987_v37, %v8979_v14 }
0x163a   : > { %v4915_v40 = vpack.c.bf16 %v4911_v39, %v4911_v39 }
0x163c   : > { %8521 = vmatmul.mubr.msk.bf16.vlgmr.msra.gmra.mrb[140].mxu1 %vm1437_vm2, %v4915_v40 }
0x163d   : > { %8531 = vmatpush3.bf16.msra.mxu1 %v5064_v41  ;;  %8532 = vmatprep.mubr.msk.bf16.mxu1 %vm9079_vm1, %v9078_v16 }
0x163e   : > { %8542 = vmatprep.subr.bf16.mxu1 %v9078_v16 }
0x163f   : > { %v8989_v31 = vpop.eup %8988 }
0x1640   : > { %v4913_v42 = vmul.f32 %v8989_v31, %v8981_v17 }
0x1642   : > { %v4917_v43 = vpack.c.bf16 %v4913_v42, %v4913_v42 }
0x1644   : > { %8533 = vmatmul.mubr.msk.bf16.vlgmr.msra.gmra.mrb[144].mxu1 %vm1437_vm2, %v4917_v43  ;;  %v8894_v43 = vld [vmem:[%s10642_s14 + $0x20] sm:$0xff]  }
0x1645   : > { %8544 = vmatprep.mubr.msk.bf16.mxu1 %vm9079_vm1, %v9078_v16  ;;  %8543 = vmatpush3.bf16.msra.mxu1 %v5160_v47 }
0x1646   : > { %8554 = vmatprep.subr.bf16.mxu1 %v9078_v16 }
0x16ff   : > { %v4962_v49 = vpop.f32.mrb[132].mxu0 }
0x1700   : > { %v5106_v50 = vpack.c.bf16 %v4962_v49, %v4962_v49  ;;  %v8516_v51 = vpop.f32.mrb[133].mxu0 }
0x1701   : > { %v4965_v54 = vpop.f32.mrb[134].mxu0 }
0x1702   : > { %v8517_v33 = vpop.f32.mrb[135].mxu0  ;;  %8539 = vmatmul.mubr.msk.bf16.vlgmr.msra.gmra.mrb[140].mxu0 %vm1437_vm2, %v5106_v50  ;;  %v7570_v50 = vld [vmem:[%s10632_s4 + $0x2] ss:$0 sm:$0xff] }
0x1703   : > { %8549 = vmatpush3.bf16.msra.mxu0 %v5206_v53  ;;  %8550 = vmatprep.mubr.msk.bf16.mxu0 %vm9079_vm1, %v9078_v16  ;;  %v7571_v53 = vld [vmem:[%s10633_s5 + $0x2] ss:$0 sm:$0xff] }
0x1704   : > { %8560 = vmatprep.subr.bf16.mxu0 %v9078_v16 }
0x1707   : > { %v5054_v55 = vpop.f32.mrb[136].mxu0 }
0x1708   : > { %v5108_v58 = vpack.c.bf16 %v5054_v55, %v5054_v55  ;;  %v8528_v59 = vpop.f32.mrb[137].mxu0 }
0x1709   : > { %v5057_v60 = vpop.f32.mrb[138].mxu0  ;;  %v8899_v59 = vld [vmem:[%s10644_s16 + $0x58] sm:$0xff]  }
0x170a   : > { %v8529_v61 = vpop.f32.mrb[139].mxu0  ;;  %8551 = vmatmul.mubr.msk.bf16.vlgmr.msra.gmra.mrb[144].mxu0 %vm1437_vm2, %v5108_v58  ;;  %v8898_v58 = vld [vmem:[%s10644_s16 + $0x50] sm:$0xff]   ;;  %v7572_v60 = vld [vmem:[%s10643_s15 + $0x2] ss:$0 sm:$0xff] }
0x170b   : > { %8564 = vmatprep.mubr.msk.bf16.mxu0 %vm9079_vm1, %v9078_v16  ;;  %8561 = vmatpush3.bf16.msra.mxu0 %v8894_v43  ;;  %v8915_v43 = vld [vmem:[%s10638_s10 + $0xc8] sm:$0xff]  }
0x170c   : > { %8562 = vmatprep.subr.bf16.mxu0 %v9078_v16 }
0x170f   : > { %v5008_v63 = vpop.f32.mrb[140].mxu1  ;;  %8563 = vmatpush3.bf16.msra.mxu0 %v8895_v44  ;;  %v8916_v44 = vld [vmem:[%s10636_s8 + $0xf0] sm:$0xff]  }
0x1710   : > { %v5107_v0 = vpack.c.bf16 %v5008_v63, %v5008_v63  ;;  %v8522_v1 = vpop.f32.mrb[141].mxu1  ;;  %8580 = vmatprep.subr.bf16.mxu0 %v9078_v16 }
0x1711   : > { %v5011_v2 = vpop.f32.mrb[142].mxu1 }
0x1712   : > { %v8523_v3 = vpop.f32.mrb[143].mxu1  ;;  %8545 = vmatmul.mubr.msk.bf16.vlgmr.msra.gmra.mrb[148].mxu1 %vm1437_vm2, %v5107_v0 }
0x1713   : > { %8555 = vmatpush3.bf16.msra.mxu1 %v5252_v56  ;;  %8556 = vmatprep.mubr.msk.bf16.mxu1 %vm9079_vm1, %v9078_v16  ;;  %v7581_v3 = vld [vmem:[%s10645_s17 + $0x2] ss:$0 sm:$0xff] }
0x1714   : > { %8568 = vmatprep.subr.bf16.mxu1 %v9078_v16 }
0x1717   : > { %v5100_v4 = vpop.f32.mrb[144].mxu1 }
0x1718   : > { %v5109_v57 = vpack.c.bf16 %v5100_v4, %v5100_v4  ;;  %v8534_v5 = vpop.f32.mrb[145].mxu1 }
0x1719   : > { %v5103_v6 = vpop.f32.mrb[146].mxu1 }
0x171a   : > { %v8535_v7 = vpop.f32.mrb[147].mxu1  ;;  %8557 = vmatmul.mubr.msk.bf16.vlgmr.msra.gmra.mrb[152].mxu1 %vm1437_vm2, %v5109_v57 }
0x171b   : > { %8576 = vmatprep.mubr.msk.bf16.mxu1 %vm9079_vm1, %v9078_v16 }
0x17d5   : > { %v5150_v9 = vpop.f32.mrb[140].mxu0 }
0x17d6   : > { %v8540_v11 = vpop.f32.mrb[141].mxu0  ;;  %v5294_v20 = vsel %vm680_vm0, %v5150_v9, 0.0 }
0x17d7   : > { %v5153_v12 = vpop.f32.mrb[142].mxu0 }
0x17d8   : > { %v8541_v52 = vpop.f32.mrb[143].mxu0 }
0x17dd   : > { %v5242_v13 = vpop.f32.mrb[144].mxu0 }
0x17de   : > { %v8552_v14 = vpop.f32.mrb[145].mxu0  ;;  %v5297_v24 = vsel %vm680_vm0, %v5242_v13, 0.0 }
0x17df   : > { %v5245_v15 = vpop.f32.mrb[146].mxu0 }
0x17e0   : > { %v8553_v17 = vpop.f32.mrb[147].mxu0 }
0x17e1   : > { %v8900_v17 = vld [vmem:[%s10634_s6 + $0xc0] sm:$0xff]  }
0x17e5   : > { %v5196_v18 = vpop.f32.mrb[148].mxu1 }
0x17e6   : > { %v5295_v21 = vsel %vm680_vm0, %v5196_v18, 0.0  ;;  %v8546_v22 = vpop.f32.mrb[149].mxu1  ;;  %v8901_v18 = vld [vmem:[%s10634_s6 + $0xe0] sm:$0xff]  }
0x17e7   : > { %v5296_v23 = vadd.f32 %v5295_v21, %v5294_v20  ;;  %v5199_v10 = vpop.f32.mrb[150].mxu1  ;;  %v8902_v20 = vld [vmem:[%s10634_s6 + $0xc8] sm:$0xff]  }
0x17e8   : > { %v8547_v25 = vpop.f32.mrb[151].mxu1  ;;  %v8903_v21 = vld [vmem:[%s10634_s6 + $0xe8] sm:$0xff]  }
0x17e9   : > { %v5298_v26 = vadd.f32 %v5297_v24, %v5296_v23  ;;  %v7665_v25 = vld [vmem:[%s10666_s22 + $0x3] ss:$0 sm:$0xff] }
0x17ed   : > { %v5288_v27 = vpop.f32.mrb[152].mxu1 }
0x17ee   : > { %v5299_v29 = vsel %vm680_vm0, %v5288_v27, 0.0  ;;  %v8558_v8 = vpop.f32.mrb[153].mxu1  ;;  %v7666_v27 = vld [vmem:[%s10667_s3 + $0x3] ss:$0 sm:$0xff]  ;;  %s9020_s3 = scalar_lea.vmem %s9019_s26, 256 }
0x17ef   : > { %v5300_v30 = vadd.f32 %v5299_v29, %v5298_v26  ;;  %v5291_v34 = vpop.f32.mrb[154].mxu1  ;;  %v8904_v8 = vld [vmem:[%s10634_s6 + $0xd0] sm:$0xff]   ;;  %p9022_p1 = scmp.lt.s32.totalorder %s9020_s3, %s9014_s25 }
0x17f0   : > { %v8559_v35 = vpop.f32.mrb[155].mxu1 }
0x17f1   : > { %v5307_v36 = vadd.f32 %v7569_v28, %v5300_v30  ;;  %v8905_v30 = vld [vmem:[%s10636_s8 + $0xc0] sm:$0xff]   ;;  %v8906_v35 = vld [vmem:[%s10634_s6 + $0xd8] sm:$0xff]   ;;  %p9023_p2 = por %p9022_p1, %p9021_p0 }
0x17f3   : > { %v5308_v37 = vadd.f32 %v5307_v36, %v9914_v32  ;;  %v8896_v32 = vld [vmem:[%s10644_s16 + $0x40] sm:$0xff]   ;;  %v8907_v36 = vld [vmem:[%s10636_s8 + $0xc8] sm:$0xff]   ;;  %p9024_p3 = pnand %p9023_p2, %p9017_p13 }
0x17f4   : > { %8569 = vmatpush3.bf16.msra.mxu1 %v8896_v32  ;;  %v8917_v32 = vld [vmem:[%s10638_s10 + $0xe0] sm:$0xff]  }
0x17f5   : > { %v5309_v38 = vsel %vm680_vm0, %v5308_v37, 0.0  ;;  %8570 = vmatprep.subr.bf16.mxu1 %v9078_v16 }
0x17f6   : > { %5310 = vadd.xlane.f32.xlu0 %v5309_v38  ;;  %v8909_v38 = vld [vmem:[%s10636_s8 + $0xe0] sm:$0xff]  }
0x17f8   : > { %8571 = vmatpush3.bf16.msra.mxu1 %v8897_v45  ;;  %v8918_v45 = vld [vmem:[%s10636_s8 + $0xf8] sm:$0xff]  }
0x17f9   : > { %8572 = vmatprep.subr.bf16.mxu1 %v9078_v16 }
0x17fc   : > { %8573 = vmatpush3.bf16.msra.mxu1 %v8898_v58 }
0x17fd   : > { %8574 = vmatprep.subr.bf16.mxu1 %v9078_v16 }
0x1800   : > { %8575 = vmatpush3.bf16.msra.mxu1 %v8899_v59 }
0x1801   : > { %8596 = vmatprep.subr.bf16.mxu1 %v9078_v16 }
0x1883   : > { %v5311_v39 = vpop.xlane.xlu0 %5310 }
0x1884   : > { %v5312_v40 = vmul.f32 0.03125, %v5311_v39  ;;  %v8910_v39 = vld [vmem:[%s10634_s6 + $0xf8] sm:$0xff]  }
0x1886   : > { %v5313_v41 = vsub.f32 %v5308_v37, %v5312_v40  ;;  %v8911_v40 = vld [vmem:[%s10636_s8 + $0xe8] sm:$0xff]  }
0x1888   : > { %v5314_v31 = vmul.f32 %v5313_v41, %v5313_v41 }
0x188a   : > { %v5315_v42 = vsel %vm680_vm0, %v5314_v31, 0.0  ;;  %v8913_v31 = vld [vmem:[%s10638_s10 + $0xc0] sm:$0xff]  }
0x188b   : > { %5316 = vadd.xlane.f32.xlu1 %v5315_v42  ;;  %v8914_v42 = vld [vmem:[%s10636_s8 + $0xd8] sm:$0xff]  }
0x1918   : > { %v5317_v46 = vpop.xlane.xlu1 %5316 }
0x1919   : > { %v5318_v47 = vmul.f32 0.03125, %v5317_v46  ;;  %v8919_v46 = vld [vmem:[%s10638_s10 + $0xe8] sm:$0xff]  }
0x191b   : > { %v5319_v48 = vadd.f32 1e-05, %v5318_v47  ;;  %v8920_v47 = vld [vmem:[%s10638_s10 + $0xd0] sm:$0xff]  }
0x191d   : > { %8990 = vrsqrt.f32 %v5319_v48  ;;  %v8921_v48 = vld [vmem:[%s10638_s10 + $0xd8] sm:$0xff]  }
0x1927   : > { %v8991_v49 = vpop.eup %8990 }
0x1928   : > { %v5321_v51 = vmul.f32 %v8991_v49, %v5313_v41  ;;  %v8912_v41 = vld [vmem:[%s10636_s8 + $0xd0] sm:$0xff]  }
0x1929   : > { %v8922_v49 = vld [vmem:[%s10638_s10 + $0xf0] sm:$0xff]  }
0x192a   : > { %v5328_v54 = vmul.f32 %v7570_v50, %v5321_v51  ;;  %v8923_v50 = vld [vmem:[%s10638_s10 + $0xf8] sm:$0xff]  }
0x192c   : > { %v5335_v33 = vadd.f32 %v7571_v53, %v5328_v54 }
0x192e   : > { %v5336_v55 = vpack.c.bf16 %v5335_v33, %v5335_v33 }
0x1930   : > { %8565 = vmatmul.mubr.msk.bf16.vlgmr.msra.gmra.mrb[148].mxu0 %vm680_vm0, %v5336_v55 }
0x1931   : > { %8584 = vmatprep.mubr.msk.bf16.mxu0 %vm9079_vm1, %v9078_v16  ;;  %8581 = vmatpush3.bf16.msra.mxu0 %v8900_v17 }
0x1932   : > { %8582 = vmatprep.subr.bf16.mxu0 %v9078_v16 }
0x1935   : > { %8583 = vmatpush3.bf16.msra.mxu0 %v8902_v20 }
0x1936   : > { %8588 = vmatprep.subr.bf16.mxu0 %v9078_v16 }
0x1a03   : > { %v5392_v61 = vpop.f32.mrb[148].mxu0 }
0x1a04   : > { %v5393_v62 = vadd.f32 %v7572_v60, %v5392_v61  ;;  %v8566_v63 = vpop.f32.mrb[149].mxu0  ;;  %v7683_v61 = vld [vmem:[%s10637_s9 + $0xc] ss:$0 sm:$0xff] }
0x1a05   : > { %v5395_v0 = vpop.f32.mrb[150].mxu0 }
0x1a06   : > { %v5398_v1 = vmax.f32 %v5393_v62, 0.0  ;;  %v8567_v56 = vpop.f32.mrb[151].mxu0 }
0x1a08   : > { %v5399_v2 = vpack.c.bf16 %v5398_v1, %v5398_v1 }
0x1a0a   : > { %8577 = vmatmul.mubr.msk.bf16.vlgmr.msra.gmra.mrb[156].mxu1 %vm2177_vm5, %v5399_v2 }
0x1a0b   : > { %8600 = vmatprep.mubr.msk.bf16.mxu1 %vm9079_vm1, %v9078_v16  ;;  %8597 = vmatpush3.bf16.msra.mxu1 %v8901_v18 }
0x1a0c   : > { %8598 = vmatprep.subr.bf16.mxu1 %v9078_v16 }
0x1a0f   : > { %8599 = vmatpush3.bf16.msra.mxu1 %v8903_v21 }
0x1a10   : > { %8612 = vmatprep.subr.bf16.mxu1 %v9078_v16 }
0x1add   : > { %v5461_v4 = vpop.f32.mrb[156].mxu1 }
0x1ade   : > { %v5467_v57 = vadd.f32 %v5461_v4, %v5308_v37  ;;  %v8578_v5 = vpop.f32.mrb[157].mxu1  ;;  %v8908_v37 = vld [vmem:[%s10634_s6 + $0xf0] sm:$0xff]  }
0x1adf   : > { %v5464_v6 = vpop.f32.mrb[158].mxu1 }
0x1ae0   : > { %v10250_v7 = vadd.f32 %v7581_v3, %v5467_v57  ;;  %v8579_v9 = vpop.f32.mrb[159].mxu1  ;;  %v7667_v6 = vld [vmem:[%s10635_s7 + $0xc] ss:$0 sm:$0xff] }
0x1ae2   : > { %v5574_v11 = vsel %vm680_vm0, %v10250_v7, 0.0 }
0x1ae3   : > { %5575 = vadd.xlane.f32.xlu0 %v5574_v11  ;;  %v7685_v11 = vld [vmem:[%s10637_s9 + $0xe] ss:$0 sm:$0xff] }
0x1b70   : > { %v5576_v12 = vpop.xlane.xlu0 %5575 }
0x1b71   : > { %v5577_v52 = vmul.f32 0.03125, %v5576_v12 }
0x1b73   : > { %v5578_v13 = vsub.f32 %v10250_v7, %v5577_v52 }
0x1b75   : > { %v5579_v14 = vmul.f32 %v5578_v13, %v5578_v13 }
0x1b77   : > { %v5580_v15 = vsel %vm680_vm0, %v5579_v14, 0.0 }
0x1b78   : > { %5581 = vadd.xlane.f32.xlu1 %v5580_v15 }
0x1c05   : > { %v5582_v22 = vpop.xlane.xlu1 %5581 }
0x1c06   : > { %v5583_v23 = vmul.f32 0.03125, %v5582_v22 }
0x1c08   : > { %v5584_v10 = vadd.f32 1e-05, %v5583_v23 }
0x1c0a   : > { %8992 = vrsqrt.f32 %v5584_v10 }
0x1c14   : > { %v8993_v24 = vpop.eup %8992 }
0x1c15   : > { %v5586_v26 = vmul.f32 %v8993_v24, %v5578_v13  ;;  %v7669_v24 = vld [vmem:[%s10635_s7 + $0xe] ss:$0 sm:$0xff] }
0x1c17   : > { %v5593_v28 = vmul.f32 %v7665_v25, %v5586_v26  ;;  %v7684_v26 = vld [vmem:[%s10637_s9 + $0xd] ss:$0 sm:$0xff] }
0x1c19   : > { %v5600_v29 = vadd.f32 %v7666_v27, %v5593_v28  ;;  %v7699_v27 = vld [vmem:[%s10639_s11 + $0xc] ss:$0 sm:$0xff] }
0x1c1b   : > { %v10284_v34 = vpack.c.bf16 %v5600_v29, %v5600_v29 }
0x1c1d   : > { %8585 = vmatmul.mubr.msk.bf16.vlgmr.msra.gmra.mrb[152].mxu0 %vm680_vm0, %v10284_v34  ;;  %8601 = vmatmul.mubr.msk.bf16.vlgmr.msra.gmra.mrb[160].mxu1 %vm680_vm0, %v10284_v34 }
0x1c1e   : > { %8589 = vmatpush3.bf16.msra.mxu0 %v8904_v8  ;;  %8613 = vmatpush3.bf16.msra.mxu1 %v8905_v30 }
0x1c1f   : > { %8590 = vmatprep.subr.bf16.mxu0 %v9078_v16  ;;  %8614 = vmatprep.subr.bf16.mxu1 %v9078_v16 }
0x1c20   : > { %8592 = vmatprep.mubr.msk.bf16.mxu0 %vm9079_vm1, %v9078_v16  ;;  %8616 = vmatprep.mubr.msk.bf16.mxu1 %vm9079_vm1, %v9078_v16 }
0x1c22   : > { %8591 = vmatpush3.bf16.msra.mxu0 %v8906_v35  ;;  %8615 = vmatpush3.bf16.msra.mxu1 %v8907_v36 }
0x1c23   : > { %8604 = vmatprep.subr.bf16.mxu0 %v9078_v16  ;;  %8628 = vmatprep.subr.bf16.mxu1 %v9078_v16 }
0x1c25   : > { %8593 = vmatmul.mubr.msk.bf16.vlgmr.msra.gmra.mrb[156].mxu0 %vm680_vm0, %v10284_v34  ;;  %8617 = vmatmul.mubr.msk.bf16.vlgmr.msra.gmra.mrb[164].mxu1 %vm680_vm0, %v10284_v34 }
0x1c26   : > { %8605 = vmatpush3.bf16.msra.mxu0 %v8908_v37  ;;  %8629 = vmatpush3.bf16.msra.mxu1 %v8909_v38 }
0x1c27   : > { %8606 = vmatprep.subr.bf16.mxu0 %v9078_v16  ;;  %8630 = vmatprep.subr.bf16.mxu1 %v9078_v16 }
0x1c28   : > { %8608 = vmatprep.mubr.msk.bf16.mxu0 %vm9079_vm1, %v9078_v16  ;;  %8632 = vmatprep.mubr.msk.bf16.mxu1 %vm9079_vm1, %v9078_v16 }
0x1c2a   : > { %8607 = vmatpush3.bf16.msra.mxu0 %v8910_v39  ;;  %8631 = vmatpush3.bf16.msra.mxu1 %v8911_v40 }
0x1c2b   : > { %8620 = vmatprep.subr.bf16.mxu0 %v9078_v16  ;;  %8644 = vmatprep.subr.bf16.mxu1 %v9078_v16 }
0x1c2d   : > { %8609 = vmatmul.mubr.msk.bf16.vlgmr.msra.gmra.mrb[160].mxu0 %vm680_vm0, %v10284_v34  ;;  %8633 = vmatmul.mubr.msk.bf16.vlgmr.msra.gmra.mrb[168].mxu1 %vm680_vm0, %v10284_v34 }
0x1c2e   : > { %8621 = vmatpush3.bf16.msra.mxu0 %v8912_v41  ;;  %8645 = vmatpush3.bf16.msra.mxu1 %v8913_v31 }
0x1c2f   : > { %8622 = vmatprep.subr.bf16.mxu0 %v9078_v16  ;;  %8646 = vmatprep.subr.bf16.mxu1 %v9078_v16 }
0x1c30   : > { %8624 = vmatprep.mubr.msk.bf16.mxu0 %vm9079_vm1, %v9078_v16  ;;  %8648 = vmatprep.mubr.msk.bf16.mxu1 %vm9079_vm1, %v9078_v16 }
0x1c32   : > { %8623 = vmatpush3.bf16.msra.mxu0 %v8914_v42  ;;  %8647 = vmatpush3.bf16.msra.mxu1 %v8915_v43  ;;  %v7668_v43 = vld [vmem:[%s10635_s7 + $0xd] ss:$0 sm:$0xff] }
0x1c33   : > { %8636 = vmatprep.subr.bf16.mxu0 %v9078_v16  ;;  %8660 = vmatprep.subr.bf16.mxu1 %v9078_v16 }
0x1c35   : > { %8625 = vmatmul.mubr.msk.bf16.vlgmr.msra.gmra.mrb[164].mxu0 %vm680_vm0, %v10284_v34  ;;  %8649 = vmatmul.mubr.msk.bf16.vlgmr.msra.gmra.mrb[172].mxu1 %vm680_vm0, %v10284_v34 }
0x1c36   : > { %8637 = vmatpush3.bf16.msra.mxu0 %v8916_v44  ;;  %8661 = vmatpush3.bf16.msra.mxu1 %v8917_v32 }
0x1c37   : > { %8638 = vmatprep.subr.bf16.mxu0 %v9078_v16  ;;  %8662 = vmatprep.subr.bf16.mxu1 %v9078_v16 }
0x1c38   : > { %8640 = vmatprep.mubr.msk.bf16.mxu0 %vm9079_vm1, %v9078_v16  ;;  %8664 = vmatprep.mubr.msk.bf16.mxu1 %vm9079_vm1, %v9078_v16 }
0x1c3a   : > { %8639 = vmatpush3.bf16.msra.mxu0 %v8918_v45  ;;  %8663 = vmatpush3.bf16.msra.mxu1 %v8919_v46  ;;  %v7686_v45 = vld [vmem:[%s10637_s9 + $0xf] ss:$0 sm:$0xff] }
0x1c3b   : > { %8652 = vmatprep.subr.bf16.mxu0 %v9078_v16  ;;  %8676 = vmatprep.subr.bf16.mxu1 %v9078_v16 }
0x1c3d   : > { %8641 = vmatmul.mubr.msk.bf16.vlgmr.msra.gmra.mrb[168].mxu0 %vm680_vm0, %v10284_v34  ;;  %8665 = vmatmul.mubr.msk.bf16.vlgmr.msra.gmra.mrb[176].mxu1 %vm680_vm0, %v10284_v34 }
0x1c3e   : > { %8653 = vmatpush3.bf16.msra.mxu0 %v8920_v47  ;;  %8656 = vmatprep.mubr.msk.bf16.mxu0 %vm9079_vm1, %v9078_v16 }
0x1c3f   : > { %8654 = vmatprep.subr.bf16.mxu0 %v9078_v16  ;;  %8678 = vmatprep.mubr.msk.bf16.mxu1 %vm9079_vm1, %v9078_v16 }
0x1c42   : > { %8655 = vmatpush3.bf16.msra.mxu0 %v8921_v48 }
0x1c43   : > { %8668 = vmatprep.subr.bf16.mxu0 %v9078_v16 }
0x1c45   : > { %8657 = vmatmul.mubr.msk.bf16.vlgmr.msra.gmra.mrb[172].mxu0 %vm680_vm0, %v10284_v34 }
0x1c46   : > { %8669 = vmatpush3.bf16.msra.mxu0 %v8922_v49  ;;  %8672 = vmatprep.mubr.msk.bf16.mxu0 %vm9079_vm1, %v9078_v16 }
0x1c47   : > { %8670 = vmatprep.subr.bf16.mxu0 %v9078_v16 }
0x1c4a   : > { %8671 = vmatpush3.bf16.msra.mxu0 %v8923_v50 }
0x1c4b   : > { %8682 = vmatprep.subr.bf16.mxu0 %v9078_v16 }
0x1c4d   : > { %8673 = vmatmul.mubr.msk.bf16.vlgmr.msra.gmra.mrb[176].mxu0 %vm680_vm0, %v10284_v34 }
0x1c4e   : > { %8684 = vmatprep.mubr.msk.bf16.mxu0 %vm9079_vm1, %v9078_v16 }
0x1cf0   : > { %v5675_v51 = vpop.f32.mrb[152].mxu0  ;;  %v5779_v53 = vpop.f32.mrb[160].mxu1 }
0x1cf1   : > { %v8586_v54 = vpop.f32.mrb[153].mxu0  ;;  %v8602_v33 = vpop.f32.mrb[161].mxu1  ;;  %v5676_v12 = vadd.f32 %v7667_v6, %v5675_v51  ;;  %v5780_v28 = vadd.f32 %v7669_v24, %v5779_v53 }
0x1cf2   : > { %v5678_v55 = vpop.f32.mrb[154].mxu0  ;;  %v5782_v58 = vpop.f32.mrb[162].mxu1 }
0x1cf3   : > { %v8587_v59 = vpop.f32.mrb[155].mxu0  ;;  %v8603_v60 = vpop.f32.mrb[163].mxu1  ;;  %v6301_v21 = vpack.c.bf16 %v5676_v12, %v5676_v12  ;;  %v6303_v39 = vpack.c.bf16 %v5780_v28, %v5780_v28 }
0x1cf4   : > { %v7670_v60 = vld [vmem:[%s10635_s7 + $0xf] ss:$0 sm:$0xff] }
0x1cf8   : > { %v5727_v62 = vpop.f32.mrb[156].mxu0  ;;  %v5907_v63 = vpop.f32.mrb[164].mxu1 }
0x1cf9   : > { %v5908_v0 = vadd.f32 %v7683_v61, %v5907_v63  ;;  %v8594_v1 = vpop.f32.mrb[157].mxu0  ;;  %v8618_v56 = vpop.f32.mrb[165].mxu1  ;;  %v5728_v46 = vadd.f32 %v7668_v43, %v5727_v62  ;;  %v7700_v62 = vld [vmem:[%s10639_s11 + $0xd] ss:$0 sm:$0xff] }
0x1cfa   : > { %v5730_v2 = vpop.f32.mrb[158].mxu0  ;;  %v5910_v3 = vpop.f32.mrb[166].mxu1 }
0x1cfb   : > { %v6305_v4 = vpack.c.bf16 %v5908_v0, %v5908_v0  ;;  %v8595_v57 = vpop.f32.mrb[159].mxu0  ;;  %v8619_v5 = vpop.f32.mrb[167].mxu1  ;;  %v6302_v33 = vpack.c.bf16 %v5728_v46, %v5728_v46 }
0x1cfd   : > { %v6313_v9 = vsel %vm1437_vm2, %v6305_v4, 0 }
0x1cfe   : > { %8677 = vmatpush3.bf16.xpose.msra.mxu1 %v6313_v9 }
0x1cff   : > { %8688 = vmatprep.subr.bf16.mxu1 %v9078_v16 }
0x1d00   : > { %v5831_v52 = vpop.f32.mrb[160].mxu0  ;;  %v6011_v13 = vpop.f32.mrb[168].mxu1 }
0x1d01   : > { %v6012_v14 = vadd.f32 %v7685_v11, %v6011_v13  ;;  %v8610_v15 = vpop.f32.mrb[161].mxu0  ;;  %v8634_v17 = vpop.f32.mrb[169].mxu1  ;;  %v5832_v63 = vadd.f32 %v7670_v60, %v5831_v52  ;;  %v7701_v60 = vld [vmem:[%s10639_s11 + $0xe] ss:$0 sm:$0xff] }
0x1d02   : > { %v5834_v18 = vpop.f32.mrb[162].mxu0  ;;  %v6014_v20 = vpop.f32.mrb[170].mxu1 }
0x1d03   : > { %v6307_v22 = vpack.c.bf16 %v6012_v14, %v6012_v14  ;;  %v8611_v23 = vpop.f32.mrb[163].mxu0  ;;  %v8635_v10 = vpop.f32.mrb[171].mxu1  ;;  %v6304_v3 = vpack.c.bf16 %v5832_v63, %v5832_v63 }
0x1d05   : > { %v6405_v25 = vsel %vm1437_vm2, %v6307_v22, 0  ;;  %8679 = vmatmul.mubr.msk.bf16.vlgmr.msra.gmra.mrb[180].mxu1 %vm1437_vm2, %v6301_v21 }
0x1d06   : > { %8689 = vmatpush3.bf16.xpose.msra.mxu1 %v6405_v25  ;;  %8690 = vmatprep.mubr.msk.bf16.mxu1 %vm9079_vm1, %v9078_v16 }
0x1d07   : > { %8700 = vmatprep.subr.bf16.mxu1 %v9078_v16 }
0x1d08   : > { %v5959_v29 = vpop.f32.mrb[164].mxu0  ;;  %v6139_v8 = vpop.f32.mrb[172].mxu1 }
0x1d09   : > { %v5960_v30 = vadd.f32 %v7684_v26, %v5959_v29  ;;  %v6140_v34 = vadd.f32 %v7699_v27, %v6139_v8  ;;  %v8626_v35 = vpop.f32.mrb[165].mxu0  ;;  %v8650_v36 = vpop.f32.mrb[173].mxu1 }
0x1d0a   : > { %v5962_v37 = vpop.f32.mrb[166].mxu0  ;;  %v6142_v38 = vpop.f32.mrb[174].mxu1 }
0x1d0b   : > { %v6306_v40 = vpack.c.bf16 %v5960_v30, %v5960_v30  ;;  %v6541_v41 = vpack.c.bf16 %v6140_v34, %v6140_v34  ;;  %v8627_v31 = vpop.f32.mrb[167].mxu0  ;;  %v8651_v42 = vpop.f32.mrb[175].mxu1 }
0x1d0d   : > { %v6359_v44 = vsel %vm1437_vm2, %v6306_v40, 0  ;;  %v6549_v32 = vsel %vm1677_vm3, %v6541_v41, 0  ;;  %8691 = vmatmul.mubr.msk.bf16.vlgmr.msra.gmra.mrb[184].mxu1 %vm1437_vm2, %v6303_v39 }
0x1d0e   : > { %8683 = vmatpush3.bf16.xpose.msra.mxu0 %v6359_v44  ;;  %8701 = vmatpush3.bf16.msra.mxu1 %v6549_v32 }
0x1d0f   : > { %8694 = vmatprep.subr.bf16.mxu0 %v9078_v16  ;;  %8702 = vmatprep.mubr.msk.bf16.mxu1 %vm9079_vm1, %v9078_v16 }
0x1d10   : > { %v6063_v47 = vpop.f32.mrb[168].mxu0  ;;  %v10445_v48 = vpop.f32.mrb[176].mxu1  ;;  %8712 = vmatprep.subr.bf16.mxu1 %v9078_v16 }
0x1d11   : > { %v6064_v49 = vadd.f32 %v7686_v45, %v6063_v47  ;;  %v8642_v50 = vpop.f32.mrb[169].mxu0  ;;  %v8666_v51 = vpop.f32.mrb[177].mxu1 }
0x1d12   : > { %v6066_v53 = vpop.f32.mrb[170].mxu0  ;;  %v6246_v54 = vpop.f32.mrb[178].mxu1 }
0x1d13   : > { %v6308_v55 = vpack.c.bf16 %v6064_v49, %v6064_v49  ;;  %v8643_v58 = vpop.f32.mrb[171].mxu0  ;;  %v8667_v59 = vpop.f32.mrb[179].mxu1 }
0x1d15   : > { %v6451_v61 = vsel %vm1437_vm2, %v6308_v55, 0  ;;  %8685 = vmatmul.mubr.msk.bf16.vlgmr.msra.gmra.mrb[180].mxu0 %vm1437_vm2, %v6302_v33 }
0x1d16   : > { %8695 = vmatpush3.bf16.xpose.msra.mxu0 %v6451_v61  ;;  %8696 = vmatprep.mubr.msk.bf16.mxu0 %vm9079_vm1, %v9078_v16  ;;  %v6244_v61 = vadd.f32 %v7701_v60, %v10445_v48 }
0x1d17   : > { %8706 = vmatprep.subr.bf16.mxu0 %v9078_v16 }
0x1d18   : > { %v6191_v0 = vpop.f32.mrb[172].mxu0 }
0x1d19   : > { %v6192_v1 = vadd.f32 %v7700_v62, %v6191_v0  ;;  %v8658_v56 = vpop.f32.mrb[173].mxu0  ;;  %v6543_v0 = vpack.c.bf16 %v6244_v61, %v6244_v61 }
0x1d1a   : > { %v6194_v2 = vpop.f32.mrb[174].mxu0 }
0x1d1b   : > { %v6542_v4 = vpack.c.bf16 %v6192_v1, %v6192_v1  ;;  %v8659_v57 = vpop.f32.mrb[175].mxu0  ;;  %v6641_v2 = vsel %vm1677_vm3, %v6543_v0, 0 }
0x1d1c   : > { %v7702_v57 = vld [vmem:[%s10639_s11 + $0xf] ss:$0 sm:$0xff] }
0x1d1d   : > { %v6595_v5 = vsel %vm1677_vm3, %v6542_v4, 0  ;;  %8697 = vmatmul.mubr.msk.bf16.vlgmr.msra.gmra.mrb[184].mxu0 %vm1437_vm2, %v6304_v3 }
0x1d1e   : > { %8707 = vmatpush3.bf16.msra.mxu0 %v6595_v5  ;;  %8708 = vmatprep.mubr.msk.bf16.mxu0 %vm9079_vm1, %v9078_v16 }
0x1d1f   : > { %8718 = vmatprep.subr.bf16.mxu0 %v9078_v16 }
0x1d20   : > { %v10464_v6 = vpop.f32.mrb[176].mxu0 }
0x1d21   : > { %v8674_v9 = vpop.f32.mrb[177].mxu0 }
0x1d22   : > { %v6298_v11 = vpop.f32.mrb[178].mxu0  ;;  %v6296_v9 = vadd.f32 %v7702_v57, %v10464_v6 }
0x1d23   : > { %v8675_v12 = vpop.f32.mrb[179].mxu0 }
0x1dd8   : > { %v6349_v52 = vpop.f32.mrb[180].mxu1 }
0x1dd9   : > { %v6350_v13 = vadd.f32 %v6349_v52, %v9455_v19  ;;  %v8680_v14 = vpop.f32.mrb[181].mxu1  ;;  %v6544_v52 = vpack.c.bf16 %v6296_v9, %v6296_v9 }
0x1dda   : > { %v6352_v15 = vpop.f32.mrb[182].mxu1 }
0x1ddb   : > { %v8681_v17 = vpop.f32.mrb[183].mxu1  ;;  %v6493_v18 = vsel %vm1437_vm2, %v6350_v13, -inf  ;;  %v6687_v15 = vsel %vm1677_vm3, %v6544_v52, 0 }
0x1ddc   : > { %6494 = vmax.xlane.f32.xlu0 %v6493_v18 }
0x1de0   : > { %v6441_v20 = vpop.f32.mrb[184].mxu1 }
0x1de1   : > { %v6442_v21 = vadd.f32 %v6441_v20, %v9455_v19  ;;  %v8692_v22 = vpop.f32.mrb[185].mxu1  ;;  %v7646_v20 = vld [vmem:[%s10640_s12 + $0x30] sm:$0xf] }
0x1de2   : > { %v6444_v23 = vpop.f32.mrb[186].mxu1  ;;  %v7647_v22 = vld [vmem:[%s10640_s12 + $0x34] sm:$0xf] }
0x1de3   : > { %v8693_v10 = vpop.f32.mrb[187].mxu1  ;;  %v6499_v24 = vsel %vm1437_vm2, %v6442_v21, -inf  ;;  %v6783_v23 = vsel %vm1677_vm3, %v7647_v22, 0 }
0x1de4   : > { %6500 = vmax.xlane.f32.xlu0 %v6499_v24  ;;  %v7648_v10 = vld [vmem:[%s10640_s12 + $0x38] sm:$0xf] }
0x1de8   : > { %v6395_v25 = vpop.f32.mrb[180].mxu0 }
0x1de9   : > { %v6396_v26 = vadd.f32 %v6395_v25, %v9455_v19  ;;  %v8686_v27 = vpop.f32.mrb[181].mxu0 }
0x1dea   : > { %v6398_v28 = vpop.f32.mrb[182].mxu0  ;;  %v6829_v27 = vsel %vm1677_vm3, %v7648_v10, 0 }
0x1deb   : > { %v8687_v29 = vpop.f32.mrb[183].mxu0  ;;  %v6496_v8 = vsel %vm1437_vm2, %v6396_v26, -inf }
0x1dec   : > { %6497 = vmax.xlane.f32.xlu1 %v6496_v8 }
0x1df0   : > { %v6487_v30 = vpop.f32.mrb[184].mxu0 }
0x1df1   : > { %v6488_v34 = vadd.f32 %v6487_v30, %v9455_v19  ;;  %v8698_v35 = vpop.f32.mrb[185].mxu0 }
0x1df2   : > { %v6490_v36 = vpop.f32.mrb[186].mxu0 }
0x1df3   : > { %v8699_v37 = vpop.f32.mrb[187].mxu0  ;;  %v6502_v38 = vsel %vm1437_vm2, %v6488_v34, -inf }
0x1df4   : > { %6503 = vmax.xlane.f32.xlu1 %v6502_v38  ;;  %v7649_v37 = vld [vmem:[%s10640_s12 + $0x3c] sm:$0xf] }
0x1e69   : > { %v6495_v39 = vpop.xlane.xlu0 %6494 }
0x1e6a   : > { %v6505_v40 = vsub.f32 %v6350_v13, %v6495_v39 }
0x1e6c   : > { %v6509_v41 = vmul.f32 1.442695, %v6505_v40 }
0x1e6e   : > { %8994 = vpow2.f32 %v6509_v41  ;;  %v6875_v41 = vsel %vm1677_vm3, %v7649_v37, 0 }
0x1e71   : > { %v6501_v31 = vpop.xlane.xlu0 %6500 }
0x1e72   : > { %v6507_v42 = vsub.f32 %v6442_v21, %v6501_v31  ;;  %v6737_v21 = vsel %vm1677_vm3, %v7646_v20, 0  ;;  %v8927_v20 = vld [vmem:[%s10644_s16 + $0x68] sm:$0xff]  }
0x1e74   : > { %v6513_v43 = vmul.f32 1.442695, %v6507_v42 }
0x1e76   : > { %8996 = vpow2.f32 %v6513_v43 }
0x1e78   : > { %v8995_v44 = vpop.eup %8994 }
0x1e79   : > { %v6498_v32 = vpop.xlane.xlu1 %6497  ;;  %v6517_v45 = vsel %vm1437_vm2, %v8995_v44, 0.0 }
0x1e7a   : > { %v6506_v46 = vsub.f32 %v6396_v26, %v6498_v32  ;;  %6518 = vadd.xlane.f32.xlu0 %v6517_v45 }
0x1e7c   : > { %v6511_v19 = vmul.f32 1.442695, %v6506_v46 }
0x1e7e   : > { %8998 = vpow2.f32 %v6511_v19 }
0x1e80   : > { %v8997_v47 = vpop.eup %8996 }
0x1e81   : > { %v6504_v49 = vpop.xlane.xlu1 %6503  ;;  %v6523_v50 = vsel %vm1437_vm2, %v8997_v47, 0.0 }
0x1e82   : > { %v6508_v51 = vsub.f32 %v6488_v34, %v6504_v49  ;;  %6524 = vadd.xlane.f32.xlu0 %v6523_v50 }
0x1e84   : > { %v6515_v53 = vmul.f32 1.442695, %v6508_v51 }
0x1e86   : > { %9000 = vpow2.f32 %v6515_v53 }
0x1e88   : > { %v8999_v54 = vpop.eup %8998 }
0x1e89   : > { %v6520_v33 = vsel %vm1437_vm2, %v8999_v54, 0.0 }
0x1e8a   : > { %6521 = vadd.xlane.f32.xlu1 %v6520_v33 }
0x1e90   : > { %v9001_v55 = vpop.eup %9000 }
0x1e91   : > { %v6526_v58 = vsel %vm1437_vm2, %v9001_v55, 0.0 }
0x1e92   : > { %6527 = vadd.xlane.f32.xlu1 %v6526_v58 }
0x1f07   : > { %v6519_v59 = vpop.xlane.xlu0 %6518 }
0x1f08   : > { %9002 = vrcp.f32 %v6519_v59 }
0x1f0f   : > { %v6525_v62 = vpop.xlane.xlu0 %6524 }
0x1f10   : > { %9004 = vrcp.f32 %v6525_v62 }
0x1f12   : > { %v9003_v63 = vpop.eup %9002 }
0x1f13   : > { %v6533_v1 = vmul.f32 %v9003_v63, %v8995_v44 }
0x1f15   : > { %v6537_v56 = vpack.c.bf16 %v6533_v1, %v6533_v1 }
0x1f17   : > { %8703 = vmatmul.mubr.msk.bf16.vlgmr.msra.gmra.mrb[188].mxu1 %vm1437_vm2, %v6537_v56  ;;  %v6522_v3 = vpop.xlane.xlu1 %6521 }
0x1f18   : > { %8713 = vmatpush3.bf16.msra.mxu1 %v6641_v2  ;;  %9006 = vrcp.f32 %v6522_v3  ;;  %8714 = vmatprep.mubr.msk.bf16.mxu1 %vm9079_vm1, %v9078_v16  ;;  %v7727_v2 = vld [vmem:[%s10641_s13 + $0x3] ss:$0 sm:$0xff] }
0x1f19   : > { %8724 = vmatprep.subr.bf16.mxu1 %v9078_v16 }
0x1f1a   : > { %v9005_v4 = vpop.eup %9004 }
0x1f1b   : > { %v6535_v48 = vmul.f32 %v9005_v4, %v8997_v47 }
0x1f1d   : > { %v6539_v5 = vpack.c.bf16 %v6535_v48, %v6535_v48 }
0x1f1f   : > { %8715 = vmatmul.mubr.msk.bf16.vlgmr.msra.gmra.mrb[192].mxu1 %vm1437_vm2, %v6539_v5  ;;  %v6528_v11 = vpop.xlane.xlu1 %6527 }
0x1f20   : > { %9008 = vrcp.f32 %v6528_v11  ;;  %8726 = vmatprep.mubr.msk.bf16.mxu1 %vm9079_vm1, %v9078_v16  ;;  %8725 = vmatpush3.bf16.msra.mxu1 %v6737_v21 }
0x1f21   : > { %8736 = vmatprep.subr.bf16.mxu1 %v9078_v16 }
0x1f22   : > { %v9007_v12 = vpop.eup %9006 }
0x1f23   : > { %v6534_v13 = vmul.f32 %v9007_v12, %v8999_v54 }
0x1f25   : > { %v6538_v14 = vpack.c.bf16 %v6534_v13, %v6534_v13 }
0x1f27   : > { %8709 = vmatmul.mubr.msk.bf16.vlgmr.msra.gmra.mrb[188].mxu0 %vm1437_vm2, %v6538_v14 }
0x1f28   : > { %8719 = vmatpush3.bf16.msra.mxu0 %v6687_v15  ;;  %8720 = vmatprep.mubr.msk.bf16.mxu0 %vm9079_vm1, %v9078_v16 }
0x1f29   : > { %8730 = vmatprep.subr.bf16.mxu0 %v9078_v16 }
0x1f2a   : > { %v9009_v6 = vpop.eup %9008 }
0x1f2b   : > { %v6536_v17 = vmul.f32 %v9009_v6, %v9001_v55 }
0x1f2d   : > { %v6540_v18 = vpack.c.bf16 %v6536_v17, %v6536_v17  ;;  %v8924_v17 = vld [vmem:[%s10642_s14 + $0x30] sm:$0xff]  }
0x1f2f   : > { %8721 = vmatmul.mubr.msk.bf16.vlgmr.msra.gmra.mrb[192].mxu0 %vm1437_vm2, %v6540_v18  ;;  %v8925_v18 = vld [vmem:[%s10642_s14 + $0x38] sm:$0xff]  }
0x1f30   : > { %8732 = vmatprep.mubr.msk.bf16.mxu0 %vm9079_vm1, %v9078_v16  ;;  %8731 = vmatpush3.bf16.msra.mxu0 %v6783_v23 }
0x1f31   : > { %8742 = vmatprep.subr.bf16.mxu0 %v9078_v16 }
0x1fea   : > { %v6585_v24 = vpop.f32.mrb[188].mxu1 }
0x1feb   : > { %v6729_v25 = vpack.c.bf16 %v6585_v24, %v6585_v24  ;;  %v8704_v26 = vpop.f32.mrb[189].mxu1  ;;  %v7728_v24 = vld [vmem:[%s10632_s4 + $0x3] ss:$0 sm:$0xff] }
0x1fec   : > { %v6588_v28 = vpop.f32.mrb[190].mxu1  ;;  %v7729_v26 = vld [vmem:[%s10633_s5 + $0x3] ss:$0 sm:$0xff] }
0x1fed   : > { %v8705_v29 = vpop.f32.mrb[191].mxu1  ;;  %8727 = vmatmul.mubr.msk.bf16.vlgmr.msra.gmra.mrb[196].mxu1 %vm1437_vm2, %v6729_v25 }
0x1fee   : > { %8737 = vmatpush3.bf16.msra.mxu1 %v6829_v27  ;;  %8738 = vmatprep.mubr.msk.bf16.mxu1 %vm9079_vm1, %v9078_v16 }
0x1fef   : > { %8748 = vmatprep.subr.bf16.mxu1 %v9078_v16 }
0x1ff2   : > { %v6677_v8 = vpop.f32.mrb[192].mxu1 }
0x1ff3   : > { %v6731_v30 = vpack.c.bf16 %v6677_v8, %v6677_v8  ;;  %v8716_v34 = vpop.f32.mrb[193].mxu1  ;;  %v8928_v8 = vld [vmem:[%s10644_s16 + $0x70] sm:$0xff]  }
0x1ff4   : > { %v6680_v35 = vpop.f32.mrb[194].mxu1  ;;  %v7730_v34 = vld [vmem:[%s10643_s15 + $0x3] ss:$0 sm:$0xff] }
0x1ff5   : > { %v8717_v36 = vpop.f32.mrb[195].mxu1  ;;  %8739 = vmatmul.mubr.msk.bf16.vlgmr.msra.gmra.mrb[200].mxu1 %vm1437_vm2, %v6731_v30  ;;  %v8929_v30 = vld [vmem:[%s10644_s16 + $0x78] sm:$0xff]  }
0x1ff6   : > { %8752 = vmatprep.mubr.msk.bf16.mxu1 %vm9079_vm1, %v9078_v16  ;;  %8749 = vmatpush3.bf16.msra.mxu1 %v8924_v17 }
0x1ff7   : > { %8750 = vmatprep.subr.bf16.mxu1 %v9078_v16 }
0x1ffa   : > { %v6631_v38 = vpop.f32.mrb[188].mxu0  ;;  %8751 = vmatpush3.bf16.msra.mxu1 %v8925_v18 }
0x1ffb   : > { %v6730_v39 = vpack.c.bf16 %v6631_v38, %v6631_v38  ;;  %v8710_v40 = vpop.f32.mrb[189].mxu0 }
0x1ffc   : > { %v6634_v31 = vpop.f32.mrb[190].mxu0 }
0x1ffd   : > { %v8711_v42 = vpop.f32.mrb[191].mxu0  ;;  %8733 = vmatmul.mubr.msk.bf16.vlgmr.msra.gmra.mrb[196].mxu0 %vm1437_vm2, %v6730_v39 }
0x1ffe   : > { %8743 = vmatpush3.bf16.msra.mxu0 %v6875_v41  ;;  %8744 = vmatprep.mubr.msk.bf16.mxu0 %vm9079_vm1, %v9078_v16 }
0x1fff   : > { %8756 = vmatprep.subr.bf16.mxu0 %v9078_v16 }
0x2002   : > { %v6723_v43 = vpop.f32.mrb[192].mxu0 }
0x2003   : > { %v6732_v44 = vpack.c.bf16 %v6723_v43, %v6723_v43  ;;  %v8722_v32 = vpop.f32.mrb[193].mxu0 }
0x2004   : > { %v6726_v45 = vpop.f32.mrb[194].mxu0 }
0x2005   : > { %v8723_v46 = vpop.f32.mrb[195].mxu0  ;;  %8745 = vmatmul.mubr.msk.bf16.vlgmr.msra.gmra.mrb[200].mxu0 %vm1437_vm2, %v6732_v44 }
0x2006   : > { %8764 = vmatprep.mubr.msk.bf16.mxu0 %vm9079_vm1, %v9078_v16 }
0x20c0   : > { %v6773_v19 = vpop.f32.mrb[196].mxu1 }
0x20c1   : > { %v8728_v47 = vpop.f32.mrb[197].mxu1  ;;  %v6917_v58 = vsel %vm680_vm0, %v6773_v19, 0.0 }
0x20c2   : > { %v6776_v49 = vpop.f32.mrb[198].mxu1 }
0x20c3   : > { %v8729_v50 = vpop.f32.mrb[199].mxu1 }
0x20c8   : > { %v6865_v51 = vpop.f32.mrb[200].mxu1 }
0x20c9   : > { %v8740_v53 = vpop.f32.mrb[201].mxu1  ;;  %v6920_v63 = vsel %vm680_vm0, %v6865_v51, 0.0 }
0x20ca   : > { %v6868_v54 = vpop.f32.mrb[202].mxu1 }
0x20cb   : > { %v8741_v33 = vpop.f32.mrb[203].mxu1 }
0x20d0   : > { %v6819_v55 = vpop.f32.mrb[196].mxu0 }
0x20d1   : > { %v6918_v59 = vsel %vm680_vm0, %v6819_v55, 0.0  ;;  %v8734_v60 = vpop.f32.mrb[197].mxu0 }
0x20d2   : > { %v6919_v61 = vadd.f32 %v6918_v59, %v6917_v58  ;;  %v6822_v62 = vpop.f32.mrb[198].mxu0 }
0x20d3   : > { %v8735_v0 = vpop.f32.mrb[199].mxu0 }
0x20d4   : > { %v6921_v1 = vadd.f32 %v6920_v63, %v6919_v61 }
0x20d8   : > { %v6911_v56 = vpop.f32.mrb[200].mxu0 }
0x20d9   : > { %v6922_v3 = vsel %vm680_vm0, %v6911_v56, 0.0  ;;  %v8746_v4 = vpop.f32.mrb[201].mxu0 }
0x20da   : > { %v6923_v48 = vadd.f32 %v6922_v3, %v6921_v1  ;;  %v6914_v57 = vpop.f32.mrb[202].mxu0 }
0x20db   : > { %v8747_v5 = vpop.f32.mrb[203].mxu0 }
0x20dc   : > { %v6930_v9 = vadd.f32 %v7727_v2, %v6923_v48 }
0x20de   : > { %v6931_v11 = vadd.f32 %v6930_v9, %v10250_v7  ;;  %v8926_v7 = vld [vmem:[%s10644_s16 + $0x60] sm:$0xff]  }
0x20df   : > { %8757 = vmatpush3.bf16.msra.mxu0 %v8926_v7 }
0x20e0   : > { %v6932_v12 = vsel %vm680_vm0, %v6931_v11, 0.0  ;;  %8758 = vmatprep.subr.bf16.mxu0 %v9078_v16 }
0x20e1   : > { %6933 = vadd.xlane.f32.xlu0 %v6932_v12 }
0x20e3   : > { %8759 = vmatpush3.bf16.msra.mxu0 %v8927_v20 }
0x20e4   : > { %8760 = vmatprep.subr.bf16.mxu0 %v9078_v16 }
0x20e7   : > { %8761 = vmatpush3.bf16.msra.mxu0 %v8928_v8 }
0x20e8   : > { %8762 = vmatprep.subr.bf16.mxu0 %v9078_v16  ;;  %v7739_v16 = vld [vmem:[%s10645_s17 + $0x3] ss:$0 sm:$0xff] }
0x20eb   : > { %8763 = vmatpush3.bf16.msra.mxu0 %v8929_v30 }
0x216e   : > { %v6934_v52 = vpop.xlane.xlu0 %6933 }
0x216f   : > { %v6935_v13 = vmul.f32 0.03125, %v6934_v52 }
0x2171   : > { %v6936_v14 = vsub.f32 %v6931_v11, %v6935_v13 }
0x2173   : > { %v6937_v15 = vmul.f32 %v6936_v14, %v6936_v14 }
0x2175   : > { %v6938_v6 = vsel %vm680_vm0, %v6937_v15, 0.0 }
0x2176   : > { %6939 = vadd.xlane.f32.xlu1 %v6938_v6 }
0x2203   : > { %v6940_v21 = vpop.xlane.xlu1 %6939 }
0x2204   : > { %v6941_v22 = vmul.f32 0.03125, %v6940_v21 }
0x2206   : > { %v6942_v23 = vadd.f32 1e-05, %v6941_v22 }
0x2208   : > { %9010 = vrsqrt.f32 %v6942_v23 }
0x2212   : > { %v9011_v10 = vpop.eup %9010 }
0x2213   : > { %v6944_v25 = vmul.f32 %v9011_v10, %v6936_v14 }
0x2215   : > { %v6951_v27 = vmul.f32 %v7728_v24, %v6944_v25 }
0x2217   : > { %v6958_v28 = vadd.f32 %v7729_v26, %v6951_v27 }
0x2219   : > { %v6959_v29 = vpack.c.bf16 %v6958_v28, %v6958_v28 }
0x221b   : > { %8753 = vmatmul.mubr.msk.bf16.vlgmr.msra.gmra.mrb[204].mxu1 %vm680_vm0, %v6959_v29 }
0x22ee   : > { %v7015_v35 = vpop.f32.mrb[204].mxu1 }
0x22ef   : > { %v7016_v36 = vadd.f32 %v7730_v34, %v7015_v35  ;;  %v8754_v37 = vpop.f32.mrb[205].mxu1 }
0x22f0   : > { %v7018_v38 = vpop.f32.mrb[206].mxu1 }
0x22f1   : > { %v7021_v39 = vmax.f32 %v7016_v36, 0.0  ;;  %v8755_v40 = vpop.f32.mrb[207].mxu1 }
0x22f3   : > { %v7022_v41 = vpack.c.bf16 %v7021_v39, %v7021_v39 }
0x22f5   : > { %8765 = vmatmul.mubr.msk.bf16.vlgmr.msra.gmra.mrb[204].mxu0 %vm2177_vm5, %v7022_v41 }
0x23c8   : > { %v7084_v31 = vpop.f32.mrb[204].mxu0 }
0x23c9   : > { %v7090_v42 = vadd.f32 %v7084_v31, %v6931_v11  ;;  %v8766_v43 = vpop.f32.mrb[205].mxu0 }
0x23ca   : > { %v7087_v44 = vpop.f32.mrb[206].mxu0 }
0x23cb   : > { %v7097_v32 = vadd.f32 %v7739_v16, %v7090_v42  ;;  %v8767_v45 = vpop.f32.mrb[207].mxu0 }
0x23cd   : > { %7098 = vst.msk [vmem:[%s579_s20] sm:$0xff] %vm680_vm0, %v7097_v32 }
0x23ce   : > { %9027 = shalt.err (!%p9024_p3)
}
0x23cf   : > { %s9028_s24 = scalar_lea.hbm %s10585_s1, 128  ;;  %s9032_s21 = scalar_lea.hbm %s10646_s18, 256 }
0x23d0   : > { %p9029_p4 = scmp.ne.s32.totalorder %s10585_s1, %s9028_s24  ;;  %p9033_p9 = scmp.lt.u32.totalorder %s10585_s1, %s10646_s18 }
0x23d1   : > { %p9034_p10 = scmp.lt.u32.totalorder %s9032_s21, %s9028_s24  ;;  %p9036_p12 = scmp.lt.u32.totalorder %s9028_s24, %s10585_s1 }
0x23d2   : > { %p9030_p7 = pnand %p9029_p4, %p9215_p5 }
0x23d3   : > { %p9035_p11 = por %p9034_p10, %p9033_p9 }
0x23d4   : > { %p9031_p8 = pneg %p9030_p7 }
0x23d5   : > { %p9037_p13 = por %p9036_p12, %p9035_p11 }
0x23d7   : > { %p9038_p0 = pnand %p9037_p13, %p9031_p8 }
0x23d9   : > { %9041 = shalt.err (!%p9038_p0)
}
0x23da   : > { %8768 = dma.vmem_to_hbm [thread:$0]  (%p9215_p5), %s10587_s23, 128, %s10585_s1, %s7100_s0  }
0x23db PF: > { %s10668_s3 = sld [smem:[#allocation5_spill]]  ;;  %p8774_p1 = scmp.ge.s32.totalorder %s9076_s30, 2 }
0x23dd   : > { %p8771_p2 = pnand %p8774_p1, %p9219_p6 }
0x23e1   : > { %s7125_s26 = sand.u32 1, %s10668_s3  }
0x23e2   : > { %s7126_s19 = scalar_lea.sflag [#allocation3], %s7125_s26 }
0x23e3   : > { %9059 = dma.done.wait (!%p8771_p2), %s7126_s19, 128  }
0x23e4   : > { %9061 = vsyncadd (!%p8771_p2), %s7126_s19, 4294967168  ;;  %s10670_s30 = sld [smem:[#allocation7_spill]]  ;;  %s10671_s24 = sld [smem:[#allocation6_spill]] }
0x23e5   : > { %s10672_s29 = sld [smem:[#allocation8_spill]]  ;;  %s10673_s27 = smov %s9068_s28 }
0x23ea   : > { %p28_p3 = scmp.ge.s32.totalorder %s10670_s30, 4   ;;  %s10674_s28 = smov %s10671_s24 }
0x23ec   :  { %30 = sbr.rel (!%p28_p3) target bundleno = 8 (0x8), region = 178 }
0x23f3   :  { %7131 = vsyncpa [#allocation3], 1 }
0x23f4   :  { %7133 = vsyncpa [#allocation3 + $0x1], 1 }

</bundles_post_ra>
